<compile_context>
chip_gen: v6e
topology: v6e:2x2x1
jax: 0.10.0
libtpu: 0.0.40
codegen_flags: <defaults>
</compile_context>

<pallas_src>
import functools

import jax
import jax.numpy as jnp
from jax import lax
from jax.experimental import pallas as pl
from jax.experimental.pallas import tpu as pltpu


# ----------------------------------------------------------------------------
# Fused LeNet kernel: B images per grid step, everything stays in VMEM/vregs.
# ----------------------------------------------------------------------------
def _lenet_kernel(x_ref, ppad_ref, t1_ref, b1_ref, q1_ref, t2_ref, b2_ref,
                  q2_ref, wf1_ref, bf1_ref, wf2_ref, bf2_ref, wf3_ref,
                  bf3_ref, sel_ref, o_ref):
    f32, bf16 = jnp.float32, jnp.bfloat16

    # ---- vertical zero-padding (2 rows top/bottom per image) as one exact
    #      0/1 row-placement matmul:  (B*32, B*28) @ (B*28, 28) -> (B*32, 28)
    x = x_ref[...].astype(bf16)
    xp = jnp.dot(ppad_ref[...], x, preferred_element_type=f32).astype(bf16)

    # ---- conv1 (5x5, pad=2 folded into T1): 5 row-shifted Toeplitz matmuls.
    #      Rows b*32 + y (y < 28) of the accumulator are the valid outputs.
    m1 = xp.shape[0] - 4
    acc = jnp.dot(xp[0:m1], t1_ref[0], preferred_element_type=f32)
    for di in range(1, 5):
        acc = acc + jnp.dot(xp[di:di + m1], t1_ref[di],
                            preferred_element_type=f32)
    a1 = jnp.maximum(acc + b1_ref[...], 0.0).astype(bf16)        # (B*32-4, 168)

    # ---- 2x2 avg pool #1: rows via exact block-diag 0.5-selector; columns
    #      were folded into T2' at init.
    r1 = jnp.dot(q1_ref[...], a1, preferred_element_type=f32).astype(bf16)   # (B*14, 168)

    # ---- conv2 (5x5, valid): 5 row-shifted matmuls with K = 168.
    m2 = r1.shape[0] - 4
    acc = jnp.dot(r1[0:m2], t2_ref[0], preferred_element_type=f32)
    for di in range(1, 5):
        acc = acc + jnp.dot(r1[di:di + m2], t2_ref[di],
                            preferred_element_type=f32)
    a2 = jnp.maximum(acc + b2_ref[...], 0.0).astype(bf16)        # (B*14-4, 160)

    # ---- 2x2 avg pool #2 rows (columns folded into Wf1')
    r2 = jnp.dot(q2_ref[...], a2, preferred_element_type=f32).astype(bf16)   # (B*5, 160)

    # ---- fc1 as 5 row-shifted matmuls (torch flatten order folded into Wf1').
    #      Only rows b*5 are real images; the 4 garbage rows per image are
    #      carried through fc2/fc3 (negligible flops) and dropped at the end.
    m3 = r2.shape[0] - 4
    h = jnp.dot(r2[0:m3], wf1_ref[0], preferred_element_type=f32)
    for r in range(1, 5):
        h = h + jnp.dot(r2[r:r + m3], wf1_ref[r], preferred_element_type=f32)
    h = jnp.maximum(h + bf1_ref[...], 0.0).astype(bf16)          # (B*5-4, 120)

    # ---- fc2 + ReLU
    h = jnp.maximum(jnp.dot(h, wf2_ref[...], preferred_element_type=f32)
                    + bf2_ref[...], 0.0).astype(bf16)            # (B*5-4, 84)

    # ---- fc3 (weights/bias zero-padded to 128 output lanes)
    logits = jnp.dot(h, wf3_ref[...], preferred_element_type=f32) + bf3_ref[...]

    # ---- pick row b*5 for image b: exact f32 0/1 selection -> dense (B,128)
    o_ref[...] = jnp.dot(sel_ref[...], logits, preferred_element_type=f32)


# ----------------------------------------------------------------------------
# Wrapper
# ----------------------------------------------------------------------------
@functools.partial(jax.jit, static_argnames=("num_classes", "images_per_step"))
def lenet_forward(x_nchw, operands, num_classes=10, images_per_step=8):
    """x_nchw: (N, 1, 28, 28) -> logits (N, num_classes)."""
    B = images_per_step
    assert B % 8 == 0, "images_per_step must be a multiple of 8 (dense stores)"
    assert x_nchw.shape[1:] == (1, 28, 28)
    N = x_nchw.shape[0]
    n_pad = (-N) % B
    x = x_nchw.reshape(N, 28, 28).astype(jnp.float32)
    if n_pad:                                    # only when N % B != 0
        x = jnp.pad(x, ((0, n_pad), (0, 0), (0, 0)))
    npad = N + n_pad
    x2d = x.reshape(npad * 28, 28)               # free view; rows contiguous per image

    def rep(a):  # full-array block, same block every step -> VMEM-resident
        nd = a.ndim
        return pl.BlockSpec(a.shape, lambda i: (0,) * nd)

    out = pl.pallas_call(
        _lenet_kernel,
        out_shape=jax.ShapeDtypeStruct((npad, 128), jnp.float32),
        grid=(npad // B,),
        in_specs=[pl.BlockSpec((B * 28, 28), lambda i: (i, 0))] +
                 [rep(a) for a in operands],
        out_specs=pl.BlockSpec((B, 128), lambda i: (i, 0)),
        compiler_params=pltpu.CompilerParams(
            dimension_semantics=("parallel",)),   # batch axis across TCs (v7x)
    )(x2d, *operands)

    return out[:N, :num_classes]


# ----------------------------------------------------------------------------
# One-time (init) weight preprocessing.
# ----------------------------------------------------------------------------
def conv_to_row_toeplitz(w, w_in, pad=0):
    """w: (co, ci, kh, kw) torch conv weight -> T: (kh, w_in*ci, w_out*co) with
    the horizontal (same-)padding folded in, so
        out[y, x*co + o] = sum_di  X[y+di, :] @ T[di]
    where X rows are the *vertically padded* image rows and columns are the
    (x, ci)-interleaved lanes."""
    co, ci, kh, kw = w.shape
    w_out = w_in + 2 * pad - kw + 1
    wt = jnp.transpose(w.astype(jnp.float32), (2, 3, 1, 0))        # (kh, kw, ci, co)
    xin = jnp.arange(w_in)[:, None]
    x = jnp.arange(w_out)[None, :]
    dj = xin - x + pad
    valid = (dj >= 0) & (dj < kw)
    T = wt[:, jnp.clip(dj, 0, kw - 1), :, :]                       # (kh, w_in, w_out, ci, co)
    T = jnp.where(valid[None, :, :, None, None], T, 0.0)
    T = jnp.transpose(T, (0, 1, 3, 2, 4))                          # (kh, w_in, ci, w_out, co)
    return T.reshape(kh, w_in * ci, w_out * co)


def avg_pool_row_matrix(h_in):
    h_out = h_in // 2
    rows = jnp.arange(h_out)[:, None]
    cols = jnp.arange(h_in)[None, :]
    return 0.5 * ((cols == 2 * rows) | (cols == 2 * rows + 1)).astype(jnp.float32)


def avg_pool_col_matrix(w_in, c):
    """(w_in*c, (w_in//2)*c): pools the interleaved (x, c) lane layout over x."""
    return jnp.kron(avg_pool_row_matrix(w_in).T, jnp.eye(c, dtype=jnp.float32))


def make_pad_placement(B, h=28, pad=2):
    """(B*(h+2p), B*h) 0/1 matrix scattering each image's h rows into rows
    [pad, pad+h) of its (h+2p)-row padded block (vertical zero padding)."""
    hp = h + 2 * pad
    rows = jnp.arange(B * hp)
    b, q = rows // hp, rows % hp
    t = q - pad
    valid = (t >= 0) & (t < h)
    tgt = b * h + jnp.clip(t, 0, h - 1)
    cols = jnp.arange(B * h)[None, :]
    return ((cols == tgt[:, None]) & valid[:, None]).astype(jnp.float32)


def make_pool_row_selector(B, in_block, out_per_img, in_total):
    """(B*out_per_img, in_total) block-diag matrix with 0.5 at input rows
    {b*in_block + 2i, b*in_block + 2i + 1} for output row b*out_per_img + i."""
    rows = jnp.arange(B * out_per_img)
    b, i = rows // out_per_img, rows % out_per_img
    c0 = (b * in_block + 2 * i)[:, None]
    cols = jnp.arange(in_total)[None, :]
    return 0.5 * ((cols == c0) | (cols == c0 + 1)).astype(jnp.float32)


def make_image_row_selector(B, in_block, in_total):
    """(B, in_total) 0/1 matrix picking row b*in_block for image b."""
    rows = jnp.arange(B)[:, None]
    cols = jnp.arange(in_total)[None, :]
    return (cols == rows * in_block).astype(jnp.float32)


def prepare_kernel_operands(raw, images_per_step=8):
    B = images_per_step
    bf16 = jnp.bfloat16
    nc = raw["Wf3"].shape[0]
    assert nc <= 128

    T1 = conv_to_row_toeplitz(raw["W1"], w_in=28, pad=2)            # (5, 28, 168)
    T2 = conv_to_row_toeplitz(raw["W2"], w_in=14, pad=0)            # (5, 84, 160)
    Px1 = avg_pool_col_matrix(28, 6)                                # (168, 84)
    Px2 = avg_pool_col_matrix(10, 16)                               # (160, 80)
    T2f = jnp.einsum("pk,dkn->dpn", Px1, T2)                        # (5, 168, 160)

    # torch flatten index = c*25 + h*5 + w  ->  slab (row h, lane w*16 + c)
    Wf1_slab = jnp.transpose(raw["Wf1"].reshape(120, 16, 5, 5),
                             (2, 3, 1, 0)).reshape(5, 80, 120)
    Wf1f = jnp.einsum("pk,dkn->dpn", Px2, Wf1_slab)                 # (5, 160, 120)

    b1t = jnp.tile(raw["b1"], 28)[None, :]                          # (1, 168)
    b2t = jnp.tile(raw["b2"], 10)[None, :]                          # (1, 160)
    bf1 = raw["bf1"][None, :]                                       # (1, 120)
    Wf2 = raw["Wf2"].T                                              # (120, 84)
    bf2 = raw["bf2"][None, :]                                       # (1, 84)
    Wf3p = jnp.zeros((84, 128), jnp.float32).at[:, :nc].set(raw["Wf3"].T)
    bf3p = jnp.zeros((1, 128), jnp.float32).at[0, :nc].set(raw["bf3"])

    Ppad = make_pad_placement(B, h=28, pad=2)                       # (B*32, B*28)
    Q1 = make_pool_row_selector(B, 32, 14, B * 32 - 4)              # (B*14, B*32-4)
    Q2 = make_pool_row_selector(B, 14, 5, B * 14 - 4)               # (B*5,  B*14-4)
    Sel = make_image_row_selector(B, 5, B * 5 - 4)                  # (B,    B*5-4)

    # MXU operands in bf16; biases and the exact final row-select stay f32.
    return (Ppad.astype(bf16), T1.astype(bf16), b1t, Q1.astype(bf16),
            T2f.astype(bf16), b2t, Q2.astype(bf16), Wf1f.astype(bf16), bf1,
            Wf2.astype(bf16), bf2, Wf3p.astype(bf16), bf3p, Sel)


# ----------------------------------------------------------------------------
# Deterministic synthetic parameters (torch layouts; truncated-normal weights
# like the module's _init_weights, default-style uniform biases)
# ----------------------------------------------------------------------------
def _trunc_normal(key, shape, threshold=0.2):
    return jax.random.truncated_normal(key, -threshold, threshold, shape, jnp.float32)


def _bias(key, shape, fan_in):
    bound = 1.0 / jnp.sqrt(jnp.float32(fan_in))
    return jax.random.uniform(key, shape, jnp.float32, -bound, bound)


def init_params(key, num_classes=10):
    ks = jax.random.split(key, 10)
    return dict(
        W1=_trunc_normal(ks[0], (6, 1, 5, 5)),   b1=_bias(ks[1], (6,), 25),
        W2=_trunc_normal(ks[2], (16, 6, 5, 5)),  b2=_bias(ks[3], (16,), 150),
        Wf1=_trunc_normal(ks[4], (120, 400)),    bf1=_bias(ks[5], (120,), 400),
        Wf2=_trunc_normal(ks[6], (84, 120)),     bf2=_bias(ks[7], (84,), 120),
        Wf3=_trunc_normal(ks[8], (num_classes, 84)), bf3=_bias(ks[9], (num_classes,), 84),
    )


# ----------------------------------------------------------------------------
# Pure-JAX reference (mirrors the PyTorch module) for the correctness check
# ----------------------------------------------------------------------------
def lenet_reference(x_nchw, raw):
    x = x_nchw.astype(jnp.float32)
    dn = ("NCHW", "OIHW", "NCHW")
    y = lax.conv_general_dilated(x, raw["W1"], (1, 1), ((2, 2), (2, 2)),
                                 dimension_numbers=dn)
    y = jax.nn.relu(y + raw["b1"][None, :, None, None])
    y = lax.reduce_window(y, 0.0, lax.add, (1, 1, 2, 2), (1, 1, 2, 2), "VALID") * 0.25
    y = lax.conv_general_dilated(y, raw["W2"], (1, 1), "VALID", dimension_numbers=dn)
    y = jax.nn.relu(y + raw["b2"][None, :, None, None])
    y = lax.reduce_window(y, 0.0, lax.add, (1, 1, 2, 2), (1, 1, 2, 2), "VALID") * 0.25
    f = y.reshape(y.shape[0], -1)
    h = jax.nn.relu(f @ raw["Wf1"].T + raw["bf1"])
    h = jax.nn.relu(h @ raw["Wf2"].T + raw["bf2"])
    return h @ raw["Wf3"].T + raw["bf3"]


if __name__ == "__main__":
    key = jax.random.PRNGKey(0)
    kx, kp = jax.random.split(key)
    num_classes = 10
    B = 8                                   # images per grid step
    raw = init_params(kp, num_classes=num_classes)
    operands = prepare_kernel_operands(raw, images_per_step=B)

    # small spec-consistent shape (N=2, zero-padded to one 8-image step) plus
    # a multi-step case (N=24 -> grid=3) exercising the batched path.
    for n in (2, 24):
        x = jax.random.normal(jax.random.fold_in(kx, n), (n, 1, 28, 28), jnp.float32)
        out = jax.block_until_ready(
            lenet_forward(x, operands, num_classes=num_classes, images_per_step=B))
        assert out.shape == (n, num_classes) and out.dtype == jnp.float32
        ref = lenet_reference(x, raw)
        err = float(jnp.max(jnp.abs(out - ref)))
        # tolerance sized for bf16 MXU operands with f32 accumulation
        assert jnp.allclose(out, ref, atol=4e-2, rtol=4e-2), f"max abs err {err}"
    print("KERNEL_OK")
</pallas_src>

<mosaic_0001>
module attributes {stable_mosaic.version = 11 : i64} {
  func.func @_lenet_kernel(%arg0: i32, %arg1: memref<224x28xf32, #tpu.memory_space<vmem>>, %arg2: memref<256x224xbf16, #tpu.memory_space<vmem>>, %arg3: memref<5x28x168xbf16, #tpu.memory_space<vmem>>, %arg4: memref<1x168xf32, #tpu.memory_space<vmem>>, %arg5: memref<112x252xbf16, #tpu.memory_space<vmem>>, %arg6: memref<5x168x160xbf16, #tpu.memory_space<vmem>>, %arg7: memref<1x160xf32, #tpu.memory_space<vmem>>, %arg8: memref<40x108xbf16, #tpu.memory_space<vmem>>, %arg9: memref<5x160x120xbf16, #tpu.memory_space<vmem>>, %arg10: memref<1x120xf32, #tpu.memory_space<vmem>>, %arg11: memref<120x84xbf16, #tpu.memory_space<vmem>>, %arg12: memref<1x84xf32, #tpu.memory_space<vmem>>, %arg13: memref<84x128xbf16, #tpu.memory_space<vmem>>, %arg14: memref<1x128xf32, #tpu.memory_space<vmem>>, %arg15: memref<8x36xf32, #tpu.memory_space<vmem>>, %arg16: memref<8x128xf32, #tpu.memory_space<vmem>>) attributes {dimension_semantics = [#tpu.dimension_semantics<parallel>], iteration_bounds = array<i64: 1>, scalar_prefetch = 0 : i64, scratch_operands = 0 : i64, tpu.core_type = #tpu.core_type<tc>, window_params = [{transform_indices = @transform_0, window_bounds = array<i64: 224, 28>}, {pipeline_mode = #tpu.pipeline_mode<synchronous>, transform_indices = @transform_1, window_bounds = array<i64: 256, 224>}, {pipeline_mode = #tpu.pipeline_mode<synchronous>, transform_indices = @transform_2, window_bounds = array<i64: 5, 28, 168>}, {pipeline_mode = #tpu.pipeline_mode<synchronous>, transform_indices = @transform_3, window_bounds = array<i64: 1, 168>}, {pipeline_mode = #tpu.pipeline_mode<synchronous>, transform_indices = @transform_4, window_bounds = array<i64: 112, 252>}, {pipeline_mode = #tpu.pipeline_mode<synchronous>, transform_indices = @transform_5, window_bounds = array<i64: 5, 168, 160>}, {pipeline_mode = #tpu.pipeline_mode<synchronous>, transform_indices = @transform_6, window_bounds = array<i64: 1, 160>}, {pipeline_mode = #tpu.pipeline_mode<synchronous>, transform_indices = @transform_7, window_bounds = array<i64: 40, 108>}, {pipeline_mode = #tpu.pipeline_mode<synchronous>, transform_indices = @transform_8, window_bounds = array<i64: 5, 160, 120>}, {pipeline_mode = #tpu.pipeline_mode<synchronous>, transform_indices = @transform_9, window_bounds = array<i64: 1, 120>}, {pipeline_mode = #tpu.pipeline_mode<synchronous>, transform_indices = @transform_10, window_bounds = array<i64: 120, 84>}, {pipeline_mode = #tpu.pipeline_mode<synchronous>, transform_indices = @transform_11, window_bounds = array<i64: 1, 84>}, {pipeline_mode = #tpu.pipeline_mode<synchronous>, transform_indices = @transform_12, window_bounds = array<i64: 84, 128>}, {pipeline_mode = #tpu.pipeline_mode<synchronous>, transform_indices = @transform_13, window_bounds = array<i64: 1, 128>}, {pipeline_mode = #tpu.pipeline_mode<synchronous>, transform_indices = @transform_14, window_bounds = array<i64: 8, 36>}, {transform_indices = @transform_15, window_bounds = array<i64: 8, 128>}]} {
    %c0 = arith.constant 0 : index
    %c0_0 = arith.constant 0 : index
    %0 = vector.load %arg1[%c0, %c0_0] : memref<224x28xf32, #tpu.memory_space<vmem>>, vector<224x28xf32>
    %1 = arith.truncf %0 : vector<224x28xf32> to vector<224x28xbf16>
    %c0_1 = arith.constant 0 : index
    %c0_2 = arith.constant 0 : index
    %2 = vector.load %arg2[%c0_1, %c0_2] : memref<256x224xbf16, #tpu.memory_space<vmem>>, vector<256x224xbf16>
    %cst = arith.constant dense<0.000000e+00> : vector<256x28xf32>
    %3 = tpu.matmul %2, %1, %cst {dimension_numbers = #tpu.dot_dimension_numbers<[1], [0], [0], [1], [0, 0, 1, 1], [], []>} : vector<256x224xbf16>, vector<224x28xbf16>, vector<256x28xf32> -> vector<256x28xf32>
    %4 = arith.truncf %3 : vector<256x28xf32> to vector<256x28xbf16>
    %5 = vector.extract_strided_slice %4 {offsets = [0, 0], sizes = [252, 28], strides = [1, 1]} : vector<256x28xbf16> to vector<252x28xbf16>
    %c0_3 = arith.constant 0 : index
    %c0_4 = arith.constant 0 : index
    %c0_5 = arith.constant 0 : index
    %6 = vector.load %arg3[%c0_3, %c0_4, %c0_5] : memref<5x28x168xbf16, #tpu.memory_space<vmem>>, vector<1x28x168xbf16>
    %7 = vector.shape_cast %6 : vector<1x28x168xbf16> to vector<28x168xbf16>
    %cst_6 = arith.constant dense<0.000000e+00> : vector<252x168xf32>
    %8 = tpu.matmul %5, %7, %cst_6 {dimension_numbers = #tpu.dot_dimension_numbers<[1], [0], [0], [1], [0, 0, 1, 1], [], []>} : vector<252x28xbf16>, vector<28x168xbf16>, vector<252x168xf32> -> vector<252x168xf32>
    %9 = vector.extract_strided_slice %4 {offsets = [1, 0], sizes = [252, 28], strides = [1, 1]} : vector<256x28xbf16> to vector<252x28xbf16>
    %c1 = arith.constant 1 : index
    %c0_7 = arith.constant 0 : index
    %c0_8 = arith.constant 0 : index
    %10 = vector.load %arg3[%c1, %c0_7, %c0_8] : memref<5x28x168xbf16, #tpu.memory_space<vmem>>, vector<1x28x168xbf16>
    %11 = vector.shape_cast %10 : vector<1x28x168xbf16> to vector<28x168xbf16>
    %cst_9 = arith.constant dense<0.000000e+00> : vector<252x168xf32>
    %12 = tpu.matmul %9, %11, %cst_9 {dimension_numbers = #tpu.dot_dimension_numbers<[1], [0], [0], [1], [0, 0, 1, 1], [], []>} : vector<252x28xbf16>, vector<28x168xbf16>, vector<252x168xf32> -> vector<252x168xf32>
    %13 = arith.addf %8, %12 : vector<252x168xf32>
    %14 = vector.extract_strided_slice %4 {offsets = [2, 0], sizes = [252, 28], strides = [1, 1]} : vector<256x28xbf16> to vector<252x28xbf16>
    %c2 = arith.constant 2 : index
    %c0_10 = arith.constant 0 : index
    %c0_11 = arith.constant 0 : index
    %15 = vector.load %arg3[%c2, %c0_10, %c0_11] : memref<5x28x168xbf16, #tpu.memory_space<vmem>>, vector<1x28x168xbf16>
    %16 = vector.shape_cast %15 : vector<1x28x168xbf16> to vector<28x168xbf16>
    %cst_12 = arith.constant dense<0.000000e+00> : vector<252x168xf32>
    %17 = tpu.matmul %14, %16, %cst_12 {dimension_numbers = #tpu.dot_dimension_numbers<[1], [0], [0], [1], [0, 0, 1, 1], [], []>} : vector<252x28xbf16>, vector<28x168xbf16>, vector<252x168xf32> -> vector<252x168xf32>
    %18 = arith.addf %13, %17 : vector<252x168xf32>
    %19 = vector.extract_strided_slice %4 {offsets = [3, 0], sizes = [252, 28], strides = [1, 1]} : vector<256x28xbf16> to vector<252x28xbf16>
    %c3 = arith.constant 3 : index
    %c0_13 = arith.constant 0 : index
    %c0_14 = arith.constant 0 : index
    %20 = vector.load %arg3[%c3, %c0_13, %c0_14] : memref<5x28x168xbf16, #tpu.memory_space<vmem>>, vector<1x28x168xbf16>
    %21 = vector.shape_cast %20 : vector<1x28x168xbf16> to vector<28x168xbf16>
    %cst_15 = arith.constant dense<0.000000e+00> : vector<252x168xf32>
    %22 = tpu.matmul %19, %21, %cst_15 {dimension_numbers = #tpu.dot_dimension_numbers<[1], [0], [0], [1], [0, 0, 1, 1], [], []>} : vector<252x28xbf16>, vector<28x168xbf16>, vector<252x168xf32> -> vector<252x168xf32>
    %23 = arith.addf %18, %22 : vector<252x168xf32>
    %24 = vector.extract_strided_slice %4 {offsets = [4, 0], sizes = [252, 28], strides = [1, 1]} : vector<256x28xbf16> to vector<252x28xbf16>
    %c4 = arith.constant 4 : index
    %c0_16 = arith.constant 0 : index
    %c0_17 = arith.constant 0 : index
    %25 = vector.load %arg3[%c4, %c0_16, %c0_17] : memref<5x28x168xbf16, #tpu.memory_space<vmem>>, vector<1x28x168xbf16>
    %26 = vector.shape_cast %25 : vector<1x28x168xbf16> to vector<28x168xbf16>
    %cst_18 = arith.constant dense<0.000000e+00> : vector<252x168xf32>
    %27 = tpu.matmul %24, %26, %cst_18 {dimension_numbers = #tpu.dot_dimension_numbers<[1], [0], [0], [1], [0, 0, 1, 1], [], []>} : vector<252x28xbf16>, vector<28x168xbf16>, vector<252x168xf32> -> vector<252x168xf32>
    %28 = arith.addf %23, %27 : vector<252x168xf32>
    %c0_19 = arith.constant 0 : index
    %c0_20 = arith.constant 0 : index
    %29 = vector.load %arg4[%c0_19, %c0_20] : memref<1x168xf32, #tpu.memory_space<vmem>>, vector<1x168xf32>
    %30 = vector.broadcast %29 : vector<1x168xf32> to vector<252x168xf32>
    %31 = arith.addf %28, %30 : vector<252x168xf32>
    %cst_21 = arith.constant 0.000000e+00 : f32
    %32 = vector.broadcast %cst_21 : f32 to vector<252x168xf32>
    %33 = arith.maximumf %31, %32 : vector<252x168xf32>
    %34 = arith.truncf %33 : vector<252x168xf32> to vector<252x168xbf16>
    %c0_22 = arith.constant 0 : index
    %c0_23 = arith.constant 0 : index
    %35 = vector.load %arg5[%c0_22, %c0_23] : memref<112x252xbf16, #tpu.memory_space<vmem>>, vector<112x252xbf16>
    %cst_24 = arith.constant dense<0.000000e+00> : vector<112x168xf32>
    %36 = tpu.matmul %35, %34, %cst_24 {dimension_numbers = #tpu.dot_dimension_numbers<[1], [0], [0], [1], [0, 0, 1, 1], [], []>} : vector<112x252xbf16>, vector<252x168xbf16>, vector<112x168xf32> -> vector<112x168xf32>
    %37 = arith.truncf %36 : vector<112x168xf32> to vector<112x168xbf16>
    %38 = vector.extract_strided_slice %37 {offsets = [0, 0], sizes = [108, 168], strides = [1, 1]} : vector<112x168xbf16> to vector<108x168xbf16>
    %c0_25 = arith.constant 0 : index
    %c0_26 = arith.constant 0 : index
    %c0_27 = arith.constant 0 : index
    %39 = vector.load %arg6[%c0_25, %c0_26, %c0_27] : memref<5x168x160xbf16, #tpu.memory_space<vmem>>, vector<1x168x160xbf16>
    %40 = vector.shape_cast %39 : vector<1x168x160xbf16> to vector<168x160xbf16>
    %cst_28 = arith.constant dense<0.000000e+00> : vector<108x160xf32>
    %41 = tpu.matmul %38, %40, %cst_28 {dimension_numbers = #tpu.dot_dimension_numbers<[1], [0], [0], [1], [0, 0, 1, 1], [], []>} : vector<108x168xbf16>, vector<168x160xbf16>, vector<108x160xf32> -> vector<108x160xf32>
    %42 = vector.extract_strided_slice %37 {offsets = [1, 0], sizes = [108, 168], strides = [1, 1]} : vector<112x168xbf16> to vector<108x168xbf16>
    %c1_29 = arith.constant 1 : index
    %c0_30 = arith.constant 0 : index
    %c0_31 = arith.constant 0 : index
    %43 = vector.load %arg6[%c1_29, %c0_30, %c0_31] : memref<5x168x160xbf16, #tpu.memory_space<vmem>>, vector<1x168x160xbf16>
    %44 = vector.shape_cast %43 : vector<1x168x160xbf16> to vector<168x160xbf16>
    %cst_32 = arith.constant dense<0.000000e+00> : vector<108x160xf32>
    %45 = tpu.matmul %42, %44, %cst_32 {dimension_numbers = #tpu.dot_dimension_numbers<[1], [0], [0], [1], [0, 0, 1, 1], [], []>} : vector<108x168xbf16>, vector<168x160xbf16>, vector<108x160xf32> -> vector<108x160xf32>
    %46 = arith.addf %41, %45 : vector<108x160xf32>
    %47 = vector.extract_strided_slice %37 {offsets = [2, 0], sizes = [108, 168], strides = [1, 1]} : vector<112x168xbf16> to vector<108x168xbf16>
    %c2_33 = arith.constant 2 : index
    %c0_34 = arith.constant 0 : index
    %c0_35 = arith.constant 0 : index
    %48 = vector.load %arg6[%c2_33, %c0_34, %c0_35] : memref<5x168x160xbf16, #tpu.memory_space<vmem>>, vector<1x168x160xbf16>
    %49 = vector.shape_cast %48 : vector<1x168x160xbf16> to vector<168x160xbf16>
    %cst_36 = arith.constant dense<0.000000e+00> : vector<108x160xf32>
    %50 = tpu.matmul %47, %49, %cst_36 {dimension_numbers = #tpu.dot_dimension_numbers<[1], [0], [0], [1], [0, 0, 1, 1], [], []>} : vector<108x168xbf16>, vector<168x160xbf16>, vector<108x160xf32> -> vector<108x160xf32>
    %51 = arith.addf %46, %50 : vector<108x160xf32>
    %52 = vector.extract_strided_slice %37 {offsets = [3, 0], sizes = [108, 168], strides = [1, 1]} : vector<112x168xbf16> to vector<108x168xbf16>
    %c3_37 = arith.constant 3 : index
    %c0_38 = arith.constant 0 : index
    %c0_39 = arith.constant 0 : index
    %53 = vector.load %arg6[%c3_37, %c0_38, %c0_39] : memref<5x168x160xbf16, #tpu.memory_space<vmem>>, vector<1x168x160xbf16>
    %54 = vector.shape_cast %53 : vector<1x168x160xbf16> to vector<168x160xbf16>
    %cst_40 = arith.constant dense<0.000000e+00> : vector<108x160xf32>
    %55 = tpu.matmul %52, %54, %cst_40 {dimension_numbers = #tpu.dot_dimension_numbers<[1], [0], [0], [1], [0, 0, 1, 1], [], []>} : vector<108x168xbf16>, vector<168x160xbf16>, vector<108x160xf32> -> vector<108x160xf32>
    %56 = arith.addf %51, %55 : vector<108x160xf32>
    %57 = vector.extract_strided_slice %37 {offsets = [4, 0], sizes = [108, 168], strides = [1, 1]} : vector<112x168xbf16> to vector<108x168xbf16>
    %c4_41 = arith.constant 4 : index
    %c0_42 = arith.constant 0 : index
    %c0_43 = arith.constant 0 : index
    %58 = vector.load %arg6[%c4_41, %c0_42, %c0_43] : memref<5x168x160xbf16, #tpu.memory_space<vmem>>, vector<1x168x160xbf16>
    %59 = vector.shape_cast %58 : vector<1x168x160xbf16> to vector<168x160xbf16>
    %cst_44 = arith.constant dense<0.000000e+00> : vector<108x160xf32>
    %60 = tpu.matmul %57, %59, %cst_44 {dimension_numbers = #tpu.dot_dimension_numbers<[1], [0], [0], [1], [0, 0, 1, 1], [], []>} : vector<108x168xbf16>, vector<168x160xbf16>, vector<108x160xf32> -> vector<108x160xf32>
    %61 = arith.addf %56, %60 : vector<108x160xf32>
    %c0_45 = arith.constant 0 : index
    %c0_46 = arith.constant 0 : index
    %62 = vector.load %arg7[%c0_45, %c0_46] : memref<1x160xf32, #tpu.memory_space<vmem>>, vector<1x160xf32>
    %63 = vector.broadcast %62 : vector<1x160xf32> to vector<108x160xf32>
    %64 = arith.addf %61, %63 : vector<108x160xf32>
    %cst_47 = arith.constant 0.000000e+00 : f32
    %65 = vector.broadcast %cst_47 : f32 to vector<108x160xf32>
    %66 = arith.maximumf %64, %65 : vector<108x160xf32>
    %67 = arith.truncf %66 : vector<108x160xf32> to vector<108x160xbf16>
    %c0_48 = arith.constant 0 : index
    %c0_49 = arith.constant 0 : index
    %68 = vector.load %arg8[%c0_48, %c0_49] : memref<40x108xbf16, #tpu.memory_space<vmem>>, vector<40x108xbf16>
    %cst_50 = arith.constant dense<0.000000e+00> : vector<40x160xf32>
    %69 = tpu.matmul %68, %67, %cst_50 {dimension_numbers = #tpu.dot_dimension_numbers<[1], [0], [0], [1], [0, 0, 1, 1], [], []>} : vector<40x108xbf16>, vector<108x160xbf16>, vector<40x160xf32> -> vector<40x160xf32>
    %70 = arith.truncf %69 : vector<40x160xf32> to vector<40x160xbf16>
    %71 = vector.extract_strided_slice %70 {offsets = [0, 0], sizes = [36, 160], strides = [1, 1]} : vector<40x160xbf16> to vector<36x160xbf16>
    %c0_51 = arith.constant 0 : index
    %c0_52 = arith.constant 0 : index
    %c0_53 = arith.constant 0 : index
    %72 = vector.load %arg9[%c0_51, %c0_52, %c0_53] : memref<5x160x120xbf16, #tpu.memory_space<vmem>>, vector<1x160x120xbf16>
    %73 = vector.shape_cast %72 : vector<1x160x120xbf16> to vector<160x120xbf16>
    %cst_54 = arith.constant dense<0.000000e+00> : vector<36x120xf32>
    %74 = tpu.matmul %71, %73, %cst_54 {dimension_numbers = #tpu.dot_dimension_numbers<[1], [0], [0], [1], [0, 0, 1, 1], [], []>} : vector<36x160xbf16>, vector<160x120xbf16>, vector<36x120xf32> -> vector<36x120xf32>
    %75 = vector.extract_strided_slice %70 {offsets = [1, 0], sizes = [36, 160], strides = [1, 1]} : vector<40x160xbf16> to vector<36x160xbf16>
    %c1_55 = arith.constant 1 : index
    %c0_56 = arith.constant 0 : index
    %c0_57 = arith.constant 0 : index
    %76 = vector.load %arg9[%c1_55, %c0_56, %c0_57] : memref<5x160x120xbf16, #tpu.memory_space<vmem>>, vector<1x160x120xbf16>
    %77 = vector.shape_cast %76 : vector<1x160x120xbf16> to vector<160x120xbf16>
    %cst_58 = arith.constant dense<0.000000e+00> : vector<36x120xf32>
    %78 = tpu.matmul %75, %77, %cst_58 {dimension_numbers = #tpu.dot_dimension_numbers<[1], [0], [0], [1], [0, 0, 1, 1], [], []>} : vector<36x160xbf16>, vector<160x120xbf16>, vector<36x120xf32> -> vector<36x120xf32>
    %79 = arith.addf %74, %78 : vector<36x120xf32>
    %80 = vector.extract_strided_slice %70 {offsets = [2, 0], sizes = [36, 160], strides = [1, 1]} : vector<40x160xbf16> to vector<36x160xbf16>
    %c2_59 = arith.constant 2 : index
    %c0_60 = arith.constant 0 : index
    %c0_61 = arith.constant 0 : index
    %81 = vector.load %arg9[%c2_59, %c0_60, %c0_61] : memref<5x160x120xbf16, #tpu.memory_space<vmem>>, vector<1x160x120xbf16>
    %82 = vector.shape_cast %81 : vector<1x160x120xbf16> to vector<160x120xbf16>
    %cst_62 = arith.constant dense<0.000000e+00> : vector<36x120xf32>
    %83 = tpu.matmul %80, %82, %cst_62 {dimension_numbers = #tpu.dot_dimension_numbers<[1], [0], [0], [1], [0, 0, 1, 1], [], []>} : vector<36x160xbf16>, vector<160x120xbf16>, vector<36x120xf32> -> vector<36x120xf32>
    %84 = arith.addf %79, %83 : vector<36x120xf32>
    %85 = vector.extract_strided_slice %70 {offsets = [3, 0], sizes = [36, 160], strides = [1, 1]} : vector<40x160xbf16> to vector<36x160xbf16>
    %c3_63 = arith.constant 3 : index
    %c0_64 = arith.constant 0 : index
    %c0_65 = arith.constant 0 : index
    %86 = vector.load %arg9[%c3_63, %c0_64, %c0_65] : memref<5x160x120xbf16, #tpu.memory_space<vmem>>, vector<1x160x120xbf16>
    %87 = vector.shape_cast %86 : vector<1x160x120xbf16> to vector<160x120xbf16>
    %cst_66 = arith.constant dense<0.000000e+00> : vector<36x120xf32>
    %88 = tpu.matmul %85, %87, %cst_66 {dimension_numbers = #tpu.dot_dimension_numbers<[1], [0], [0], [1], [0, 0, 1, 1], [], []>} : vector<36x160xbf16>, vector<160x120xbf16>, vector<36x120xf32> -> vector<36x120xf32>
    %89 = arith.addf %84, %88 : vector<36x120xf32>
    %90 = vector.extract_strided_slice %70 {offsets = [4, 0], sizes = [36, 160], strides = [1, 1]} : vector<40x160xbf16> to vector<36x160xbf16>
    %c4_67 = arith.constant 4 : index
    %c0_68 = arith.constant 0 : index
    %c0_69 = arith.constant 0 : index
    %91 = vector.load %arg9[%c4_67, %c0_68, %c0_69] : memref<5x160x120xbf16, #tpu.memory_space<vmem>>, vector<1x160x120xbf16>
    %92 = vector.shape_cast %91 : vector<1x160x120xbf16> to vector<160x120xbf16>
    %cst_70 = arith.constant dense<0.000000e+00> : vector<36x120xf32>
    %93 = tpu.matmul %90, %92, %cst_70 {dimension_numbers = #tpu.dot_dimension_numbers<[1], [0], [0], [1], [0, 0, 1, 1], [], []>} : vector<36x160xbf16>, vector<160x120xbf16>, vector<36x120xf32> -> vector<36x120xf32>
    %94 = arith.addf %89, %93 : vector<36x120xf32>
    %c0_71 = arith.constant 0 : index
    %c0_72 = arith.constant 0 : index
    %95 = vector.load %arg10[%c0_71, %c0_72] : memref<1x120xf32, #tpu.memory_space<vmem>>, vector<1x120xf32>
    %96 = vector.broadcast %95 : vector<1x120xf32> to vector<36x120xf32>
    %97 = arith.addf %94, %96 : vector<36x120xf32>
    %cst_73 = arith.constant 0.000000e+00 : f32
    %98 = vector.broadcast %cst_73 : f32 to vector<36x120xf32>
    %99 = arith.maximumf %97, %98 : vector<36x120xf32>
    %100 = arith.truncf %99 : vector<36x120xf32> to vector<36x120xbf16>
    %c0_74 = arith.constant 0 : index
    %c0_75 = arith.constant 0 : index
    %101 = vector.load %arg11[%c0_74, %c0_75] : memref<120x84xbf16, #tpu.memory_space<vmem>>, vector<120x84xbf16>
    %cst_76 = arith.constant dense<0.000000e+00> : vector<36x84xf32>
    %102 = tpu.matmul %100, %101, %cst_76 {dimension_numbers = #tpu.dot_dimension_numbers<[1], [0], [0], [1], [0, 0, 1, 1], [], []>} : vector<36x120xbf16>, vector<120x84xbf16>, vector<36x84xf32> -> vector<36x84xf32>
    %c0_77 = arith.constant 0 : index
    %c0_78 = arith.constant 0 : index
    %103 = vector.load %arg12[%c0_77, %c0_78] : memref<1x84xf32, #tpu.memory_space<vmem>>, vector<1x84xf32>
    %104 = vector.broadcast %103 : vector<1x84xf32> to vector<36x84xf32>
    %105 = arith.addf %102, %104 : vector<36x84xf32>
    %cst_79 = arith.constant 0.000000e+00 : f32
    %106 = vector.broadcast %cst_79 : f32 to vector<36x84xf32>
    %107 = arith.maximumf %105, %106 : vector<36x84xf32>
    %108 = arith.truncf %107 : vector<36x84xf32> to vector<36x84xbf16>
    %c0_80 = arith.constant 0 : index
    %c0_81 = arith.constant 0 : index
    %109 = vector.load %arg13[%c0_80, %c0_81] : memref<84x128xbf16, #tpu.memory_space<vmem>>, vector<84x128xbf16>
    %cst_82 = arith.constant dense<0.000000e+00> : vector<36x128xf32>
    %110 = tpu.matmul %108, %109, %cst_82 {dimension_numbers = #tpu.dot_dimension_numbers<[1], [0], [0], [1], [0, 0, 1, 1], [], []>} : vector<36x84xbf16>, vector<84x128xbf16>, vector<36x128xf32> -> vector<36x128xf32>
    %c0_83 = arith.constant 0 : index
    %c0_84 = arith.constant 0 : index
    %111 = vector.load %arg14[%c0_83, %c0_84] : memref<1x128xf32, #tpu.memory_space<vmem>>, vector<1x128xf32>
    %112 = vector.broadcast %111 : vector<1x128xf32> to vector<36x128xf32>
    %113 = arith.addf %110, %112 : vector<36x128xf32>
    %c0_85 = arith.constant 0 : index
    %c0_86 = arith.constant 0 : index
    %114 = vector.load %arg15[%c0_85, %c0_86] : memref<8x36xf32, #tpu.memory_space<vmem>>, vector<8x36xf32>
    %cst_87 = arith.constant dense<0.000000e+00> : vector<8x128xf32>
    %115 = tpu.matmul %114, %113, %cst_87 {dimension_numbers = #tpu.dot_dimension_numbers<[1], [0], [0], [1], [0, 0, 1, 1], [], []>} : vector<8x36xf32>, vector<36x128xf32>, vector<8x128xf32> -> vector<8x128xf32>
    %c0_88 = arith.constant 0 : index
    %c0_89 = arith.constant 0 : index
    %116 = vector.load %arg16[%c0_88, %c0_89] : memref<8x128xf32, #tpu.memory_space<vmem>>, vector<8x128xf32>
    tpu.vector_store %arg16[%c0_88, %c0_89], %115 {strides = array<i32>} : memref<8x128xf32, #tpu.memory_space<vmem>>, vector<8x128xf32>,
    return
  }
  func.func @transform_0(%arg0: i32) -> (i32, i32) {
    %c0_i32 = arith.constant 0 : i32
    %c0_i32_0 = arith.constant 0 : i32
    return %arg0, %c0_i32 : i32, i32
  }
  func.func @transform_1(%arg0: i32) -> (i32, i32) {
    %c0_i32 = arith.constant 0 : i32
    %c0_i32_0 = arith.constant 0 : i32
    %c0_i32_1 = arith.constant 0 : i32
    return %c0_i32, %c0_i32_0 : i32, i32
  }
  func.func @transform_2(%arg0: i32) -> (i32, i32, i32) {
    %c0_i32 = arith.constant 0 : i32
    %c0_i32_0 = arith.constant 0 : i32
    %c0_i32_1 = arith.constant 0 : i32
    %c0_i32_2 = arith.constant 0 : i32
    return %c0_i32, %c0_i32_0, %c0_i32_1 : i32, i32, i32
  }
  func.func @transform_3(%arg0: i32) -> (i32, i32) {
    %c0_i32 = arith.constant 0 : i32
    %c0_i32_0 = arith.constant 0 : i32
    %c0_i32_1 = arith.constant 0 : i32
    return %c0_i32, %c0_i32_0 : i32, i32
  }
  func.func @transform_4(%arg0: i32) -> (i32, i32) {
    %c0_i32 = arith.constant 0 : i32
    %c0_i32_0 = arith.constant 0 : i32
    %c0_i32_1 = arith.constant 0 : i32
    return %c0_i32, %c0_i32_0 : i32, i32
  }
  func.func @transform_5(%arg0: i32) -> (i32, i32, i32) {
    %c0_i32 = arith.constant 0 : i32
    %c0_i32_0 = arith.constant 0 : i32
    %c0_i32_1 = arith.constant 0 : i32
    %c0_i32_2 = arith.constant 0 : i32
    return %c0_i32, %c0_i32_0, %c0_i32_1 : i32, i32, i32
  }
  func.func @transform_6(%arg0: i32) -> (i32, i32) {
    %c0_i32 = arith.constant 0 : i32
    %c0_i32_0 = arith.constant 0 : i32
    %c0_i32_1 = arith.constant 0 : i32
    return %c0_i32, %c0_i32_0 : i32, i32
  }
  func.func @transform_7(%arg0: i32) -> (i32, i32) {
    %c0_i32 = arith.constant 0 : i32
    %c0_i32_0 = arith.constant 0 : i32
    %c0_i32_1 = arith.constant 0 : i32
    return %c0_i32, %c0_i32_0 : i32, i32
  }
  func.func @transform_8(%arg0: i32) -> (i32, i32, i32) {
    %c0_i32 = arith.constant 0 : i32
    %c0_i32_0 = arith.constant 0 : i32
    %c0_i32_1 = arith.constant 0 : i32
    %c0_i32_2 = arith.constant 0 : i32
    return %c0_i32, %c0_i32_0, %c0_i32_1 : i32, i32, i32
  }
  func.func @transform_9(%arg0: i32) -> (i32, i32) {
    %c0_i32 = arith.constant 0 : i32
    %c0_i32_0 = arith.constant 0 : i32
    %c0_i32_1 = arith.constant 0 : i32
    return %c0_i32, %c0_i32_0 : i32, i32
  }
  func.func @transform_10(%arg0: i32) -> (i32, i32) {
    %c0_i32 = arith.constant 0 : i32
    %c0_i32_0 = arith.constant 0 : i32
    %c0_i32_1 = arith.constant 0 : i32
    return %c0_i32, %c0_i32_0 : i32, i32
  }
  func.func @transform_11(%arg0: i32) -> (i32, i32) {
    %c0_i32 = arith.constant 0 : i32
    %c0_i32_0 = arith.constant 0 : i32
    %c0_i32_1 = arith.constant 0 : i32
    return %c0_i32, %c0_i32_0 : i32, i32
  }
  func.func @transform_12(%arg0: i32) -> (i32, i32) {
    %c0_i32 = arith.constant 0 : i32
    %c0_i32_0 = arith.constant 0 : i32
    %c0_i32_1 = arith.constant 0 : i32
    return %c0_i32, %c0_i32_0 : i32, i32
  }
  func.func @transform_13(%arg0: i32) -> (i32, i32) {
    %c0_i32 = arith.constant 0 : i32
    %c0_i32_0 = arith.constant 0 : i32
    %c0_i32_1 = arith.constant 0 : i32
    return %c0_i32, %c0_i32_0 : i32, i32
  }
  func.func @transform_14(%arg0: i32) -> (i32, i32) {
    %c0_i32 = arith.constant 0 : i32
    %c0_i32_0 = arith.constant 0 : i32
    %c0_i32_1 = arith.constant 0 : i32
    return %c0_i32, %c0_i32_0 : i32, i32
  }
  func.func @transform_15(%arg0: i32) -> (i32, i32) {
    %c0_i32 = arith.constant 0 : i32
    %c0_i32_0 = arith.constant 0 : i32
    return %arg0, %c0_i32 : i32, i32
  }
}

</mosaic_0001>

<bundles_post_ra>
// kernel: lenet_forward.1
= control target key start
LH: loop header
LB: loop body
LE: loop exit
PB: predicated region body
PF: predicated region fallthrough
CT: control target
= control target key end

     0   :  { %v9870_v0 = vmov 0   ;;  %vm269_vm0 = vcmask 785408   ;;  %vm699_vm1 = vcmask 1045504   ;;  %vm650_vm2 = vcmask 228352   ;;  %s9853_s0 = inlined_call_operand.vmem [shape: f32[224,28], index: 0, kind: input, shape index: {}]   ;;  %s9854_s1 = inlined_call_operand.vmem [shape: bf16[256,224], index: 1, kind: input, shape index: {}]   ;;  %s9855_s2 = inlined_call_operand.vmem [shape: bf16[5,28,168], index: 2, kind: input, shape index: {}]   ;;  %s9856_s3 = inlined_call_operand.vmem [shape: f32[1,168], index: 3, kind: input, shape index: {}]   ;;  %s9857_s4 = inlined_call_operand.vmem [shape: bf16[112,252], index: 4, kind: input, shape index: {}]   ;;  %s9858_s5 = inlined_call_operand.vmem [shape: bf16[5,168,160], index: 5, kind: input, shape index: {}]   ;;  %s9859_s7 = inlined_call_operand.vmem [shape: bf16[40,108], index: 7, kind: input, shape index: {}]   ;;  %s9860_s8 = inlined_call_operand.vmem [shape: bf16[5,160,120], index: 8, kind: input, shape index: {}]   ;;  %s9861_s6 = inlined_call_operand.vmem [shape: f32[1,160], index: 6, kind: input, shape index: {}]   ;;  %s9862_s10 = inlined_call_operand.vmem [shape: bf16[120,84], index: 10, kind: input, shape index: {}]   ;;  %s9863_s12 = inlined_call_operand.vmem [shape: bf16[84,128], index: 12, kind: input, shape index: {}]   ;;  %s9864_s9 = inlined_call_operand.vmem [shape: f32[1,120], index: 9, kind: input, shape index: {}]   ;;  %s9865_s11 = inlined_call_operand.vmem [shape: f32[1,84], index: 11, kind: input, shape index: {}]   ;;  %s9866_s13 = inlined_call_operand.vmem [shape: f32[1,128], index: 13, kind: input, shape index: {}]   ;;  %s9867_s14 = inlined_call_operand.vmem [shape: f32[8,36], index: 14, kind: input, shape index: {}]   ;;  %s9868_s15 = inlined_call_operand.vmem [shape: f32[8,128], index: 15, kind: output, shape index: {}]  }
   0x1   :  { %318 = vmatprep.subr.bf16.mxu0 %v9870_v0  ;;  %v65_v1 = vld [vmem:[%s9853_s0 + $0x70] sm:$0xff]  ;;  %v66_v2 = vld [vmem:[%s9853_s0 + $0x78] sm:$0xff]  ;;  %v63_v3 = vld [vmem:[%s9853_s0 + $0x60] sm:$0xff]  ;;  %738 = vmatprep.mubr.bf16.mxu1 %v9870_v0  ;;  %vm1169_vm3 = vcmask 1046528   ;;  %vm504_vm4 = vsmask.f32 7424 }
   0x2   :  { %v86_v4 = vpack.c.bf16 %v66_v2, %v65_v1  ;;  %v64_v5 = vld [vmem:[%s9853_s0 + $0x68] sm:$0xff]  ;;  %v61_v7 = vld [vmem:[%s9853_s0 + $0x50] sm:$0xff]  ;;  %v62_v8 = vld [vmem:[%s9853_s0 + $0x58] sm:$0xff]  ;;  %vm1535_vm5 = vsmask.f32 6400  ;;  %vm2543_vm6 = vcmask 1014784  }
   0x3   :  { %v85_v6 = vpack.c.bf16 %v64_v5, %v63_v3  ;;  %v84_v9 = vpack.c.bf16 %v62_v8, %v61_v7  ;;  %v59_v10 = vld [vmem:[%s9853_s0 + $0x40] sm:$0xff]  ;;  %v60_v11 = vld [vmem:[%s9853_s0 + $0x48] sm:$0xff]  ;;  %v57_v14 = vld [vmem:[%s9853_s0 + $0x30] sm:$0xff]  ;;  %vm2975_vm7 = vcmask 1043456   ;;  %vm2953_vm8 = vcmask 326656  }
   0x4   :  { %319 = vmatpush1.bf16.msra.mxu0 %v86_v4  ;;  %v6410_v12 = vld [vmem:[%s9854_s1 + $0x4] ss:$8 sps:$4 sm:$0xff]   ;;  %v83_v13 = vpack.c.bf16 %v60_v11, %v59_v10  ;;  %v58_v15 = vld [vmem:[%s9853_s0 + $0x38] sm:$0xff]  ;;  %v53_v20 = vld [vmem:[%s9853_s0 + $0x10] sm:$0xff]  ;;  %vm4409_vm9 = vcmask 883712   ;;  %vm4642_vm10 = vcmask 261120  }
   0x5   :  { %320 = vmatprep.subr.bf16.mxu0 %v9870_v0  ;;  %5740 = vmatprep.mubr.msk.bf16.mxu0 %vm269_vm0, %v6410_v12  ;;  %v82_v16 = vpack.c.bf16 %v58_v15, %v57_v14  ;;  %v55_v17 = vld [vmem:[%s9853_s0 + $0x20] sm:$0xff]  ;;  %v56_v18 = vld [vmem:[%s9853_s0 + $0x28] sm:$0xff]  ;;  %v54_v21 = vld [vmem:[%s9853_s0 + $0x18] sm:$0xff]  ;;  %vm6736_vm11 = vmmov 0   ;;  %vm5565_vm12 = vcmask 1041408   ;;  %vm5427_vm13 = vcmask 982016  }
   0x6   :  { %v81_v19 = vpack.c.bf16 %v56_v18, %v55_v17  ;;  %v80_v22 = vpack.c.bf16 %v54_v21, %v53_v20  ;;  %v51_v23 = vld [vmem:[%s9853_s0] sm:$0xff]  ;;  %v52_v24 = vld [vmem:[%s9853_s0 + $0x8] sm:$0xff]  ;;  %v77_v26 = vld [vmem:[%s9853_s0 + $0xd0] sm:$0xff]  ;;  %vm5555_vm14 = vcmask 687104   ;;  %vm5626_vm15 = vcmask 293888  }
   0x7   :  { %v79_v25 = vpack.c.bf16 %v52_v24, %v51_v23  ;;  %v78_v27 = vld [vmem:[%s9853_s0 + $0xd8] sm:$0xff]  ;;  %v75_v29 = vld [vmem:[%s9853_s0 + $0xc0] sm:$0xff]  ;;  %v76_v30 = vld [vmem:[%s9853_s0 + $0xc8] sm:$0xff] }
   0x8   :  { %321 = vmatpush1.bf16.msra.mxu0 %v85_v6  ;;  %v92_v28 = vpack.c.bf16 %v78_v27, %v77_v26  ;;  %v91_v31 = vpack.c.bf16 %v76_v30, %v75_v29  ;;  %v73_v32 = vld [vmem:[%s9853_s0 + $0xb0] sm:$0xff]  ;;  %v74_v33 = vld [vmem:[%s9853_s0 + $0xb8] sm:$0xff]  ;;  %v71_v35 = vld [vmem:[%s9853_s0 + $0xa0] sm:$0xff] }
   0x9   :  { %322 = vmatprep.subr.bf16.mxu0 %v9870_v0  ;;  %v90_v34 = vpack.c.bf16 %v74_v33, %v73_v32  ;;  %v72_v36 = vld [vmem:[%s9853_s0 + $0xa8] sm:$0xff]  ;;  %v69_v38 = vld [vmem:[%s9853_s0 + $0x90] sm:$0xff]  ;;  %v70_v39 = vld [vmem:[%s9853_s0 + $0x98] sm:$0xff] }
   0xa   :  { %v89_v37 = vpack.c.bf16 %v72_v36, %v71_v35  ;;  %v88_v40 = vpack.c.bf16 %v70_v39, %v69_v38  ;;  %v67_v41 = vld [vmem:[%s9853_s0 + $0x80] sm:$0xff]  ;;  %v68_v42 = vld [vmem:[%s9853_s0 + $0x88] sm:$0xff]  ;;  %v6411_v45 = vld [vmem:[%s9854_s1 + $0x14] ss:$8 sps:$4 sm:$0xff]  }
   0xb   :  { %v87_v43 = vpack.c.bf16 %v68_v42, %v67_v41  ;;  %v6408_v44 = vld [vmem:[%s9854_s1] ss:$8 sps:$4 sm:$0xff]   ;;  %v6413_v46 = vld [vmem:[%s9854_s1 + $0x10] ss:$8 sps:$4 sm:$0xff]   ;;  %v6414_v47 = vld [vmem:[%s9854_s1 + $0x24] ss:$8 sps:$4 sm:$0xff]  }
   0xc   :  { %323 = vmatpush1.bf16.msra.mxu0 %v84_v9  ;;  %v6416_v48 = vld [vmem:[%s9854_s1 + $0x20] ss:$8 sps:$4 sm:$0xff]   ;;  %v6417_v49 = vld [vmem:[%s9854_s1 + $0x34] ss:$8 sps:$4 sm:$0xff]   ;;  %v6419_v50 = vld [vmem:[%s9854_s1 + $0x30] ss:$8 sps:$4 sm:$0xff]  }
   0xd   :  { %324 = vmatprep.subr.bf16.mxu0 %v9870_v0  ;;  %v6420_v51 = vld [vmem:[%s9854_s1 + $0x44] ss:$8 sps:$4 sm:$0xff]   ;;  %v6422_v52 = vld [vmem:[%s9854_s1 + $0x40] ss:$8 sps:$4 sm:$0xff]   ;;  %v6423_v53 = vld [vmem:[%s9854_s1 + $0x54] ss:$8 sps:$4 sm:$0xff]  }
   0xe   :  { %v6425_v54 = vld [vmem:[%s9854_s1 + $0x50] ss:$8 sps:$4 sm:$0xff]   ;;  %v6426_v55 = vld [vmem:[%s9854_s1 + $0x64] ss:$8 sps:$4 sm:$0xff]   ;;  %v6428_v56 = vld [vmem:[%s9854_s1 + $0x60] ss:$8 sps:$4 sm:$0xff]  }
   0xf   :  { %v6429_v57 = vld [vmem:[%s9854_s1 + $0x74] ss:$8 sps:$4 sm:$0xff]   ;;  %v6431_v58 = vld [vmem:[%s9854_s1 + $0x70] ss:$8 sps:$4 sm:$0xff]   ;;  %v6432_v59 = vld [vmem:[%s9854_s1 + $0x84] ss:$8 sps:$4 sm:$0xff]  }
  0x10   :  { %325 = vmatpush1.bf16.msra.mxu0 %v83_v13  ;;  %v6434_v60 = vld [vmem:[%s9854_s1 + $0x80] ss:$8 sps:$4 sm:$0xff]   ;;  %v6435_v61 = vld [vmem:[%s9854_s1 + $0x94] ss:$8 sps:$4 sm:$0xff]   ;;  %v6437_v62 = vld [vmem:[%s9854_s1 + $0x90] ss:$8 sps:$4 sm:$0xff]  }
  0x11   :  { %326 = vmatprep.subr.bf16.mxu0 %v9870_v0  ;;  %v6438_v63 = vld [vmem:[%s9854_s1 + $0xa4] ss:$8 sps:$4 sm:$0xff]   ;;  %v6992_v1 = vld [vmem:[%s9855_s2 + $0x54] ss:$8 sps:$4 sm:$0x3f]  }
  0x12   :  { %v6458_v2 = vld [vmem:[%s9855_s2 + $0x50] ss:$8 sps:$4 sm:$0x3f]   ;;  %v6440_v3 = vld [vmem:[%s9854_s1 + $0xa0] ss:$8 sps:$4 sm:$0xff]  }
  0x13   :  { %v6459_v4 = vld [vmem:[%s9855_s2 + $0x34] ss:$8 sps:$4 sm:$0x3f]   ;;  %v7010_v6 = vsel %vm699_vm1, %v6458_v2, 0  ;;  %v7020_v8 = vld [vmem:[%s9855_s2 + $0x44] ss:$8 sps:$4 sm:$0xff]  }
  0x14   :  { %327 = vmatpush1.bf16.msra.mxu0 %v82_v16  ;;  %v6441_v5 = vld [vmem:[%s9854_s1 + $0xb4] ss:$8 sps:$4 sm:$0xff]   ;;  %v6461_v7 = vld [vmem:[%s9855_s2 + $0x30] ss:$8 sps:$4 sm:$0x3f]   ;;  %5764 = vmatprep.subr.msk.bf16.mxu1 %vm699_vm1, %v6459_v4 }
  0x15   :  { %328 = vmatprep.subr.bf16.mxu0 %v9870_v0  ;;  %v701_v9 = vsel %vm699_vm1, %v6461_v7, 0  ;;  %v7026_v10 = vld [vmem:[%s9855_s2 + $0x40] ss:$8 sps:$4 sm:$0xff]   ;;  %v6465_v11 = vld [vmem:[%s9855_s2 + $0x24] ss:$8 sps:$4 sm:$0xff]  }
  0x16   :  { %719 = vmatpush1.bf16.msra.mxu1 %v701_v9  ;;  %v6467_v12 = vld [vmem:[%s9855_s2 + $0x20] ss:$8 sps:$4 sm:$0xff]   ;;  %v6443_v13 = vld [vmem:[%s9854_s1 + $0xb0] ss:$8 sps:$4 sm:$0xff]   ;;  %v6444_v14 = vld [vmem:[%s9854_s1 + $0xc4] ss:$8 sps:$4 sm:$0xff]  }
  0x17   :  { %720 = vmatprep.subr.bf16.mxu1 %v6465_v11  ;;  %v6446_v15 = vld [vmem:[%s9854_s1 + $0xc0] ss:$8 sps:$4 sm:$0xff]   ;;  %v6447_v16 = vld [vmem:[%s9854_s1 + $0xd4] ss:$8 sps:$4 sm:$0xff]   ;;  %v6449_v17 = vld [vmem:[%s9854_s1 + $0xd0] ss:$8 sps:$4 sm:$0xff]  }
  0x18   :  { %329 = vmatpush1.bf16.msra.mxu0 %v81_v19  ;;  %v6450_v18 = vld [vmem:[%s9854_s1 + $0xe4] ss:$8 sps:$4 sm:$0xff]   ;;  %v6452_v19 = vld [vmem:[%s9854_s1 + $0xe0] ss:$8 sps:$4 sm:$0xff]   ;;  %v6453_v20 = vld [vmem:[%s9854_s1 + $0xf4] ss:$8 sps:$4 sm:$0xff]  }
  0x19   :  { %330 = vmatprep.subr.bf16.mxu0 %v9870_v0  ;;  %v6455_v21 = vld [vmem:[%s9854_s1 + $0xf0] ss:$8 sps:$4 sm:$0xff]   ;;  %v6474_v24 = vld [vmem:[%s9855_s2 + $0x94] ss:$8 sps:$4 sm:$0x3f]  }
  0x1a   :  { %721 = vmatpush1.bf16.msra.mxu1 %v6467_v12  ;;  %v6476_v38 = vld [vmem:[%s9855_s2 + $0x90] ss:$8 sps:$4 sm:$0x3f]  }
  0x1b   :  { %v6470_v41 = vld [vmem:[%s9855_s2 + $0x10] ss:$8 sps:$4 sm:$0x3f]  }
  0x1c   :  { %331 = vmatpush1.bf16.msra.mxu0 %v80_v22  ;;  %v6468_v22 = vld [vmem:[%s9855_s2 + $0x14] ss:$8 sps:$4 sm:$0x3f]  }
  0x1d   :  { %332 = vmatprep.subr.bf16.mxu0 %v9870_v0  ;;  %5785 = vmatprep.subr.msk.bf16.mxu1 %vm699_vm1, %v6468_v22 }
  0x20   :  { %333 = vmatpush1.bf16.msra.mxu0 %v79_v25 }
  0x21   :  { %338 = vmatprep.subr.bf16.mxu0 %v9870_v0 }
  0x24   :  { %339 = vmatpush2.bf16.msra.mxu0 %v92_v28 }
  0x25   :  { %340 = vmatprep.subr.bf16.mxu0 %v9870_v0 }
  0x28   :  { %341 = vmatpush2.bf16.msra.mxu0 %v91_v31 }
  0x29   :  { %342 = vmatprep.subr.bf16.mxu0 %v9870_v0 }
  0x2c   :  { %343 = vmatpush2.bf16.msra.mxu0 %v90_v34 }
  0x2d   :  { %344 = vmatprep.subr.bf16.mxu0 %v9870_v0 }
  0x30   :  { %345 = vmatpush2.bf16.msra.mxu0 %v89_v37 }
  0x31   :  { %346 = vmatprep.subr.bf16.mxu0 %v9870_v0 }
  0x34   :  { %347 = vmatpush2.bf16.msra.mxu0 %v88_v40 }
  0x35   :  { %348 = vmatprep.subr.bf16.mxu0 %v9870_v0 }
  0x38   :  { %349 = vmatpush2.bf16.msra.mxu0 %v87_v43 }
  0x39   :  { %5810 = vmatprep.subr.msk.bf16.mxu0 %vm699_vm1, %v6992_v1 }
  0x3b   :  { %351 = vmatmul.mubr.bf16.vlgmr.msra.gmra.mxu0 %v6408_v44 }
  0x3c   :  { %5741 = vmatprep.mubr.msk.bf16.mxu0 %vm269_vm0, %v6411_v45  ;;  %1286 = vmatpush1.bf16.msra.mxu0 %v7010_v6 }
  0x3d   :  { %1287 = vmatprep.subr.bf16.mxu0 %v7020_v8 }
  0x40   :  { %1288 = vmatpush1.bf16.msra.mxu0 %v7026_v10 }
  0x41   :  { %5860 = vmatprep.subr.msk.bf16.mxu0 %vm699_vm1, %v6474_v24 }
  0x43   :  { %359 = vmatmul.mubr.bf16.gmra.mxu0 %v6413_v46 }
  0x44   :  { %5742 = vmatprep.mubr.msk.bf16.mxu0 %vm269_vm0, %v6414_v47 }
  0x4b   :  { %367 = vmatmul.mubr.bf16.gmra.mxu0 %v6416_v48  ;;  %v2032_v48 = vsel %vm699_vm1, %v6476_v38, 0 }
  0x4c   :  { %5743 = vmatprep.mubr.msk.bf16.mxu0 %vm269_vm0, %v6417_v49  ;;  %v6479_v49 = vld [vmem:[%s9855_s2 + $0x84] ss:$8 sps:$4 sm:$0xff]  }
  0x53   :  { %375 = vmatmul.mubr.bf16.gmra.mxu0 %v6419_v50 }
  0x54   :  { %5744 = vmatprep.mubr.msk.bf16.mxu0 %vm269_vm0, %v6420_v51 }
  0x5b   :  { %383 = vmatmul.mubr.bf16.gmra.mxu0 %v6422_v52 }
  0x5c   :  { %5745 = vmatprep.mubr.msk.bf16.mxu0 %vm269_vm0, %v6423_v53 }
  0x63   :  { %391 = vmatmul.mubr.bf16.gmra.mxu0 %v6425_v54 }
  0x64   :  { %5746 = vmatprep.mubr.msk.bf16.mxu0 %vm269_vm0, %v6426_v55  ;;  %v950_v55 = vsel %vm699_vm1, %v6470_v41, 0 }
  0x6b   :  { %399 = vmatmul.mubr.bf16.gmra.mxu0 %v6428_v56  ;;  %v6473_v56 = vld [vmem:[%s9855_s2 + $0x4] ss:$8 sps:$4 sm:$0xff]  }
  0x6c   :  { %5747 = vmatprep.mubr.msk.bf16.mxu0 %vm269_vm0, %v6429_v57 }
  0x73   :  { %407 = vmatmul.mubr.bf16.gmra.mxu0 %v6431_v58  ;;  %v6477_v58 = vld [vmem:[%s9855_s2 + $0x80] ss:$8 sps:$4 sm:$0xff]  }
  0x74   :  { %5748 = vmatprep.mubr.msk.bf16.mxu0 %vm269_vm0, %v6432_v59 }
  0x7b   :  { %415 = vmatmul.mubr.bf16.gmra.mxu0 %v6434_v60 }
  0x7c   :  { %5749 = vmatprep.mubr.msk.bf16.mxu0 %vm269_vm0, %v6435_v61 }
  0x83   :  { %423 = vmatmul.mubr.bf16.gmra.mxu0 %v6437_v62  ;;  %v6471_v62 = vld [vmem:[%s9855_s2] ss:$8 sps:$4 sm:$0xff]  }
  0x84   :  { %5750 = vmatprep.mubr.msk.bf16.mxu0 %vm269_vm0, %v6438_v63 }
  0x8b   :  { %431 = vmatmul.mubr.bf16.gmra.mxu0 %v6440_v3 }
  0x8c   :  { %5751 = vmatprep.mubr.msk.bf16.mxu0 %vm269_vm0, %v6441_v5 }
  0x93   :  { %439 = vmatmul.mubr.bf16.gmra.mxu0 %v6443_v13 }
  0x94   :  { %5752 = vmatprep.mubr.msk.bf16.mxu0 %vm269_vm0, %v6444_v14 }
  0x9b   :  { %447 = vmatmul.mubr.bf16.gmra.mxu0 %v6446_v15 }
  0x9c   :  { %5753 = vmatprep.mubr.msk.bf16.mxu0 %vm269_vm0, %v6447_v16 }
  0xa3   :  { %455 = vmatmul.mubr.bf16.gmra.mxu0 %v6449_v17 }
  0xa4   :  { %5754 = vmatprep.mubr.msk.bf16.mxu0 %vm269_vm0, %v6450_v18 }
  0xab   :  { %463 = vmatmul.mubr.bf16.gmra.mxu0 %v6452_v19 }
  0xac   :  { %5755 = vmatprep.mubr.msk.bf16.mxu0 %vm269_vm0, %v6453_v20 }
  0xb3   :  { %471 = vmatmul.mubr.bf16.gmra.mxu0 %v6455_v21 }
  0xb4   :  { %1305 = vmatprep.mubr.bf16.mxu0 %v9870_v0 }
  0xfb   :  { %v352_v23 = vpop.f32.mrf.mxu0 }
  0xfd   :  { %v354_v25 = vpop.f32.mrf.mxu0 }
  0xff   :  { %v355_v26 = vpop.f32.mrf.mxu0 }
 0x100   :  { %v7077_v27 = vpack.c.bf16 %v355_v26, %v352_v23 }
 0x101   :  { %v357_v28 = vpop.f32.mrf.mxu0 }
 0x102   :  { %v506_v29 = vshrl.u32 %v7077_v27, 16  ;;  %v508_v30 = vshll.u32 %v7077_v27, 16  ;;  %v1170_v42 = vrot.slane %v7077_v27, 1 }
 0x103   :  { %v360_v31 = vpop.f32.mrf.mxu0 }
 0x104   :  { %v1536_v32 = vrot.slane %v506_v29, 1  ;;  %v1537_v33 = vrot.slane %v508_v30, 2  ;;  %v510_v37 = vrot.slane %v508_v30, 1 }
 0x105   :  { %v362_v34 = vpop.f32.mrf.mxu0 }
 0x106   :  { %v1538_v35 = vor.u32 %v1537_v33, %v1536_v32  ;;  %v511_v47 = vor.u32 %v510_v37, %v506_v29 }
 0x107   :  { %v363_v36 = vpop.f32.mrf.mxu0 }
 0x108   :  { %v7084_v39 = vpack.c.bf16 %v363_v36, %v360_v31 }
 0x109   :  { %v365_v40 = vpop.f32.mrf.mxu0 }
 0x10a   :  { %v1171_v43 = vrot.slane %v7084_v39, 1  ;;  %v513_v44 = vshll.u32 %v7084_v39, 16  ;;  %v517_v45 = vshrl.u32 %v7084_v39, 16 }
 0x10b   :  { %v368_v46 = vpop.f32.mrf.mxu0 }
 0x10c   :  { %v1172_v50 = vsel %vm1169_vm3, %v1170_v42, %v1171_v43  ;;  %v515_v51 = vrot.slane %v513_v44, 1  ;;  %v1540_v52 = vrot.slane %v513_v44, 2  ;;  %v1539_v53 = vrot.slane %v517_v45, 1 }
 0x10d   :  { %v370_v54 = vpop.f32.mrf.mxu0  ;;  %5811 = vmatmul.mubr.msk.bf16.vlgmr.msra.gmra.mxu0 %vm650_vm2, %v1172_v50 }
 0x10e   :  { %v516_v57 = vsel %vm504_vm4, %v511_v47, %v515_v51  ;;  %1315 = vmatprep.mubr.bf16.mxu0 %v9870_v0  ;;  %2050 = vmatpush1.bf16.msra.mxu0 %v2032_v48  ;;  %v1541_v59 = vor.u32 %v1540_v52, %v1539_v53  ;;  %v519_v9 = vor.u32 %v517_v45, %v515_v51 }
 0x10f   :  { %v371_v60 = vpop.f32.mrf.mxu0  ;;  %5765 = vmatmul.mubr.msk.bf16.vlgmr.msra.gmra.mxu1 %vm650_vm2, %v516_v57  ;;  %2051 = vmatprep.subr.bf16.mxu0 %v6479_v49 }
 0x110   :  { %v7109_v61 = vpack.c.bf16 %v371_v60, %v368_v46  ;;  %748 = vmatprep.mubr.bf16.mxu1 %v9870_v0  ;;  %968 = vmatpush1.bf16.msra.mxu1 %v950_v55  ;;  %v7116_v63 = vsel %vm1535_vm5, %v1538_v35, %v1541_v59 }
 0x111   :  { %v373_v2 = vpop.f32.mrf.mxu0  ;;  %969 = vmatprep.subr.bf16.mxu1 %v6473_v56 }
 0x112   :  { %v1173_v3 = vrot.slane %v7109_v61, 1  ;;  %v521_v4 = vshll.u32 %v7109_v61, 16  ;;  %v525_v5 = vshrl.u32 %v7109_v61, 16  ;;  %2052 = vmatpush1.bf16.msra.mxu0 %v6477_v58 }
 0x113   :  { %v376_v7 = vpop.f32.mrf.mxu0 }
 0x114   :  { %v1174_v11 = vsel %vm1169_vm3, %v1171_v43, %v1173_v3  ;;  %v523_v12 = vrot.slane %v521_v4, 1  ;;  %v1544_v13 = vrot.slane %v521_v4, 2  ;;  %v1543_v14 = vrot.slane %v525_v5, 1  ;;  %970 = vmatpush1.bf16.msra.mxu1 %v6471_v62 }
 0x115   :  { %v378_v15 = vpop.f32.mrf.mxu0  ;;  %5812 = vmatmul.mubr.msk.bf16.gmra.mxu0 %vm650_vm2, %v1174_v11  ;;  %6401 = vmatprep.subr.msk.bf16.mxu1 %vm699_vm1, %v6992_v1 }
 0x116   :  { %v524_v16 = vsel %vm504_vm4, %v519_v9, %v523_v12  ;;  %1325 = vmatprep.mubr.bf16.mxu0 %v9870_v0  ;;  %v1545_v17 = vor.u32 %v1544_v13, %v1543_v14  ;;  %v527_v25 = vor.u32 %v525_v5, %v523_v12 }
 0x117   :  { %v379_v18 = vpop.f32.mrf.mxu0  ;;  %5766 = vmatmul.mubr.msk.bf16.gmra.mxu1 %vm650_vm2, %v524_v16 }
 0x118   :  { %v7128_v19 = vpack.c.bf16 %v379_v18, %v376_v7  ;;  %758 = vmatprep.mubr.bf16.mxu1 %v9870_v0  ;;  %v7132_v20 = vsel %vm1535_vm5, %v1541_v59, %v1545_v17 }
 0x119   :  { %v381_v21 = vpop.f32.mrf.mxu0 }
 0x11a   :  { %v1175_v22 = vrot.slane %v7128_v19, 1  ;;  %v529_v1 = vshll.u32 %v7128_v19, 16  ;;  %v533_v23 = vshrl.u32 %v7128_v19, 16 }
 0x11b   :  { %v384_v24 = vpop.f32.mrf.mxu0 }
 0x11c   :  { %v1176_v26 = vsel %vm1169_vm3, %v1173_v3, %v1175_v22  ;;  %v531_v28 = vrot.slane %v529_v1, 1  ;;  %v1548_v29 = vrot.slane %v529_v1, 2  ;;  %v1547_v30 = vrot.slane %v533_v23, 1 }
 0x11d   :  { %v386_v31 = vpop.f32.mrf.mxu0  ;;  %5813 = vmatmul.mubr.msk.bf16.gmra.mxu0 %vm650_vm2, %v1176_v26 }
 0x11e   :  { %v532_v32 = vsel %vm504_vm4, %v527_v25, %v531_v28  ;;  %1335 = vmatprep.mubr.bf16.mxu0 %v9870_v0  ;;  %v1549_v33 = vor.u32 %v1548_v29, %v1547_v30  ;;  %v535_v43 = vor.u32 %v533_v23, %v531_v28 }
 0x11f   :  { %v387_v34 = vpop.f32.mrf.mxu0  ;;  %5767 = vmatmul.mubr.msk.bf16.gmra.mxu1 %vm650_vm2, %v532_v32 }
 0x120   :  { %v7142_v35 = vpack.c.bf16 %v387_v34, %v384_v24  ;;  %768 = vmatprep.mubr.bf16.mxu1 %v9870_v0  ;;  %v7146_v36 = vsel %vm1535_vm5, %v1545_v17, %v1549_v33 }
 0x121   :  { %v389_v37 = vpop.f32.mrf.mxu0 }
 0x122   :  { %v1177_v38 = vrot.slane %v7142_v35, 1  ;;  %v537_v40 = vshll.u32 %v7142_v35, 16  ;;  %v541_v41 = vshrl.u32 %v7142_v35, 16 }
 0x123   :  { %v392_v42 = vpop.f32.mrf.mxu0 }
 0x124   :  { %v1178_v44 = vsel %vm1169_vm3, %v1175_v22, %v1177_v38  ;;  %v539_v45 = vrot.slane %v537_v40, 1  ;;  %v1552_v46 = vrot.slane %v537_v40, 2  ;;  %v1551_v47 = vrot.slane %v541_v41, 1 }
 0x125   :  { %v394_v48 = vpop.f32.mrf.mxu0  ;;  %5814 = vmatmul.mubr.msk.bf16.gmra.mxu0 %vm650_vm2, %v1178_v44 }
 0x126   :  { %v540_v49 = vsel %vm504_vm4, %v535_v43, %v539_v45  ;;  %1345 = vmatprep.mubr.bf16.mxu0 %v9870_v0  ;;  %v1553_v50 = vor.u32 %v1552_v46, %v1551_v47  ;;  %v543_v59 = vor.u32 %v541_v41, %v539_v45 }
 0x127   :  { %v395_v51 = vpop.f32.mrf.mxu0  ;;  %5768 = vmatmul.mubr.msk.bf16.gmra.mxu1 %vm650_vm2, %v540_v49 }
 0x128   :  { %v7156_v52 = vpack.c.bf16 %v395_v51, %v392_v42  ;;  %778 = vmatprep.mubr.bf16.mxu1 %v9870_v0  ;;  %v7160_v53 = vsel %vm1535_vm5, %v1549_v33, %v1553_v50 }
 0x129   :  { %v397_v54 = vpop.f32.mrf.mxu0 }
 0x12a   :  { %v1179_v55 = vrot.slane %v7156_v52, 1  ;;  %v545_v56 = vshll.u32 %v7156_v52, 16  ;;  %v549_v57 = vshrl.u32 %v7156_v52, 16 }
 0x12b   :  { %v400_v58 = vpop.f32.mrf.mxu0 }
 0x12c   :  { %v1180_v60 = vsel %vm1169_vm3, %v1177_v38, %v1179_v55  ;;  %v547_v62 = vrot.slane %v545_v56, 1  ;;  %v1556_v2 = vrot.slane %v545_v56, 2  ;;  %v1555_v3 = vrot.slane %v549_v57, 1 }
 0x12d   :  { %v402_v4 = vpop.f32.mrf.mxu0  ;;  %5815 = vmatmul.mubr.msk.bf16.gmra.mxu0 %vm650_vm2, %v1180_v60 }
 0x12e   :  { %v548_v5 = vsel %vm504_vm4, %v543_v59, %v547_v62  ;;  %1355 = vmatprep.mubr.bf16.mxu0 %v9870_v0  ;;  %v1557_v7 = vor.u32 %v1556_v2, %v1555_v3  ;;  %v551_v18 = vor.u32 %v549_v57, %v547_v62 }
 0x12f   :  { %v403_v9 = vpop.f32.mrf.mxu0  ;;  %5769 = vmatmul.mubr.msk.bf16.gmra.mxu1 %vm650_vm2, %v548_v5 }
 0x130   :  { %v7170_v11 = vpack.c.bf16 %v403_v9, %v400_v58  ;;  %788 = vmatprep.mubr.bf16.mxu1 %v9870_v0  ;;  %v7174_v12 = vsel %vm1535_vm5, %v1553_v50, %v1557_v7 }
 0x131   :  { %v405_v13 = vpop.f32.mrf.mxu0 }
 0x132   :  { %v1181_v14 = vrot.slane %v7170_v11, 1  ;;  %v553_v15 = vshll.u32 %v7170_v11, 16  ;;  %v557_v16 = vshrl.u32 %v7170_v11, 16 }
 0x133   :  { %v408_v17 = vpop.f32.mrf.mxu0 }
 0x134   :  { %v1182_v21 = vsel %vm1169_vm3, %v1179_v55, %v1181_v14  ;;  %v555_v22 = vrot.slane %v553_v15, 1  ;;  %v1560_v1 = vrot.slane %v553_v15, 2  ;;  %v1559_v23 = vrot.slane %v557_v16, 1 }
 0x135   :  { %v410_v24 = vpop.f32.mrf.mxu0  ;;  %5816 = vmatmul.mubr.msk.bf16.gmra.mxu0 %vm650_vm2, %v1182_v21 }
 0x136   :  { %v556_v25 = vsel %vm504_vm4, %v551_v18, %v555_v22  ;;  %1365 = vmatprep.mubr.bf16.mxu0 %v9870_v0  ;;  %v1561_v26 = vor.u32 %v1560_v1, %v1559_v23  ;;  %v559_v38 = vor.u32 %v557_v16, %v555_v22 }
 0x137   :  { %v411_v28 = vpop.f32.mrf.mxu0  ;;  %5770 = vmatmul.mubr.msk.bf16.gmra.mxu1 %vm650_vm2, %v556_v25 }
 0x138   :  { %v7184_v29 = vpack.c.bf16 %v411_v28, %v408_v17  ;;  %798 = vmatprep.mubr.bf16.mxu1 %v9870_v0  ;;  %v7188_v30 = vsel %vm1535_vm5, %v1557_v7, %v1561_v26 }
 0x139   :  { %v413_v31 = vpop.f32.mrf.mxu0 }
 0x13a   :  { %v1183_v32 = vrot.slane %v7184_v29, 1  ;;  %v561_v33 = vshll.u32 %v7184_v29, 16  ;;  %v565_v34 = vshrl.u32 %v7184_v29, 16 }
 0x13b   :  { %v416_v37 = vpop.f32.mrf.mxu0 }
 0x13c   :  { %v1184_v40 = vsel %vm1169_vm3, %v1181_v14, %v1183_v32  ;;  %v563_v41 = vrot.slane %v561_v33, 1  ;;  %v1564_v42 = vrot.slane %v561_v33, 2  ;;  %v1563_v43 = vrot.slane %v565_v34, 1 }
 0x13d   :  { %v418_v44 = vpop.f32.mrf.mxu0  ;;  %5817 = vmatmul.mubr.msk.bf16.gmra.mxu0 %vm650_vm2, %v1184_v40 }
 0x13e   :  { %v564_v45 = vsel %vm504_vm4, %v559_v38, %v563_v41  ;;  %1375 = vmatprep.mubr.bf16.mxu0 %v9870_v0  ;;  %v1565_v46 = vor.u32 %v1564_v42, %v1563_v43  ;;  %v567_v57 = vor.u32 %v565_v34, %v563_v41 }
 0x13f   :  { %v419_v47 = vpop.f32.mrf.mxu0  ;;  %5771 = vmatmul.mubr.msk.bf16.gmra.mxu1 %vm650_vm2, %v564_v45 }
 0x140   :  { %v7198_v48 = vpack.c.bf16 %v419_v47, %v416_v37  ;;  %808 = vmatprep.mubr.bf16.mxu1 %v9870_v0  ;;  %v7202_v49 = vsel %vm1535_vm5, %v1561_v26, %v1565_v46 }
 0x141   :  { %v421_v50 = vpop.f32.mrf.mxu0 }
 0x142   :  { %v1185_v51 = vrot.slane %v7198_v48, 1  ;;  %v569_v54 = vshll.u32 %v7198_v48, 16  ;;  %v573_v55 = vshrl.u32 %v7198_v48, 16 }
 0x143   :  { %v424_v56 = vpop.f32.mrf.mxu0 }
 0x144   :  { %v1186_v58 = vsel %vm1169_vm3, %v1183_v32, %v1185_v51  ;;  %v571_v59 = vrot.slane %v569_v54, 1  ;;  %v1568_v60 = vrot.slane %v569_v54, 2  ;;  %v1567_v62 = vrot.slane %v573_v55, 1 }
 0x145   :  { %v426_v2 = vpop.f32.mrf.mxu0  ;;  %5818 = vmatmul.mubr.msk.bf16.gmra.mxu0 %vm650_vm2, %v1186_v58 }
 0x146   :  { %v572_v3 = vsel %vm504_vm4, %v567_v57, %v571_v59  ;;  %1385 = vmatprep.mubr.bf16.mxu0 %v9870_v0  ;;  %v1569_v4 = vor.u32 %v1568_v60, %v1567_v62  ;;  %v575_v18 = vor.u32 %v573_v55, %v571_v59 }
 0x147   :  { %v427_v5 = vpop.f32.mrf.mxu0  ;;  %5772 = vmatmul.mubr.msk.bf16.gmra.mxu1 %vm650_vm2, %v572_v3 }
 0x148   :  { %v7212_v7 = vpack.c.bf16 %v427_v5, %v424_v56  ;;  %818 = vmatprep.mubr.bf16.mxu1 %v9870_v0  ;;  %v7216_v9 = vsel %vm1535_vm5, %v1565_v46, %v1569_v4 }
 0x149   :  { %v429_v13 = vpop.f32.mrf.mxu0 }
 0x14a   :  { %v1187_v14 = vrot.slane %v7212_v7, 1  ;;  %v577_v15 = vshll.u32 %v7212_v7, 16  ;;  %v581_v16 = vshrl.u32 %v7212_v7, 16 }
 0x14b   :  { %v432_v17 = vpop.f32.mrf.mxu0 }
 0x14c   :  { %v1188_v21 = vsel %vm1169_vm3, %v1185_v51, %v1187_v14  ;;  %v579_v22 = vrot.slane %v577_v15, 1  ;;  %v1572_v1 = vrot.slane %v577_v15, 2  ;;  %v1571_v23 = vrot.slane %v581_v16, 1 }
 0x14d   :  { %v434_v24 = vpop.f32.mrf.mxu0  ;;  %5819 = vmatmul.mubr.msk.bf16.gmra.mxu0 %vm650_vm2, %v1188_v21 }
 0x14e   :  { %v580_v25 = vsel %vm504_vm4, %v575_v18, %v579_v22  ;;  %1395 = vmatprep.mubr.bf16.mxu0 %v9870_v0  ;;  %v1573_v26 = vor.u32 %v1572_v1, %v1571_v23  ;;  %v583_v41 = vor.u32 %v581_v16, %v579_v22 }
 0x14f   :  { %v435_v28 = vpop.f32.mrf.mxu0  ;;  %5773 = vmatmul.mubr.msk.bf16.gmra.mxu1 %vm650_vm2, %v580_v25 }
 0x150   :  { %v7226_v31 = vpack.c.bf16 %v435_v28, %v432_v17  ;;  %828 = vmatprep.mubr.bf16.mxu1 %v9870_v0  ;;  %v7230_v32 = vsel %vm1535_vm5, %v1569_v4, %v1573_v26 }
 0x151   :  { %v437_v33 = vpop.f32.mrf.mxu0 }
 0x152   :  { %v1189_v34 = vrot.slane %v7226_v31, 1  ;;  %v585_v37 = vshll.u32 %v7226_v31, 16  ;;  %v589_v38 = vshrl.u32 %v7226_v31, 16 }
 0x153   :  { %v440_v40 = vpop.f32.mrf.mxu0 }
 0x154   :  { %v1190_v42 = vsel %vm1169_vm3, %v1187_v14, %v1189_v34  ;;  %v587_v43 = vrot.slane %v585_v37, 1  ;;  %v1576_v44 = vrot.slane %v585_v37, 2  ;;  %v1575_v45 = vrot.slane %v589_v38, 1 }
 0x155   :  { %v442_v46 = vpop.f32.mrf.mxu0  ;;  %5820 = vmatmul.mubr.msk.bf16.gmra.mxu0 %vm650_vm2, %v1190_v42 }
 0x156   :  { %v588_v47 = vsel %vm504_vm4, %v583_v41, %v587_v43  ;;  %1405 = vmatprep.mubr.bf16.mxu0 %v9870_v0  ;;  %v1577_v50 = vor.u32 %v1576_v44, %v1575_v45  ;;  %v591_v62 = vor.u32 %v589_v38, %v587_v43 }
 0x157   :  { %v443_v51 = vpop.f32.mrf.mxu0  ;;  %5774 = vmatmul.mubr.msk.bf16.gmra.mxu1 %vm650_vm2, %v588_v47 }
 0x158   :  { %v7240_v54 = vpack.c.bf16 %v443_v51, %v440_v40  ;;  %838 = vmatprep.mubr.bf16.mxu1 %v9870_v0  ;;  %v7244_v55 = vsel %vm1535_vm5, %v1573_v26, %v1577_v50 }
 0x159   :  { %v445_v56 = vpop.f32.mrf.mxu0 }
 0x15a   :  { %v1191_v57 = vrot.slane %v7240_v54, 1  ;;  %v593_v58 = vshll.u32 %v7240_v54, 16  ;;  %v597_v59 = vshrl.u32 %v7240_v54, 16 }
 0x15b   :  { %v448_v60 = vpop.f32.mrf.mxu0 }
 0x15c   :  { %v1192_v2 = vsel %vm1169_vm3, %v1189_v34, %v1191_v57  ;;  %v595_v3 = vrot.slane %v593_v58, 1  ;;  %v1580_v4 = vrot.slane %v593_v58, 2  ;;  %v1579_v5 = vrot.slane %v597_v59, 1 }
 0x15d   :  { %v450_v13 = vpop.f32.mrf.mxu0  ;;  %5821 = vmatmul.mubr.msk.bf16.gmra.mxu0 %vm650_vm2, %v1192_v2 }
 0x15e   :  { %v596_v14 = vsel %vm504_vm4, %v591_v62, %v595_v3  ;;  %1415 = vmatprep.mubr.bf16.mxu0 %v9870_v0  ;;  %v1581_v15 = vor.u32 %v1580_v4, %v1579_v5  ;;  %v599_v25 = vor.u32 %v597_v59, %v595_v3 }
 0x15f   :  { %v451_v16 = vpop.f32.mrf.mxu0  ;;  %5775 = vmatmul.mubr.msk.bf16.gmra.mxu1 %vm650_vm2, %v596_v14 }
 0x160   :  { %v7254_v17 = vpack.c.bf16 %v451_v16, %v448_v60  ;;  %848 = vmatprep.mubr.bf16.mxu1 %v9870_v0  ;;  %v7258_v18 = vsel %vm1535_vm5, %v1577_v50, %v1581_v15 }
 0x161   :  { %v453_v21 = vpop.f32.mrf.mxu0 }
 0x162   :  { %v1193_v22 = vrot.slane %v7254_v17, 1  ;;  %v601_v1 = vshll.u32 %v7254_v17, 16  ;;  %v605_v23 = vshrl.u32 %v7254_v17, 16 }
 0x163   :  { %v456_v24 = vpop.f32.mrf.mxu0 }
 0x164   :  { %v1194_v26 = vsel %vm1169_vm3, %v1191_v57, %v1193_v22  ;;  %v603_v28 = vrot.slane %v601_v1, 1  ;;  %v1584_v33 = vrot.slane %v601_v1, 2  ;;  %v1583_v34 = vrot.slane %v605_v23, 1 }
 0x165   :  { %v458_v37 = vpop.f32.mrf.mxu0  ;;  %5822 = vmatmul.mubr.msk.bf16.gmra.mxu0 %vm650_vm2, %v1194_v26 }
 0x166   :  { %v604_v38 = vsel %vm504_vm4, %v599_v25, %v603_v28  ;;  %1425 = vmatprep.mubr.bf16.mxu0 %v9870_v0  ;;  %v1585_v40 = vor.u32 %v1584_v33, %v1583_v34  ;;  %v607_v51 = vor.u32 %v605_v23, %v603_v28 }
 0x167   :  { %v459_v41 = vpop.f32.mrf.mxu0  ;;  %5776 = vmatmul.mubr.msk.bf16.gmra.mxu1 %vm650_vm2, %v604_v38 }
 0x168   :  { %v7268_v42 = vpack.c.bf16 %v459_v41, %v456_v24  ;;  %858 = vmatprep.mubr.bf16.mxu1 %v9870_v0  ;;  %v7272_v43 = vsel %vm1535_vm5, %v1581_v15, %v1585_v40 }
 0x169   :  { %v461_v44 = vpop.f32.mrf.mxu0 }
 0x16a   :  { %v1195_v45 = vrot.slane %v7268_v42, 1  ;;  %v609_v46 = vshll.u32 %v7268_v42, 16  ;;  %v613_v47 = vshrl.u32 %v7268_v42, 16 }
 0x16b   :  { %v464_v50 = vpop.f32.mrf.mxu0 }
 0x16c   :  { %v1196_v56 = vsel %vm1169_vm3, %v1193_v22, %v1195_v45  ;;  %v611_v57 = vrot.slane %v609_v46, 1  ;;  %v1588_v58 = vrot.slane %v609_v46, 2  ;;  %v1587_v59 = vrot.slane %v613_v47, 1 }
 0x16d   :  { %v466_v60 = vpop.f32.mrf.mxu0  ;;  %5823 = vmatmul.mubr.msk.bf16.gmra.mxu0 %vm650_vm2, %v1196_v56 }
 0x16e   :  { %v612_v62 = vsel %vm504_vm4, %v607_v51, %v611_v57  ;;  %1435 = vmatprep.mubr.bf16.mxu0 %v9870_v0  ;;  %v1589_v2 = vor.u32 %v1588_v58, %v1587_v59  ;;  %v615_v22 = vor.u32 %v613_v47, %v611_v57  ;;  %v1935_v59 = vrot.slane %v7084_v39, 2 }
 0x16f   :  { %v467_v3 = vpop.f32.mrf.mxu0  ;;  %5777 = vmatmul.mubr.msk.bf16.gmra.mxu1 %vm650_vm2, %v612_v62  ;;  %v1934_v62 = vrot.slane %v7077_v27, 2 }
 0x170   :  { %v7282_v4 = vpack.c.bf16 %v467_v3, %v464_v50  ;;  %868 = vmatprep.mubr.bf16.mxu1 %v9870_v0  ;;  %v7286_v5 = vsel %vm1535_vm5, %v1585_v40, %v1589_v2 }
 0x171   :  { %v469_v13 = vpop.f32.mrf.mxu0 }
 0x172   :  { %v1197_v14 = vrot.slane %v7282_v4, 1  ;;  %v617_v15 = vshll.u32 %v7282_v4, 16  ;;  %v621_v16 = vshrl.u32 %v7282_v4, 16  ;;  %v1937_v13 = vrot.slane %v7109_v61, 2 }
 0x173   :  { %v472_v21 = vpop.f32.mrf.mxu0 }
 0x174   :  { %v1198_v1 = vsel %vm1169_vm3, %v1195_v45, %v1197_v14  ;;  %v619_v23 = vrot.slane %v617_v15, 1  ;;  %v1592_v24 = vrot.slane %v617_v15, 2  ;;  %v1591_v25 = vrot.slane %v621_v16, 1 }
 0x175   :  { %v474_v26 = vpop.f32.mrf.mxu0  ;;  %5824 = vmatmul.mubr.msk.bf16.gmra.mxu0 %vm650_vm2, %v1198_v1  ;;  %v1939_v15 = vrot.slane %v7128_v19, 2 }
 0x176   :  { %v620_v28 = vsel %vm504_vm4, %v615_v22, %v619_v23  ;;  %1445 = vmatprep.mubr.bf16.mxu0 %v9870_v0  ;;  %v1593_v33 = vor.u32 %v1592_v24, %v1591_v25  ;;  %v623_v46 = vor.u32 %v621_v16, %v619_v23  ;;  %v6480_v16 = vld [vmem:[%s9855_s2 + $0x74] ss:$8 sps:$4 sm:$0x3f]  }
 0x177   :  { %v475_v34 = vpop.f32.mrf.mxu0  ;;  %5778 = vmatmul.mubr.msk.bf16.gmra.mxu1 %vm650_vm2, %v620_v28 }
 0x178   :  { %v7296_v37 = vpack.c.bf16 %v475_v34, %v472_v21  ;;  %878 = vmatprep.mubr.bf16.mxu1 %v9870_v0  ;;  %v7300_v38 = vsel %vm1535_vm5, %v1589_v2, %v1593_v33  ;;  %v1936_v2 = vsel %vm699_vm1, %v1934_v62, %v1935_v59  ;;  %v1940_v21 = vsel %vm699_vm1, %v1937_v13, %v1939_v15 }
 0x179   :  { %v477_v40 = vpop.f32.mrf.mxu0 }
 0x17a   :  { %v9869_v41 = vrot.slane %v7296_v37, 1  ;;  %v625_v44 = vshll.u32 %v7296_v37, 16  ;;  %v629_v45 = vshrl.u32 %v7296_v37, 16 }
 0x17c   :  { %v1200_v47 = vsel %vm1169_vm3, %v1197_v14, %v9869_v41  ;;  %v627_v50 = vrot.slane %v625_v44, 1  ;;  %v1596_v51 = vrot.slane %v625_v44, 2  ;;  %v1595_v56 = vrot.slane %v629_v45, 1 }
 0x17d   :  { %5825 = vmatmul.mubr.msk.bf16.gmra.mxu0 %vm650_vm2, %v1200_v47  ;;  %v1938_v14 = vsel %vm699_vm1, %v1935_v59, %v1937_v13 }
 0x17e   :  { %v628_v57 = vsel %vm504_vm4, %v623_v46, %v627_v50  ;;  %2069 = vmatprep.mubr.bf16.mxu0 %v9870_v0  ;;  %v7311_v58 = vor.u32 %v1596_v51, %v1595_v56  ;;  %v631_v3 = vor.u32 %v629_v45, %v627_v50  ;;  %v1957_v51 = vrot.slane %v7254_v17, 2 }
 0x17f   :  { %5779 = vmatmul.mubr.msk.bf16.gmra.mxu1 %vm650_vm2, %v628_v57 }
 0x180   :  { %888 = vmatprep.mubr.bf16.mxu1 %v9870_v0  ;;  %v7318_v60 = vsel %vm1535_vm5, %v1593_v33, %v7311_v58 }
 0x185   :  { %5861 = vmatmul.mubr.msk.bf16.vlgmr.msra.gmra.mxu0 %vm650_vm2, %v1936_v2 }
 0x186   :  { %2079 = vmatprep.mubr.bf16.mxu0 %v9870_v0 }
 0x187   :  { %5780 = vmatmul.mubr.msk.bf16.gmra.mxu1 %vm650_vm2, %v631_v3 }
 0x188   :  { %987 = vmatprep.mubr.bf16.mxu1 %v9870_v0 }
 0x18d   :  { %5862 = vmatmul.mubr.msk.bf16.gmra.mxu0 %vm650_vm2, %v1938_v14 }
 0x18e   :  { %2089 = vmatprep.mubr.bf16.mxu0 %v9870_v0 }
 0x18f   :  { %5786 = vmatmul.mubr.msk.bf16.vlgmr.msra.gmra.mxu1 %vm650_vm2, %v7077_v27 }
 0x190   :  { %997 = vmatprep.mubr.bf16.mxu1 %v9870_v0  ;;  %6403 = vmatpush1.bf16.msra.mxu1 %v7010_v6  ;;  %v1941_v6 = vrot.slane %v7142_v35, 2 }
 0x191   :  { %6402 = vmatprep.subr.bf16.mxu1 %v7020_v8 }
 0x192   :  { %v1942_v8 = vsel %vm699_vm1, %v1939_v15, %v1941_v6  ;;  %v1959_v15 = vrot.slane %v7268_v42, 2 }
 0x194   :  { %6404 = vmatpush1.bf16.msra.mxu1 %v7026_v10  ;;  %v1943_v10 = vrot.slane %v7156_v52, 2 }
 0x195   :  { %5863 = vmatmul.mubr.msk.bf16.gmra.mxu0 %vm650_vm2, %v1940_v21  ;;  %5835 = vmatprep.subr.msk.bf16.mxu1 %vm699_vm1, %v6480_v16 }
 0x196   :  { %2099 = vmatprep.mubr.bf16.mxu0 %v9870_v0  ;;  %v1944_v27 = vsel %vm699_vm1, %v1941_v6, %v1943_v10 }
 0x197   :  { %5787 = vmatmul.mubr.msk.bf16.gmra.mxu1 %vm650_vm2, %v7084_v39  ;;  %v1945_v39 = vrot.slane %v7170_v11, 2 }
 0x198   :  { %1007 = vmatprep.mubr.bf16.mxu1 %v9870_v0 }
 0x199   :  { %v1946_v22 = vsel %vm699_vm1, %v1943_v10, %v1945_v39  ;;  %v1960_v10 = vsel %vm699_vm1, %v1957_v51, %v1959_v15 }
 0x19d   :  { %5864 = vmatmul.mubr.msk.bf16.gmra.mxu0 %vm650_vm2, %v1942_v8 }
 0x19e   :  { %2109 = vmatprep.mubr.bf16.mxu0 %v9870_v0 }
 0x19f   :  { %5788 = vmatmul.mubr.msk.bf16.gmra.mxu1 %vm650_vm2, %v7109_v61  ;;  %v1947_v61 = vrot.slane %v7184_v29, 2 }
 0x1a0   :  { %1017 = vmatprep.mubr.bf16.mxu1 %v9870_v0 }
 0x1a1   :  { %v1948_v1 = vsel %vm699_vm1, %v1945_v39, %v1947_v61 }
 0x1a5   :  { %5865 = vmatmul.mubr.msk.bf16.gmra.mxu0 %vm650_vm2, %v1944_v27 }
 0x1a6   :  { %2119 = vmatprep.mubr.bf16.mxu0 %v9870_v0 }
 0x1a7   :  { %5789 = vmatmul.mubr.msk.bf16.gmra.mxu1 %vm650_vm2, %v7128_v19  ;;  %v1949_v19 = vrot.slane %v7198_v48, 2 }
 0x1a8   :  { %1027 = vmatprep.mubr.bf16.mxu1 %v9870_v0 }
 0x1a9   :  { %v1950_v23 = vsel %vm699_vm1, %v1947_v61, %v1949_v19  ;;  %v1961_v61 = vrot.slane %v7282_v4, 2 }
 0x1ad   :  { %5866 = vmatmul.mubr.msk.bf16.gmra.mxu0 %vm650_vm2, %v1946_v22 }
 0x1ae   :  { %2129 = vmatprep.mubr.bf16.mxu0 %v9870_v0 }
 0x1af   :  { %5790 = vmatmul.mubr.msk.bf16.gmra.mxu1 %vm650_vm2, %v7142_v35  ;;  %v1951_v35 = vrot.slane %v7212_v7, 2 }
 0x1b0   :  { %1037 = vmatprep.mubr.bf16.mxu1 %v9870_v0 }
 0x1b1   :  { %v1952_v24 = vsel %vm699_vm1, %v1949_v19, %v1951_v35 }
 0x1b5   :  { %5867 = vmatmul.mubr.msk.bf16.gmra.mxu0 %vm650_vm2, %v1948_v1 }
 0x1b6   :  { %2139 = vmatprep.mubr.bf16.mxu0 %v9870_v0 }
 0x1b7   :  { %5791 = vmatmul.mubr.msk.bf16.gmra.mxu1 %vm650_vm2, %v7156_v52  ;;  %v1953_v52 = vrot.slane %v7226_v31, 2 }
 0x1b8   :  { %1047 = vmatprep.mubr.bf16.mxu1 %v9870_v0 }
 0x1b9   :  { %v1954_v25 = vsel %vm699_vm1, %v1951_v35, %v1953_v52 }
 0x1bd   :  { %5868 = vmatmul.mubr.msk.bf16.gmra.mxu0 %vm650_vm2, %v1950_v23 }
 0x1be   :  { %2149 = vmatprep.mubr.bf16.mxu0 %v9870_v0 }
 0x1bf   :  { %5792 = vmatmul.mubr.msk.bf16.gmra.mxu1 %vm650_vm2, %v7170_v11 }
 0x1c0   :  { %1057 = vmatprep.mubr.bf16.mxu1 %v9870_v0 }
 0x1c5   :  { %5869 = vmatmul.mubr.msk.bf16.gmra.mxu0 %vm650_vm2, %v1952_v24  ;;  %v1962_v24 = vsel %vm699_vm1, %v1959_v15, %v1961_v61 }
 0x1c6   :  { %2159 = vmatprep.mubr.bf16.mxu0 %v9870_v0 }
 0x1c7   :  { %5793 = vmatmul.mubr.msk.bf16.gmra.mxu1 %vm650_vm2, %v7184_v29  ;;  %v1955_v29 = vrot.slane %v7240_v54, 2 }
 0x1c8   :  { %1067 = vmatprep.mubr.bf16.mxu1 %v9870_v0 }
 0x1c9   :  { %v1956_v45 = vsel %vm699_vm1, %v1953_v52, %v1955_v29  ;;  %v1958_v2 = vsel %vm699_vm1, %v1955_v29, %v1957_v51 }
 0x1cd   :  { %v7391_v11 = vpop.f32.mrf.mxu0  ;;  %5870 = vmatmul.mubr.msk.bf16.gmra.mxu0 %vm650_vm2, %v1954_v25 }
 0x1ce   :  { %2169 = vmatprep.mubr.bf16.mxu0 %v9870_v0 }
 0x1cf   :  { %v7395_v26 = vpop.f32.mrf.mxu1  ;;  %5794 = vmatmul.mubr.msk.bf16.gmra.mxu1 %vm650_vm2, %v7198_v48  ;;  %v7399_v28 = vpop.f32.mrf.mxu0 }
 0x1d0   :  { %1077 = vmatprep.mubr.bf16.mxu1 %v9870_v0 }
 0x1d1   :  { %v7403_v33 = vpop.f32.mrf.mxu1  ;;  %v7405_v34 = vpop.f32.mrf.mxu0 }
 0x1d3   :  { %v7407_v40 = vpop.f32.mrf.mxu1  ;;  %v7409_v44 = vpop.f32.mrf.mxu0 }
 0x1d5   :  { %v7412_v46 = vpop.f32.mrf.mxu1  ;;  %v7414_v47 = vpop.f32.mrf.mxu0  ;;  %5871 = vmatmul.mubr.msk.bf16.gmra.mxu0 %vm650_vm2, %v1956_v45  ;;  %v1963_v45 = vrot.slane %v7296_v37, 2 }
 0x1d6   :  { %2179 = vmatprep.mubr.bf16.mxu0 %v9870_v0 }
 0x1d7   :  { %v7418_v48 = vpop.f32.mrf.mxu1  ;;  %5795 = vmatmul.mubr.msk.bf16.gmra.mxu1 %vm650_vm2, %v7212_v7  ;;  %v7422_v50 = vpop.f32.mrf.mxu0 }
 0x1d8   :  { %1087 = vmatprep.mubr.bf16.mxu1 %v9870_v0 }
 0x1d9   :  { %v7426_v56 = vpop.f32.mrf.mxu1  ;;  %v7428_v57 = vpop.f32.mrf.mxu0 }
 0x1db   :  { %v7430_v59 = vpop.f32.mrf.mxu1  ;;  %v7432_v62 = vpop.f32.mrf.mxu0 }
 0x1dd   :  { %v7435_v3 = vpop.f32.mrf.mxu1  ;;  %v7437_v13 = vpop.f32.mrf.mxu0  ;;  %5872 = vmatmul.mubr.msk.bf16.gmra.mxu0 %vm650_vm2, %v1958_v2 }
 0x1de   :  { %2189 = vmatprep.mubr.bf16.mxu0 %v9870_v0 }
 0x1df   :  { %v7441_v7 = vpop.f32.mrf.mxu1  ;;  %5796 = vmatmul.mubr.msk.bf16.gmra.mxu1 %vm650_vm2, %v7226_v31  ;;  %v7445_v14 = vpop.f32.mrf.mxu0 }
 0x1e0   :  { %1097 = vmatprep.mubr.bf16.mxu1 %v9870_v0 }
 0x1e1   :  { %v7449_v16 = vpop.f32.mrf.mxu1  ;;  %v7451_v21 = vpop.f32.mrf.mxu0 }
 0x1e3   :  { %v7453_v6 = vpop.f32.mrf.mxu1  ;;  %v7455_v8 = vpop.f32.mrf.mxu0 }
 0x1e4   :  { %9878 = vst [vmem:[#allocation2_spill] sm:$0xff] %v7455_v8 }
 0x1e5   :  { %v7458_v27 = vpop.f32.mrf.mxu1  ;;  %v7460_v39 = vpop.f32.mrf.mxu0  ;;  %5873 = vmatmul.mubr.msk.bf16.gmra.mxu0 %vm650_vm2, %v1960_v10 }
 0x1e6   :  { %9879 = vst [vmem:[#allocation3_spill] sm:$0xff] %v7460_v39  ;;  %2199 = vmatprep.mubr.bf16.mxu0 %v9870_v0 }
 0x1e7   :  { %v7464_v31 = vpop.f32.mrf.mxu1  ;;  %5797 = vmatmul.mubr.msk.bf16.gmra.mxu1 %vm650_vm2, %v7240_v54  ;;  %v7468_v22 = vpop.f32.mrf.mxu0 }
 0x1e8   :  { %9880 = vst [vmem:[#allocation4_spill] sm:$0xff] %v7468_v22  ;;  %1107 = vmatprep.mubr.bf16.mxu1 %v9870_v0 }
 0x1e9   :  { %v7472_v1 = vpop.f32.mrf.mxu1  ;;  %v7474_v19 = vpop.f32.mrf.mxu0 }
 0x1ea   :  { %9881 = vst [vmem:[#allocation5_spill] sm:$0xff] %v7472_v1  ;;  %9882 = vst [vmem:[#allocation6_spill] sm:$0xff] %v7474_v19 }
 0x1eb   :  { %v7476_v23 = vpop.f32.mrf.mxu1  ;;  %v7478_v35 = vpop.f32.mrf.mxu0 }
 0x1ec   :  { %9883 = vst [vmem:[#allocation7_spill] sm:$0xff] %v7476_v23  ;;  %9884 = vst [vmem:[#allocation8_spill] sm:$0xff] %v7478_v35 }
 0x1ed   :  { %v7481_v52 = vpop.f32.mrf.mxu1  ;;  %v7483_v25 = vpop.f32.mrf.mxu0  ;;  %5874 = vmatmul.mubr.msk.bf16.gmra.mxu0 %vm650_vm2, %v1962_v24  ;;  %v1964_v24 = vsel %vm699_vm1, %v1961_v61, %v1963_v45 }
 0x1ee   :  { %9885 = vst [vmem:[#allocation9_spill] sm:$0xff] %v7481_v52  ;;  %9886 = vst [vmem:[#allocation10_spill] sm:$0xff] %v7483_v25  ;;  %2209 = vmatprep.mubr.bf16.mxu0 %v9870_v0 }
 0x1ef   :  { %v7487_v54 = vpop.f32.mrf.mxu1  ;;  %5798 = vmatmul.mubr.msk.bf16.gmra.mxu1 %vm650_vm2, %v7254_v17  ;;  %v7491_v29 = vpop.f32.mrf.mxu0 }
 0x1f0   :  { %9887 = vst [vmem:[#allocation11_spill] sm:$0xff] %v7487_v54  ;;  %9888 = vst [vmem:[#allocation12_spill] sm:$0xff] %v7491_v29  ;;  %1117 = vmatprep.mubr.bf16.mxu1 %v9870_v0 }
 0x1f1   :  { %v7495_v51 = vpop.f32.mrf.mxu1  ;;  %v7497_v2 = vpop.f32.mrf.mxu0 }
 0x1f2   :  { %9889 = vst [vmem:[#allocation13_spill] sm:$0xff] %v7495_v51  ;;  %9890 = vst [vmem:[#allocation14_spill] sm:$0xff] %v7497_v2 }
 0x1f3   :  { %v7499_v15 = vpop.f32.mrf.mxu1  ;;  %v7501_v10 = vpop.f32.mrf.mxu0 }
 0x1f4   :  { %9891 = vst [vmem:[#allocation15_spill] sm:$0xff] %v7499_v15  ;;  %9892 = vst [vmem:[#allocation16_spill] sm:$0xff] %v7501_v10 }
 0x1f5   :  { %v7504_v41 = vpop.f32.mrf.mxu1  ;;  %v7506_v25 = vpop.f32.mrf.mxu0  ;;  %5875 = vmatmul.mubr.msk.bf16.gmra.mxu0 %vm650_vm2, %v1964_v24 }
 0x1f6   :  { %9893 = vst [vmem:[#allocation17_spill] sm:$0xff] %v7504_v41  ;;  %9894 = vst [vmem:[#allocation18_spill] sm:$0xff] %v7506_v25  ;;  %2219 = vmatprep.mubr.bf16.mxu0 %v9870_v0 }
 0x1f7   :  { %v7510_v17 = vpop.f32.mrf.mxu1  ;;  %5799 = vmatmul.mubr.msk.bf16.gmra.mxu1 %vm650_vm2, %v7268_v42  ;;  %v7514_v2 = vpop.f32.mrf.mxu0 }
 0x1f8   :  { %9895 = vst [vmem:[#allocation19_spill] sm:$0xff] %v7510_v17  ;;  %9896 = vst [vmem:[#allocation20_spill] sm:$0xff] %v7514_v2  ;;  %1127 = vmatprep.mubr.bf16.mxu1 %v9870_v0 }
 0x1f9   :  { %v7517_v10 = vpop.f32.mrf.mxu1  ;;  %v7519_v61 = vpop.f32.mrf.mxu0 }
 0x1fa   :  { %9897 = vst [vmem:[#allocation21_spill] sm:$0xff] %v7517_v10  ;;  %9898 = vst [vmem:[#allocation22_spill] sm:$0xff] %v7519_v61 }
 0x1fb   :  { %v7521_v29 = vpop.f32.mrf.mxu1  ;;  %v7523_v25 = vpop.f32.mrf.mxu0 }
 0x1fc   :  { %9899 = vst [vmem:[#allocation23_spill] sm:$0xff] %v7521_v29  ;;  %9900 = vst [vmem:[#allocation24_spill] sm:$0xff] %v7523_v25 }
 0x1fd   :  { %v7525_v24 = vpop.f32.mrf.mxu1  ;;  %v7527_v41 = vpop.f32.mrf.mxu0  ;;  %5876 = vmatmul.mubr.msk.bf16.gmra.mxu0 %vm650_vm2, %v1963_v45 }
 0x1fe   :  { %9901 = vst [vmem:[#allocation25_spill] sm:$0xff] %v7525_v24  ;;  %9902 = vst [vmem:[#allocation26_spill] sm:$0xff] %v7527_v41 }
 0x1ff   :  { %v7530_v17 = vpop.f32.mrf.mxu1  ;;  %5800 = vmatmul.mubr.msk.bf16.gmra.mxu1 %vm650_vm2, %v7282_v4  ;;  %v7534_v42 = vpop.f32.mrf.mxu0 }
 0x200   :  { %9903 = vst [vmem:[#allocation27_spill] sm:$0xff] %v7530_v17  ;;  %9904 = vst [vmem:[#allocation28_spill] sm:$0xff] %v7534_v42  ;;  %1137 = vmatprep.mubr.bf16.mxu1 %v9870_v0 }
 0x201   :  { %v7537_v2 = vpop.f32.mrf.mxu1  ;;  %v7539_v10 = vpop.f32.mrf.mxu0 }
 0x202   :  { %9905 = vst [vmem:[#allocation29_spill] sm:$0xff] %v7537_v2  ;;  %9906 = vst [vmem:[#allocation30_spill] sm:$0xff] %v7539_v10 }
 0x203   :  { %v7541_v25 = vpop.f32.mrf.mxu1  ;;  %v7543_v24 = vpop.f32.mrf.mxu0 }
 0x204   :  { %9907 = vst [vmem:[#allocation31_spill] sm:$0xff] %v7541_v25  ;;  %9908 = vst [vmem:[#allocation32_spill] sm:$0xff] %v7543_v24  ;;  %v6482_v24 = vld [vmem:[%s9855_s2 + $0x70] ss:$8 sps:$4 sm:$0x3f]   ;;  %v9921_v25 = vrot.slane %v7296_v37, 1 }
 0x205   :  { %v7545_v41 = vpop.f32.mrf.mxu1  ;;  %v7547_v45 = vpop.f32.mrf.mxu0 }
 0x206   :  { %9909 = vst [vmem:[#allocation33_spill] sm:$0xff] %v7545_v41  ;;  %9910 = vst [vmem:[#allocation34_spill] sm:$0xff] %v7547_v45 }
 0x207   :  { %v7549_v61 = vpop.f32.mrf.mxu1  ;;  %5801 = vmatmul.mubr.msk.bf16.gmra.mxu1 %vm650_vm2, %v7296_v37  ;;  %v7553_v4 = vpop.f32.mrf.mxu0 }
 0x208   :  { %9911 = vst [vmem:[#allocation35_spill] sm:$0xff] %v7549_v61  ;;  %9912 = vst [vmem:[#allocation36_spill] sm:$0xff] %v7553_v4  ;;  %1455 = vmatprep.mubr.bf16.mxu1 %v9870_v0  ;;  %v1666_v4 = vsel %vm699_vm1, %v6482_v24, 0  ;;  %v6485_v0 = vld [vmem:[%s9855_s2 + $0x64] ss:$8 sps:$4 sm:$0xff]  }
 0x209   :  { %v7556_v42 = vpop.f32.mrf.mxu1  ;;  %v7558_v2 = vpop.f32.mrf.mxu0 }
 0x20a   :  { %9913 = vst [vmem:[#allocation37_spill] sm:$0xff] %v7556_v42  ;;  %9914 = vst [vmem:[#allocation38_spill] sm:$0xff] %v7558_v2 }
 0x20b   :  { %v7563_v41 = vpop.f32.mrf.mxu1  ;;  %v7565_v45 = vpop.f32.mrf.mxu0 }
 0x20c   :  { %9915 = vst [vmem:[#allocation39_spill] sm:$0xff] %v7563_v41  ;;  %9916 = vst [vmem:[#allocation40_spill] sm:$0xff] %v7565_v45  ;;  %v6483_v45 = vld [vmem:[%s9855_s2 + $0x60] ss:$8 sps:$4 sm:$0xff]  }
 0x20d   :  { %v7567_v61 = vpop.f32.mrf.mxu1  ;;  %v7569_v10 = vpop.f32.mrf.mxu0 }
 0x20e   :  { %9917 = vst [vmem:[#allocation41_spill] sm:$0xff] %v7567_v61  ;;  %9918 = vst [vmem:[#allocation42_spill] sm:$0xff] %v7569_v10  ;;  %v9922_v10 = vmov 0  }
 0x20f   :  { %v7575_v42 = vpop.f32.mrf.mxu1  ;;  %v7577_v2 = vpop.f32.mrf.mxu0  ;;  %5826 = vmatmul.mubr.msk.bf16.vlgmr.msra.gmra.mxu1 %vm650_vm2, %v9921_v25 }
 0x210   :  { %9919 = vst [vmem:[#allocation43_spill] sm:$0xff] %v7575_v42  ;;  %9920 = vst [vmem:[#allocation44_spill] sm:$0xff] %v7577_v2  ;;  %1684 = vmatpush1.bf16.msra.mxu1 %v1666_v4  ;;  %1703 = vmatprep.mubr.bf16.mxu1 %v9922_v10 }
 0x211   :  { %v7586_v24 = vpop.f32.mrf.mxu1  ;;  %v7588_v61 = vpop.f32.mrf.mxu0  ;;  %1685 = vmatprep.subr.bf16.mxu1 %v6485_v0 }
 0x212   :  { %9923 = vst [vmem:[#allocation45_spill] sm:$0xff] %v7586_v24  ;;  %9924 = vst [vmem:[#allocation46_spill] sm:$0xff] %v7588_v61 }
 0x213   :  { %v7590_v41 = vpop.f32.mrf.mxu1  ;;  %v7592_v42 = vpop.f32.mrf.mxu0 }
 0x214   :  { %9925 = vst [vmem:[#allocation47_spill] sm:$0xff] %v7590_v41  ;;  %9926 = vst [vmem:[#allocation48_spill] sm:$0xff] %v7592_v42  ;;  %1686 = vmatpush1.bf16.msra.mxu1 %v6483_v45 }
 0x215   :  { %v7594_v37 = vpop.f32.mrf.mxu1  ;;  %v7596_v25 = vpop.f32.mrf.mxu0 }
 0x216   :  { %9927 = vst [vmem:[#allocation49_spill] sm:$0xff] %v7594_v37  ;;  %9928 = vst [vmem:[#allocation50_spill] sm:$0xff] %v7596_v25 }
 0x217   :  { %v7598_v4 = vpop.f32.mrf.mxu1  ;;  %v7600_v2 = vpop.f32.mrf.mxu0  ;;  %5836 = vmatmul.mubr.msk.bf16.vlgmr.msra.gmra.mxu1 %vm650_vm2, %v7116_v63 }
 0x218   :  { %9929 = vst [vmem:[#allocation51_spill] sm:$0xff] %v7598_v4  ;;  %9930 = vst [vmem:[#allocation52_spill] sm:$0xff] %v7600_v2  ;;  %1713 = vmatprep.mubr.bf16.mxu1 %v9922_v10 }
 0x219   :  { %v7605_v61 = vpop.f32.mrf.mxu1  ;;  %v7607_v0 = vpop.f32.mrf.mxu0 }
 0x21a   :  { %9931 = vst [vmem:[#allocation53_spill] sm:$0xff] %v7605_v61  ;;  %9932 = vst [vmem:[#allocation54_spill] sm:$0xff] %v7607_v0 }
 0x21b   :  { %v7609_v41 = vpop.f32.mrf.mxu1  ;;  %v7611_v45 = vpop.f32.mrf.mxu0 }
 0x21c   :  { %9933 = vst [vmem:[#allocation55_spill] sm:$0xff] %v7609_v41  ;;  %9934 = vst [vmem:[#allocation56_spill] sm:$0xff] %v7611_v45 }
 0x21d   :  { %v7613_v42 = vpop.f32.mrf.mxu1  ;;  %v7615_v37 = vpop.f32.mrf.mxu0 }
 0x21e   :  { %9935 = vst [vmem:[#allocation57_spill] sm:$0xff] %v7613_v42  ;;  %9936 = vst [vmem:[#allocation58_spill] sm:$0xff] %v7615_v37 }
 0x21f   :  { %v7617_v25 = vpop.f32.mrf.mxu1  ;;  %v7619_v2 = vpop.f32.mrf.mxu0  ;;  %5837 = vmatmul.mubr.msk.bf16.gmra.mxu1 %vm650_vm2, %v7132_v20 }
 0x220   :  { %9937 = vst [vmem:[#allocation59_spill] sm:$0xff] %v7617_v25  ;;  %9938 = vst [vmem:[#allocation60_spill] sm:$0xff] %v7619_v2  ;;  %1723 = vmatprep.mubr.bf16.mxu1 %v9922_v10 }
 0x221   :  { %v7624_v63 = vpop.f32.mrf.mxu1  ;;  %v7626_v0 = vpop.f32.mrf.mxu0 }
 0x222   :  { %9939 = vst [vmem:[#allocation61_spill] sm:$0xff] %v7624_v63  ;;  %9940 = vst [vmem:[#allocation62_spill] sm:$0xff] %v7626_v0 }
 0x223   :  { %v7628_v41 = vpop.f32.mrf.mxu1  ;;  %v7630_v45 = vpop.f32.mrf.mxu0 }
 0x224   :  { %9941 = vst [vmem:[#allocation63_spill] sm:$0xff] %v7628_v41  ;;  %9942 = vst [vmem:[#allocation64_spill] sm:$0xff] %v7630_v45 }
 0x225   :  { %v7632_v42 = vpop.f32.mrf.mxu1  ;;  %v7634_v37 = vpop.f32.mrf.mxu0 }
 0x226   :  { %9943 = vst [vmem:[#allocation65_spill] sm:$0xff] %v7632_v42  ;;  %9944 = vst [vmem:[#allocation66_spill] sm:$0xff] %v7634_v37 }
 0x227   :  { %v7636_v25 = vpop.f32.mrf.mxu1  ;;  %v7638_v2 = vpop.f32.mrf.mxu0  ;;  %5838 = vmatmul.mubr.msk.bf16.gmra.mxu1 %vm650_vm2, %v7146_v36 }
 0x228   :  { %9945 = vst [vmem:[#allocation67_spill] sm:$0xff] %v7636_v25  ;;  %9946 = vst [vmem:[#allocation68_spill] sm:$0xff] %v7638_v2  ;;  %1733 = vmatprep.mubr.bf16.mxu1 %v9922_v10 }
 0x229   :  { %v7643_v20 = vpop.f32.mrf.mxu1  ;;  %v7645_v63 = vpop.f32.mrf.mxu0 }
 0x22a   :  { %9947 = vst [vmem:[#allocation69_spill] sm:$0xff] %v7643_v20  ;;  %9948 = vst [vmem:[#allocation70_spill] sm:$0xff] %v7645_v63 }
 0x22b   :  { %v7647_v0 = vpop.f32.mrf.mxu1  ;;  %v7649_v45 = vpop.f32.mrf.mxu0 }
 0x22c   :  { %9949 = vst [vmem:[#allocation71_spill] sm:$0xff] %v7647_v0  ;;  %9950 = vst [vmem:[#allocation72_spill] sm:$0xff] %v7649_v45 }
 0x22d   :  { %v7651_v42 = vpop.f32.mrf.mxu1  ;;  %v7653_v37 = vpop.f32.mrf.mxu0 }
 0x22e   :  { %9951 = vst [vmem:[#allocation73_spill] sm:$0xff] %v7651_v42  ;;  %9952 = vst [vmem:[#allocation74_spill] sm:$0xff] %v7653_v37 }
 0x22f   :  { %v7655_v25 = vpop.f32.mrf.mxu1  ;;  %v7657_v2 = vpop.f32.mrf.mxu0  ;;  %5839 = vmatmul.mubr.msk.bf16.gmra.mxu1 %vm650_vm2, %v7160_v53 }
 0x230   :  { %9953 = vst [vmem:[#allocation75_spill] sm:$0xff] %v7655_v25  ;;  %9954 = vst [vmem:[#allocation76_spill] sm:$0xff] %v7657_v2  ;;  %1743 = vmatprep.mubr.bf16.mxu1 %v9922_v10 }
 0x231   :  { %v7662_v36 = vpop.f32.mrf.mxu1  ;;  %v7664_v20 = vpop.f32.mrf.mxu0 }
 0x232   :  { %9955 = vst [vmem:[#allocation77_spill] sm:$0xff] %v7662_v36  ;;  %9956 = vst [vmem:[#allocation78_spill] sm:$0xff] %v7664_v20 }
 0x233   :  { %v7666_v63 = vpop.f32.mrf.mxu1  ;;  %v7670_v42 = vpop.f32.mrf.mxu0 }
 0x234   :  { %9957 = vst [vmem:[#allocation79_spill] sm:$0xff] %v7666_v63  ;;  %9959 = vst [vmem:[#allocation81_spill] sm:$0xff] %v7670_v42 }
 0x235   :  { %v7668_v45 = vpop.f32.mrf.mxu1  ;;  %v7679_v2 = vpop.f32.mrf.mxu0 }
 0x236   :  { %9958 = vst [vmem:[#allocation80_spill] sm:$0xff] %v7668_v45  ;;  %9962 = vst [vmem:[#allocation84_spill] sm:$0xff] %v7679_v2 }
 0x237   :  { %v7672_v37 = vpop.f32.mrf.mxu1  ;;  %5840 = vmatmul.mubr.msk.bf16.gmra.mxu1 %vm650_vm2, %v7174_v12  ;;  %v7685_v63 = vpop.f32.mrf.mxu0 }
 0x238   :  { %9960 = vst [vmem:[#allocation82_spill] sm:$0xff] %v7672_v37  ;;  %1753 = vmatprep.mubr.bf16.mxu1 %v9922_v10  ;;  %9965 = vst [vmem:[#allocation87_spill] sm:$0xff] %v7685_v63 }
 0x239   :  { %v7677_v53 = vpop.f32.mrf.mxu1  ;;  %v7694_v42 = vpop.f32.mrf.mxu0 }
 0x23a   :  { %9961 = vst [vmem:[#allocation83_spill] sm:$0xff] %v7677_v53  ;;  %9968 = vst [vmem:[#allocation90_spill] sm:$0xff] %v7694_v42 }
 0x23b   :  { %v7681_v36 = vpop.f32.mrf.mxu1 }
 0x23c   :  { %9963 = vst [vmem:[#allocation85_spill] sm:$0xff] %v7681_v36  ;;  %v7700_v36 = vpop.f32.mrf.mxu0 }
 0x23d   :  { %v7683_v20 = vpop.f32.mrf.mxu1  ;;  %9971 = vst [vmem:[#allocation93_spill] sm:$0xff] %v7700_v36 }
 0x23e   :  { %9964 = vst [vmem:[#allocation86_spill] sm:$0xff] %v7683_v20  ;;  %v7709_v63 = vpop.f32.mrf.mxu0 }
 0x23f   :  { %v7687_v45 = vpop.f32.mrf.mxu1  ;;  %5841 = vmatmul.mubr.msk.bf16.gmra.mxu1 %vm650_vm2, %v7188_v30  ;;  %9972 = vst [vmem:[#allocation94_spill] sm:$0xff] %v7709_v63 }
 0x240   :  { %9966 = vst [vmem:[#allocation88_spill] sm:$0xff] %v7687_v45  ;;  %1763 = vmatprep.mubr.bf16.mxu1 %v9922_v10 }
 0x241   :  { %v7692_v12 = vpop.f32.mrf.mxu1 }
 0x242   :  { %9967 = vst [vmem:[#allocation89_spill] sm:$0xff] %v7692_v12 }
 0x243   :  { %v7696_v53 = vpop.f32.mrf.mxu1 }
 0x244   :  { %9969 = vst [vmem:[#allocation91_spill] sm:$0xff] %v7696_v53  ;;  %v7715_v53 = vpop.f32.mrf.mxu0 }
 0x245   :  { %v7698_v2 = vpop.f32.mrf.mxu1  ;;  %9974 = vst [vmem:[#allocation96_spill] sm:$0xff] %v7715_v53 }
 0x246   :  { %9970 = vst [vmem:[#allocation92_spill] sm:$0xff] %v7698_v2  ;;  %v7724_v36 = vpop.f32.mrf.mxu0 }
 0x247   :  { %v7702_v20 = vpop.f32.mrf.mxu1  ;;  %5842 = vmatmul.mubr.msk.bf16.gmra.mxu1 %vm650_vm2, %v7202_v49  ;;  %9975 = vst [vmem:[#allocation97_spill] sm:$0xff] %v7724_v36 }
 0x248   :  { %1773 = vmatprep.mubr.bf16.mxu1 %v9922_v10  ;;  %v7730_v37 = vpop.f32.mrf.mxu0 }
 0x249   :  { %v7707_v30 = vpop.f32.mrf.mxu1  ;;  %9976 = vst [vmem:[#allocation98_spill] sm:$0xff] %v7730_v37 }
 0x24a   :  { %v7739_v53 = vpop.f32.mrf.mxu0 }
 0x24b   :  { %v7711_v12 = vpop.f32.mrf.mxu1 }
 0x24c   :  { %v7745_v0 = vpop.f32.mrf.mxu0 }
 0x24d   :  { %v7713_v45 = vpop.f32.mrf.mxu1 }
 0x24e   :  { %9973 = vst [vmem:[#allocation95_spill] sm:$0xff] %v7713_v45  ;;  %v7754_v37 = vpop.f32.mrf.mxu0 }
 0x24f   :  { %v7717_v2 = vpop.f32.mrf.mxu1  ;;  %5843 = vmatmul.mubr.msk.bf16.gmra.mxu1 %vm650_vm2, %v7216_v9 }
 0x250   :  { %1783 = vmatprep.mubr.bf16.mxu1 %v9922_v10  ;;  %v7760_v24 = vpop.f32.mrf.mxu0 }
 0x251   :  { %v7722_v49 = vpop.f32.mrf.mxu1 }
 0x252   :  { %v7769_v29 = vpop.f32.mrf.mxu0 }
 0x253   :  { %v7726_v42 = vpop.f32.mrf.mxu1 }
 0x254   :  { %v7775_v51 = vpop.f32.mrf.mxu0 }
 0x255   :  { %v7728_v63 = vpop.f32.mrf.mxu1 }
 0x256   :  { %v7784_v54 = vpop.f32.mrf.mxu0 }
 0x257   :  { %v7732_v45 = vpop.f32.mrf.mxu1  ;;  %5844 = vmatmul.mubr.msk.bf16.gmra.mxu1 %vm650_vm2, %v7230_v32 }
 0x258   :  { %1793 = vmatprep.mubr.bf16.mxu1 %v9922_v10  ;;  %v7790_v39 = vpop.f32.mrf.mxu0 }
 0x259   :  { %v7737_v9 = vpop.f32.mrf.mxu1 }
 0x25b   :  { %v7741_v25 = vpop.f32.mrf.mxu1 }
 0x25d   :  { %v7743_v36 = vpop.f32.mrf.mxu1 }
 0x25f   :  { %v7747_v41 = vpop.f32.mrf.mxu1  ;;  %5845 = vmatmul.mubr.msk.bf16.gmra.mxu1 %vm650_vm2, %v7244_v55 }
 0x260   :  { %1803 = vmatprep.mubr.bf16.mxu1 %v9922_v10 }
 0x261   :  { %v7752_v32 = vpop.f32.mrf.mxu1 }
 0x263   :  { %v7756_v61 = vpop.f32.mrf.mxu1 }
 0x265   :  { %v7758_v4 = vpop.f32.mrf.mxu1 }
 0x267   :  { %v7762_v17 = vpop.f32.mrf.mxu1  ;;  %5846 = vmatmul.mubr.msk.bf16.gmra.mxu1 %vm650_vm2, %v7258_v18 }
 0x268   :  { %1813 = vmatprep.mubr.bf16.mxu1 %v9922_v10 }
 0x269   :  { %v7767_v55 = vpop.f32.mrf.mxu1 }
 0x26a   :  { %9977 = vst [vmem:[#allocation99_spill] sm:$0xff] %v7767_v55 }
 0x26b   :  { %v7771_v35 = vpop.f32.mrf.mxu1 }
 0x26c   :  { %9978 = vst [vmem:[#allocation100_spill] sm:$0xff] %v7771_v35 }
 0x26d   :  { %v7773_v15 = vpop.f32.mrf.mxu1 }
 0x26e   :  { %9979 = vst [vmem:[#allocation101_spill] sm:$0xff] %v7773_v15 }
 0x26f   :  { %v7777_v19 = vpop.f32.mrf.mxu1  ;;  %5847 = vmatmul.mubr.msk.bf16.gmra.mxu1 %vm650_vm2, %v7272_v43 }
 0x270   :  { %9980 = vst [vmem:[#allocation102_spill] sm:$0xff] %v7777_v19  ;;  %1823 = vmatprep.mubr.bf16.mxu1 %v9922_v10  ;;  %v7799_v19 = vpop.f32.mrf.mxu0 }
 0x271   :  { %v7782_v18 = vpop.f32.mrf.mxu1 }
 0x272   :  { %9981 = vst [vmem:[#allocation103_spill] sm:$0xff] %v7782_v18 }
 0x273   :  { %v7786_v52 = vpop.f32.mrf.mxu1 }
 0x274   :  { %9982 = vst [vmem:[#allocation104_spill] sm:$0xff] %v7786_v52  ;;  %v7805_v52 = vpop.f32.mrf.mxu0 }
 0x275   :  { %v7788_v22 = vpop.f32.mrf.mxu1  ;;  %9988 = vst [vmem:[#allocation110_spill] sm:$0xff] %v7805_v52 }
 0x276   :  { %9983 = vst [vmem:[#allocation105_spill] sm:$0xff] %v7788_v22 }
 0x277   :  { %v7792_v15 = vpop.f32.mrf.mxu1  ;;  %5848 = vmatmul.mubr.msk.bf16.gmra.mxu1 %vm650_vm2, %v7286_v5 }
 0x278   :  { %9984 = vst [vmem:[#allocation106_spill] sm:$0xff] %v7792_v15  ;;  %1833 = vmatprep.mubr.bf16.mxu1 %v9922_v10  ;;  %v7814_v15 = vpop.f32.mrf.mxu0 }
 0x279   :  { %v7797_v43 = vpop.f32.mrf.mxu1  ;;  %9991 = vst [vmem:[#allocation113_spill] sm:$0xff] %v7814_v15 }
 0x27a   :  { %9985 = vst [vmem:[#allocation107_spill] sm:$0xff] %v7797_v43 }
 0x27b   :  { %v7801_v18 = vpop.f32.mrf.mxu1 }
 0x27c   :  { %9986 = vst [vmem:[#allocation108_spill] sm:$0xff] %v7801_v18  ;;  %v7820_v18 = vpop.f32.mrf.mxu0 }
 0x27d   :  { %v7803_v8 = vpop.f32.mrf.mxu1  ;;  %9994 = vst [vmem:[#allocation116_spill] sm:$0xff] %v7820_v18 }
 0x27e   :  { %9987 = vst [vmem:[#allocation109_spill] sm:$0xff] %v7803_v8 }
 0x27f   :  { %v7807_v22 = vpop.f32.mrf.mxu1  ;;  %5849 = vmatmul.mubr.msk.bf16.gmra.mxu1 %vm650_vm2, %v7300_v38 }
 0x280   :  { %9989 = vst [vmem:[#allocation111_spill] sm:$0xff] %v7807_v22  ;;  %1843 = vmatprep.mubr.bf16.mxu1 %v9922_v10  ;;  %v7829_v22 = vpop.f32.mrf.mxu0 }
 0x281   :  { %v7812_v5 = vpop.f32.mrf.mxu1  ;;  %9997 = vst [vmem:[#allocation119_spill] sm:$0xff] %v7829_v22 }
 0x282   :  { %9990 = vst [vmem:[#allocation112_spill] sm:$0xff] %v7812_v5 }
 0x283   :  { %v7816_v43 = vpop.f32.mrf.mxu1 }
 0x284   :  { %9992 = vst [vmem:[#allocation114_spill] sm:$0xff] %v7816_v43  ;;  %v7835_v43 = vpop.f32.mrf.mxu0 }
 0x285   :  { %v7818_v35 = vpop.f32.mrf.mxu1  ;;  %10000 = vst [vmem:[#allocation122_spill] sm:$0xff] %v7835_v43 }
 0x286   :  { %9993 = vst [vmem:[#allocation115_spill] sm:$0xff] %v7818_v35 }
 0x287   :  { %v7822_v8 = vpop.f32.mrf.mxu1  ;;  %5850 = vmatmul.mubr.msk.bf16.gmra.mxu1 %vm650_vm2, %v7318_v60  ;;  %v7843_v60 = vpop.f32.mrf.mxu0 }
 0x288   :  { %9995 = vst [vmem:[#allocation117_spill] sm:$0xff] %v7822_v8  ;;  %1853 = vmatprep.mubr.bf16.mxu1 %v9922_v10  ;;  %10003 = vst [vmem:[#allocation125_spill] sm:$0xff] %v7843_v60 }
 0x289   :  { %v7827_v38 = vpop.f32.mrf.mxu1  ;;  %v7849_v22 = vpop.f32.mrf.mxu0 }
 0x28a   :  { %9996 = vst [vmem:[#allocation118_spill] sm:$0xff] %v7827_v38  ;;  %10006 = vst [vmem:[#allocation128_spill] sm:$0xff] %v7849_v22 }
 0x28b   :  { %v7831_v5 = vpop.f32.mrf.mxu1  ;;  %v7855_v43 = vpop.f32.mrf.mxu0 }
 0x28c   :  { %9998 = vst [vmem:[#allocation120_spill] sm:$0xff] %v7831_v5  ;;  %10009 = vst [vmem:[#allocation131_spill] sm:$0xff] %v7855_v43 }
 0x28d   :  { %v7833_v15 = vpop.f32.mrf.mxu1 }
 0x28e   :  { %9999 = vst [vmem:[#allocation121_spill] sm:$0xff] %v7833_v15 }
 0x28f   :  { %v7837_v35 = vpop.f32.mrf.mxu1  ;;  %5851 = vmatmul.mubr.msk.bf16.gmra.mxu1 %vm650_vm2, %v7311_v58  ;;  %v7861_v58 = vpop.f32.mrf.mxu0 }
 0x290   :  { %10001 = vst [vmem:[#allocation123_spill] sm:$0xff] %v7837_v35  ;;  %10012 = vst [vmem:[#allocation134_spill] sm:$0xff] %v7861_v58 }
 0x291   :  { %v7841_v8 = vpop.f32.mrf.mxu1 }
 0x292   :  { %10002 = vst [vmem:[#allocation124_spill] sm:$0xff] %v7841_v8 }
 0x293   :  { %v7845_v10 = vpop.f32.mrf.mxu1 }
 0x294   :  { %10004 = vst [vmem:[#allocation126_spill] sm:$0xff] %v7845_v10  ;;  %v7867_v10 = vpop.f32.mrf.mxu0 }
 0x295   :  { %v7847_v38 = vpop.f32.mrf.mxu1  ;;  %10015 = vst [vmem:[#allocation137_spill] sm:$0xff] %v7867_v10 }
 0x296   :  { %10005 = vst [vmem:[#allocation127_spill] sm:$0xff] %v7847_v38 }
 0x297   :  { %v7851_v5 = vpop.f32.mrf.mxu1 }
 0x298   :  { %10007 = vst [vmem:[#allocation129_spill] sm:$0xff] %v7851_v5  ;;  %v7873_v5 = vpop.f32.mrf.mxu0 }
 0x299   :  { %v7853_v15 = vpop.f32.mrf.mxu1  ;;  %10018 = vst [vmem:[#allocation140_spill] sm:$0xff] %v7873_v5 }
 0x29a   :  { %10008 = vst [vmem:[#allocation130_spill] sm:$0xff] %v7853_v15 }
 0x29b   :  { %v7857_v35 = vpop.f32.mrf.mxu1 }
 0x29c   :  { %10010 = vst [vmem:[#allocation132_spill] sm:$0xff] %v7857_v35  ;;  %v7879_v35 = vpop.f32.mrf.mxu0 }
 0x29d   :  { %v7859_v18 = vpop.f32.mrf.mxu1  ;;  %10021 = vst [vmem:[#allocation143_spill] sm:$0xff] %v7879_v35 }
 0x29e   :  { %10011 = vst [vmem:[#allocation133_spill] sm:$0xff] %v7859_v18 }
 0x29f   :  { %v7863_v8 = vpop.f32.mrf.mxu1 }
 0x2a0   :  { %10013 = vst [vmem:[#allocation135_spill] sm:$0xff] %v7863_v8  ;;  %v7885_v8 = vpop.f32.mrf.mxu0 }
 0x2a1   :  { %v7865_v60 = vpop.f32.mrf.mxu1  ;;  %10024 = vst [vmem:[#allocation146_spill] sm:$0xff] %v7885_v8 }
 0x2a2   :  { %10014 = vst [vmem:[#allocation136_spill] sm:$0xff] %v7865_v60 }
 0x2a3   :  { %v7869_v38 = vpop.f32.mrf.mxu1 }
 0x2a4   :  { %10016 = vst [vmem:[#allocation138_spill] sm:$0xff] %v7869_v38  ;;  %v7891_v38 = vpop.f32.mrf.mxu0 }
 0x2a5   :  { %v7871_v22 = vpop.f32.mrf.mxu1  ;;  %10027 = vst [vmem:[#allocation149_spill] sm:$0xff] %v7891_v38 }
 0x2a6   :  { %10017 = vst [vmem:[#allocation139_spill] sm:$0xff] %v7871_v22 }
 0x2a7   :  { %v7875_v15 = vpop.f32.mrf.mxu1 }
 0x2a8   :  { %10019 = vst [vmem:[#allocation141_spill] sm:$0xff] %v7875_v15  ;;  %v7897_v15 = vpop.f32.mrf.mxu0 }
 0x2a9   :  { %v7877_v43 = vpop.f32.mrf.mxu1  ;;  %10030 = vst [vmem:[#allocation152_spill] sm:$0xff] %v7897_v15 }
 0x2aa   :  { %10020 = vst [vmem:[#allocation142_spill] sm:$0xff] %v7877_v43 }
 0x2ab   :  { %v7881_v18 = vpop.f32.mrf.mxu1 }
 0x2ac   :  { %10022 = vst [vmem:[#allocation144_spill] sm:$0xff] %v7881_v18  ;;  %v7903_v18 = vpop.f32.mrf.mxu0 }
 0x2ad   :  { %v7883_v58 = vpop.f32.mrf.mxu1  ;;  %10033 = vst [vmem:[#allocation155_spill] sm:$0xff] %v7903_v18 }
 0x2ae   :  { %10023 = vst [vmem:[#allocation145_spill] sm:$0xff] %v7883_v58 }
 0x2af   :  { %v7887_v60 = vpop.f32.mrf.mxu1 }
 0x2b0   :  { %10025 = vst [vmem:[#allocation147_spill] sm:$0xff] %v7887_v60  ;;  %v7909_v60 = vpop.f32.mrf.mxu0 }
 0x2b1   :  { %v7889_v10 = vpop.f32.mrf.mxu1  ;;  %10036 = vst [vmem:[#allocation158_spill] sm:$0xff] %v7909_v60  ;;  %v2296_v60 = vlaneseq }
 0x2b2   :  { %10026 = vst [vmem:[#allocation148_spill] sm:$0xff] %v7889_v10 }
 0x2b3   :  { %v7893_v22 = vpop.f32.mrf.mxu1  ;;  %v7933_v55 = vshrl.u32 %v2296_v60, 7 }
 0x2b4   :  { %10028 = vst [vmem:[#allocation150_spill] sm:$0xff] %v7893_v22  ;;  %v7915_v22 = vpop.f32.mrf.mxu0 }
 0x2b5   :  { %v7895_v5 = vpop.f32.mrf.mxu1  ;;  %10039 = vst [vmem:[#allocation161_spill] sm:$0xff] %v7915_v22  ;;  %10046 = vst [vmem:[#allocation168_spill] sm:$0xff] %v7933_v55 }
 0x2b6   :  { %10029 = vst [vmem:[#allocation151_spill] sm:$0xff] %v7895_v5 }
 0x2b7   :  { %v7899_v43 = vpop.f32.mrf.mxu1 }
 0x2b8   :  { %10031 = vst [vmem:[#allocation153_spill] sm:$0xff] %v7899_v43  ;;  %v7921_v43 = vpop.f32.mrf.mxu0 }
 0x2b9   :  { %v7901_v35 = vpop.f32.mrf.mxu1  ;;  %10042 = vst [vmem:[#allocation164_spill] sm:$0xff] %v7921_v43  ;;  %v990_v43 = vadd.f32 %v7717_v2, %v7395_v26 }
 0x2ba   :  { %10032 = vst [vmem:[#allocation154_spill] sm:$0xff] %v7901_v35  ;;  %v7923_v52 = vpop.f32.mrf.mxu0 }
 0x2bb   :  { %v7905_v58 = vpop.f32.mrf.mxu1  ;;  %10043 = vst [vmem:[#allocation165_spill] sm:$0xff] %v7923_v52  ;;  %v1466_v26 = vadd.f32 %v7391_v11, %v990_v43  ;;  %v9873_v11 = vsub.s32 1, %v7933_v55 }
 0x2bc   :  { %10034 = vst [vmem:[#allocation156_spill] sm:$0xff] %v7905_v58  ;;  %v7928_v23 = vpop.f32.mrf.mxu0 }
 0x2bd   :  { %v7907_v8 = vpop.f32.mrf.mxu1  ;;  %10045 = vst [vmem:[#allocation167_spill] sm:$0xff] %v7928_v23 }
 0x2be   :  { %10035 = vst [vmem:[#allocation157_spill] sm:$0xff] %v7907_v8 }
 0x2bf   :  { %v7911_v10 = vpop.f32.mrf.mxu1 }
 0x2c0   :  { %10037 = vst [vmem:[#allocation159_spill] sm:$0xff] %v7911_v10 }
 0x2c1   :  { %v7913_v38 = vpop.f32.mrf.mxu1 }
 0x2c2   :  { %10038 = vst [vmem:[#allocation160_spill] sm:$0xff] %v7913_v38 }
 0x2c3   :  { %v7917_v5 = vpop.f32.mrf.mxu1 }
 0x2c4   :  { %10040 = vst [vmem:[#allocation162_spill] sm:$0xff] %v7917_v5 }
 0x2c5   :  { %v7919_v15 = vpop.f32.mrf.mxu1 }
 0x2c6   :  { %10041 = vst [vmem:[#allocation163_spill] sm:$0xff] %v7919_v15 }
 0x2c7   :  { %v1139_v35 = vpop.f32.mrf.mxu1 }
 0x2c8   :  { %v1140_v10 = vadd.f32 %v1139_v35, %v7702_v20  ;;  %v992_v20 = vadd.f32 %v7722_v49, %v7403_v33  ;;  %v996_v33 = vadd.f32 %v7728_v63, %v7412_v46  ;;  %v1002_v46 = vadd.f32 %v7737_v9, %v7426_v56 }
 0x2c9   :  { %v1141_v18 = vpop.f32.mrf.mxu1 }
 0x2ca   :  { %v1142_v22 = vadd.f32 %v1141_v18, %v7707_v30  ;;  %v9874_v30 = vsub.s32 0, %v7933_v55  ;;  %v994_v18 = vadd.f32 %v7726_v42, %v7407_v40  ;;  %v1000_v42 = vadd.f32 %v7732_v45, %v7418_v48 }
 0x2cb   :  { %v1143_v58 = vpop.f32.mrf.mxu1 }
 0x2cc   :  { %v1144_v52 = vadd.f32 %v1143_v58, %v7711_v12  ;;  %v1467_v12 = vadd.f32 %v7399_v28, %v992_v20  ;;  %v1468_v60 = vadd.f32 %v7405_v34, %v994_v18  ;;  %v1004_v20 = vadd.f32 %v7741_v25, %v7430_v59 }
 0x2cd   :  { %v7925_v8 = vpop.f32.mrf.mxu1  ;;  %v1470_v9 = vadd.f32 %v7414_v47, %v1000_v42  ;;  %v1006_v59 = vadd.f32 %v7743_v36, %v7435_v3  ;;  %v1012_v36 = vadd.f32 %v7752_v32, %v7449_v16 }
 0x2ce   :  { %10044 = vst [vmem:[#allocation166_spill] sm:$0xff] %v7925_v8  ;;  %v7940_v8 = vpop.f32.mrf.mxu0 }
 0x2cf   :  { %v1457_v38 = vpop.f32.mrf.mxu1 }
 0x2d0   :  { %v7931_v5 = vadd.f32 %v1457_v38, %v1140_v10  ;;  %v7955_v2 = vpop.f32.mrf.mxu0 }
 0x2d1   :  { %v1459_v15 = vpop.f32.mrf.mxu1 }
 0x2d2   :  { %v7938_v1 = vadd.f32 %v1459_v15, %v1142_v22  ;;  %v2294_v22 = vld [vmem:[%s9856_s3] sm:$0x3]  ;;  %v7971_v63 = vpop.f32.mrf.mxu0 }
 0x2d3   :  { %v1461_v35 = vpop.f32.mrf.mxu1  ;;  %v7962_v49 = vrot.slane %v2294_v22, %v9874_v30  ;;  %v7980_v45 = vrot.slane %v2294_v22, %v9873_v11 }
 0x2d4   :  { %v7944_v23 = vadd.f32 %v1461_v35, %v1144_v52  ;;  %v1469_v35 = vadd.f32 %v7409_v44, %v996_v33  ;;  %v7984_v18 = vpop.f32.mrf.mxu0  ;;  %v1010_v33 = vadd.f32 %v7747_v41, %v7441_v7  ;;  %v1014_v41 = vadd.f32 %v7756_v61, %v7453_v6 }
 0x2d5   :  { %v7946_v10 = vpop.f32.mrf.mxu1  ;;  %10047 = vst [vmem:[#allocation169_spill] sm:$0xff] %v7984_v18  ;;  %v1475_v61 = vadd.f32 %v7445_v14, %v1012_v36 }
 0x2d7   :  { %v1705_v15 = vpop.f32.mrf.mxu1 }
 0x2d8   :  { %v1864_v52 = vadd.f32 %v1705_v15, %v1466_v26  ;;  %v1471_v15 = vadd.f32 %v7422_v50, %v1002_v46 }
 0x2d9   :  { %v1707_v40 = vpop.f32.mrf.mxu1 }
 0x2da   :  { %v2230_v43 = vadd.f32 %v7739_v53, %v1864_v52  ;;  %v1865_v38 = vadd.f32 %v1707_v40, %v1467_v12  ;;  %v1472_v12 = vadd.f32 %v7428_v57, %v1004_v20  ;;  %v1473_v57 = vadd.f32 %v7432_v62, %v1006_v59  ;;  %v10050_v59 = vld [vmem:[#allocation99_spill] sm:$0xff] }
 0x2db   :  { %v1709_v28 = vpop.f32.mrf.mxu1  ;;  %v1016_v62 = vadd.f32 %v7758_v4, %v7458_v27  ;;  %v10049_v4 = vld [vmem:[#allocation5_spill] sm:$0xff] }
 0x2dc   :  { %v1866_v58 = vadd.f32 %v1709_v28, %v1468_v60  ;;  %v2306_v26 = vadd.f32 %v7962_v49, %v2230_v43  ;;  %v2231_v48 = vadd.f32 %v7745_v0, %v1865_v38 }
 0x2dd   :  { %v1711_v34 = vpop.f32.mrf.mxu1 }
 0x2de   :  { %v2232_v56 = vadd.f32 %v7754_v37, %v1866_v58  ;;  %v1867_v53 = vadd.f32 %v1711_v34, %v1469_v35  ;;  %v2370_v37 = vmax.f32 %v2306_v26, 0.0  ;;  %v2307_v52 = vadd.f32 %v7980_v45, %v2231_v48 }
 0x2df   :  { %v1715_v44 = vpop.f32.mrf.mxu1  ;;  %v1474_v35 = vadd.f32 %v7437_v13, %v1010_v33 }
 0x2e0   :  { %v2308_v25 = vadd.f32 %v7962_v49, %v2232_v56  ;;  %v2233_v0 = vadd.f32 %v7760_v24, %v1867_v53  ;;  %v1868_v22 = vadd.f32 %v1715_v44, %v1470_v9  ;;  %v7999_v24 = vpop.f32.mrf.mxu0  ;;  %v2371_v60 = vmax.f32 %v2307_v52, 0.0  ;;  %v10053_v52 = vld [vmem:[#allocation2_spill] sm:$0xff] }
 0x2e1   :  { %v1717_v47 = vpop.f32.mrf.mxu1  ;;  %v1476_v9 = vadd.f32 %v7451_v21, %v1014_v41  ;;  %v1477_v21 = vadd.f32 %v10053_v52, %v1016_v62  ;;  %v10056_v41 = vld [vmem:[#allocation3_spill] sm:$0xff]  ;;  %v10069_v52 = vld [vmem:[#allocation104_spill] sm:$0xff] }
 0x2e2   :  { %v2372_v40 = vmax.f32 %v2308_v25, 0.0  ;;  %v2309_v50 = vadd.f32 %v7980_v45, %v2233_v0  ;;  %v2234_v42 = vadd.f32 %v7769_v29, %v1868_v22  ;;  %v1869_v3 = vadd.f32 %v1717_v47, %v1471_v15  ;;  %v8010_v20 = vpop.f32.mrf.mxu0  ;;  %v10051_v22 = vld [vmem:[#allocation7_spill] sm:$0xff] }
 0x2e3   :  { %v1719_v43 = vpop.f32.mrf.mxu1  ;;  %10048 = vst [vmem:[#allocation170_spill] sm:$0xff] %v8010_v20  ;;  %v1022_v25 = vadd.f32 %v10050_v59, %v10049_v4  ;;  %v10066_v59 = vld [vmem:[#allocation13_spill] sm:$0xff] }
 0x2e4   :  { %v8003_v7 = vpack.c.bf16 %v2372_v40, %v2370_v37  ;;  %v1870_v38 = vadd.f32 %v1719_v43, %v1472_v12  ;;  %v2310_v46 = vadd.f32 %v7962_v49, %v2234_v42  ;;  %v2235_v29 = vadd.f32 %v7775_v51, %v1869_v3  ;;  %v10054_v40 = vld [vmem:[#allocation110_spill] sm:$0xff]  ;;  %v10055_v3 = vld [vmem:[#allocation113_spill] sm:$0xff] }
 0x2e5   :  { %v1721_v28 = vpop.f32.mrf.mxu1  ;;  %v2373_v58 = vmax.f32 %v2309_v50, 0.0 }
 0x2e6   :  { %v2236_v16 = vadd.f32 %v7784_v54, %v1870_v38  ;;  %v1871_v32 = vadd.f32 %v1721_v28, %v1473_v57  ;;  %v1020_v54 = vadd.f32 %v7762_v17, %v7464_v31  ;;  %v2374_v56 = vmax.f32 %v2310_v46, 0.0  ;;  %v10052_v31 = vld [vmem:[#allocation100_spill] sm:$0xff] }
 0x2e7   :  { %v1725_v6 = vpop.f32.mrf.mxu1  ;;  %v8013_v26 = vpack.c.bf16 %v2373_v58, %v2371_v60  ;;  %v2311_v13 = vadd.f32 %v7980_v45, %v2235_v29  ;;  %v1024_v17 = vadd.f32 %v10052_v31, %v10051_v22  ;;  %v10058_v46 = vld [vmem:[#allocation4_spill] sm:$0xff]  ;;  %v10059_v58 = vld [vmem:[#allocation9_spill] sm:$0xff] }
 0x2e8   :  { %v2312_v48 = vadd.f32 %v7962_v49, %v2236_v16  ;;  %v2237_v51 = vadd.f32 %v7790_v39, %v1871_v32  ;;  %v1872_v34 = vadd.f32 %v1725_v6, %v1474_v35  ;;  %v8027_v39 = vpop.f32.mrf.mxu0  ;;  %v1478_v38 = vadd.f32 %v10056_v41, %v1020_v54  ;;  %v10060_v16 = vld [vmem:[#allocation101_spill] sm:$0xff]  ;;  %v10061_v6 = vld [vmem:[#allocation116_spill] sm:$0xff] }
 0x2e9   :  { %v1727_v53 = vpop.f32.mrf.mxu1  ;;  %v2375_v47 = vmax.f32 %v2311_v13, 0.0  ;;  %v1479_v29 = vadd.f32 %v10058_v46, %v1022_v25  ;;  %v1026_v32 = vadd.f32 %v10060_v16, %v10059_v58  ;;  %v10067_v25 = vld [vmem:[#allocation103_spill] sm:$0xff]  ;;  %v10072_v41 = vld [vmem:[#allocation125_spill] sm:$0xff]  ;;  %v10073_v46 = vld [vmem:[#allocation10_spill] sm:$0xff] }
 0x2ea   :  { %v2376_v14 = vmax.f32 %v2312_v48, 0.0  ;;  %v2313_v44 = vadd.f32 %v7980_v45, %v2237_v51  ;;  %v2238_v15 = vadd.f32 %v7799_v19, %v1872_v34  ;;  %v1873_v27 = vadd.f32 %v1727_v53, %v1475_v61  ;;  %v8038_v57 = vpop.f32.mrf.mxu0  ;;  %v10062_v48 = vld [vmem:[#allocation11_spill] sm:$0xff]  ;;  %v10063_v51 = vld [vmem:[#allocation102_spill] sm:$0xff]  ;;  %v10074_v58 = vld [vmem:[#allocation17_spill] sm:$0xff] }
 0x2eb   :  { %v1729_v0 = vpop.f32.mrf.mxu1  ;;  %10057 = vst [vmem:[#allocation5_spill] sm:$0xff] %v8038_v57  ;;  %v1030_v34 = vadd.f32 %v10063_v51, %v10062_v48  ;;  %v10064_v53 = vld [vmem:[#allocation6_spill] sm:$0xff]  ;;  %v10075_v16 = vld [vmem:[#allocation105_spill] sm:$0xff]  ;;  %v10078_v51 = vld [vmem:[#allocation19_spill] sm:$0xff] }
 0x2ec   :  { %v8031_v33 = vpack.c.bf16 %v2376_v14, %v2374_v56  ;;  %v1874_v37 = vadd.f32 %v1729_v0, %v1476_v9  ;;  %v2314_v12 = vadd.f32 %v7962_v49, %v2238_v15  ;;  %v2239_v19 = vadd.f32 %v10054_v40, %v1873_v27  ;;  %v10065_v15 = vld [vmem:[#allocation119_spill] sm:$0xff]  ;;  %v8055_v22 = vpop.f32.mrf.mxu0  ;;  %v10070_v40 = vld [vmem:[#allocation8_spill] sm:$0xff] }
 0x2ed   :  { %v1731_v50 = vpop.f32.mrf.mxu1  ;;  %v2377_v42 = vmax.f32 %v2313_v44, 0.0  ;;  %v1480_v9 = vadd.f32 %v10064_v53, %v1024_v17  ;;  %v1032_v0 = vadd.f32 %v10067_v25, %v10066_v59  ;;  %v1481_v17 = vadd.f32 %v10070_v40, %v1026_v32  ;;  %v10080_v53 = vld [vmem:[#allocation128_spill] sm:$0xff] }
 0x2ee   :  { %v2240_v36 = vadd.f32 %v10055_v3, %v1874_v37  ;;  %v1875_v43 = vadd.f32 %v1731_v50, %v1477_v21  ;;  %v2378_v56 = vmax.f32 %v2314_v12, 0.0  ;;  %v2315_v54 = vadd.f32 %v7980_v45, %v2239_v19  ;;  %v10068_v37 = vld [vmem:[#allocation15_spill] sm:$0xff] }
 0x2ef   :  { %v1735_v60 = vpop.f32.mrf.mxu1  ;;  %v8041_v28 = vpack.c.bf16 %v2377_v42, %v2375_v47  ;;  %v1034_v21 = vadd.f32 %v10069_v52, %v10068_v37  ;;  %v10071_v42 = vld [vmem:[#allocation122_spill] sm:$0xff] }
 0x2f0   :  { %v2316_v35 = vadd.f32 %v7962_v49, %v2240_v36  ;;  %v2241_v61 = vadd.f32 %v10061_v6, %v1875_v43  ;;  %v1876_v62 = vadd.f32 %v1735_v60, %v1478_v38  ;;  %v2379_v19 = vmax.f32 %v2315_v54, 0.0  ;;  %v8068_v6 = vpop.f32.mrf.mxu0 }
 0x2f1   :  { %v1737_v13 = vpop.f32.mrf.mxu1  ;;  %10076 = vst [vmem:[#allocation99_spill] sm:$0xff] %v8068_v6 }
 0x2f2   :  { %v2380_v14 = vmax.f32 %v2316_v35, 0.0  ;;  %v2317_v44 = vadd.f32 %v7980_v45, %v2241_v61  ;;  %v2242_v27 = vadd.f32 %v10065_v15, %v1876_v62  ;;  %v1877_v4 = vadd.f32 %v1737_v13, %v1479_v29  ;;  %v10077_v62 = vld [vmem:[#allocation12_spill] sm:$0xff]  ;;  %v8081_v52 = vpop.f32.mrf.mxu0 }
 0x2f3   :  { %v1739_v31 = vpop.f32.mrf.mxu1  ;;  %v1482_v29 = vadd.f32 %v10073_v46, %v1030_v34  ;;  %v1036_v35 = vadd.f32 %v10075_v16, %v10074_v58  ;;  %v1483_v32 = vadd.f32 %v10077_v62, %v1032_v0  ;;  %v10082_v0 = vld [vmem:[#allocation131_spill] sm:$0xff]  ;;  %v10088_v16 = vld [vmem:[#allocation137_spill] sm:$0xff] }
 0x2f4   :  { %v8059_v47 = vpack.c.bf16 %v2380_v14, %v2378_v56  ;;  %v1878_v12 = vadd.f32 %v1739_v31, %v1480_v9  ;;  %v2318_v50 = vadd.f32 %v7962_v49, %v2242_v27  ;;  %v2243_v3 = vadd.f32 %v10071_v42, %v1877_v4  ;;  %v10079_v56 = vld [vmem:[#allocation106_spill] sm:$0xff] }
 0x2f5   :  { %v1741_v36 = vpop.f32.mrf.mxu1  ;;  %v2381_v43 = vmax.f32 %v2317_v44, 0.0  ;;  %v1040_v54 = vadd.f32 %v10079_v56, %v10078_v51  ;;  %v10081_v27 = vld [vmem:[#allocation14_spill] sm:$0xff] }
 0x2f6   :  { %v2244_v38 = vadd.f32 %v10072_v41, %v1878_v12  ;;  %v1879_v60 = vadd.f32 %v1741_v36, %v1481_v17  ;;  %v2382_v44 = vmax.f32 %v2318_v50, 0.0  ;;  %v2319_v34 = vadd.f32 %v7980_v45, %v2243_v3  ;;  %v10084_v50 = vld [vmem:[#allocation18_spill] sm:$0xff]  ;;  %v10085_v3 = vld [vmem:[#allocation23_spill] sm:$0xff] }
 0x2f7   :  { %v1745_v61 = vpop.f32.mrf.mxu1  ;;  %v8071_v48 = vpack.c.bf16 %v2381_v43, %v2379_v19  ;;  %v1484_v4 = vadd.f32 %v10081_v27, %v1034_v21  ;;  %v10083_v19 = vld [vmem:[#allocation16_spill] sm:$0xff]  ;;  %v1486_v36 = vadd.f32 %v10084_v50, %v1040_v54  ;;  %v6488_v56 = vld [vmem:[%s9857_s4 + $0x4] ss:$8 sps:$4 sm:$0xff]  }
 0x2f8   :  { %v2320_v13 = vadd.f32 %v7962_v49, %v2244_v38  ;;  %v2245_v9 = vadd.f32 %v10080_v53, %v1879_v60  ;;  %v1880_v14 = vadd.f32 %v1745_v61, %v1482_v29  ;;  %v1485_v42 = vadd.f32 %v10083_v19, %v1036_v35  ;;  %v10086_v43 = vld [vmem:[#allocation108_spill] sm:$0xff]  ;;  %v10087_v38 = vld [vmem:[#allocation134_spill] sm:$0xff]  ;;  %5892 = vmatprep.mubr.msk.bf16.mxu1 %vm2543_vm6, %v6488_v56 }
 0x2f9   :  { %v1747_v15 = vpop.f32.mrf.mxu1  ;;  %v1044_v41 = vadd.f32 %v10086_v43, %v10085_v3  ;;  %v2383_v21 = vmax.f32 %v2319_v34, 0.0  ;;  %v10095_v3 = vld [vmem:[#allocation114_spill] sm:$0xff] }
 0x2fa   :  { %v2384_v59 = vmax.f32 %v2320_v13, 0.0  ;;  %v2321_v25 = vadd.f32 %v7980_v45, %v2245_v9  ;;  %v2246_v31 = vadd.f32 %v10082_v0, %v1880_v14  ;;  %v1881_v37 = vadd.f32 %v1747_v15, %v1483_v32  ;;  %v8092_v32 = vpop.f32.mrf.mxu0  ;;  %v10089_v13 = vld [vmem:[#allocation140_spill] sm:$0xff]  ;;  %v10090_v14 = vld [vmem:[#allocation27_spill] sm:$0xff] }
 0x2fb   :  { %v1749_v12 = vpop.f32.mrf.mxu1 }
 0x2fc   :  { %v8083_v40 = vpack.c.bf16 %v2384_v59, %v2382_v44  ;;  %v1882_v17 = vadd.f32 %v1749_v12, %v1484_v4  ;;  %v2247_v60 = vadd.f32 %v10087_v38, %v1881_v37  ;;  %v2385_v29 = vmax.f32 %v2321_v25, 0.0  ;;  %v10091_v44 = vld [vmem:[#allocation111_spill] sm:$0xff]  ;;  %v10092_v4 = vld [vmem:[#allocation22_spill] sm:$0xff] }
 0x2fd   :  { %v1751_v46 = vpop.f32.mrf.mxu1  ;;  %v2322_v58 = vadd.f32 %v7962_v49, %v2246_v31  ;;  %v1050_v34 = vadd.f32 %v10091_v44, %v10090_v14  ;;  %v1488_v59 = vadd.f32 %v10092_v4, %v1044_v41  ;;  %v10093_v37 = vld [vmem:[#allocation143_spill] sm:$0xff]  ;;  %v10100_v44 = vld [vmem:[#allocation117_spill] sm:$0xff] }
 0x2fe   :  { %v2248_v61 = vadd.f32 %v10088_v16, %v1882_v17  ;;  %v1883_v62 = vadd.f32 %v1751_v46, %v1485_v42  ;;  %v8094_v35 = vpack.c.bf16 %v2385_v29, %v2383_v21  ;;  %v2323_v15 = vadd.f32 %v7980_v45, %v2247_v60  ;;  %v8110_v17 = vpop.f32.mrf.mxu0  ;;  %v10096_v46 = vld [vmem:[#allocation149_spill] sm:$0xff]  ;;  %v10099_v14 = vld [vmem:[#allocation35_spill] sm:$0xff] }
 0x2ff   :  { %v1755_v51 = vpop.f32.mrf.mxu1  ;;  %v2386_v25 = vmax.f32 %v2322_v58, 0.0  ;;  %v10097_v58 = vld [vmem:[#allocation26_spill] sm:$0xff] }
 0x300   :  { %v2324_v54 = vadd.f32 %v7962_v49, %v2248_v61  ;;  %v2249_v53 = vadd.f32 %v10089_v13, %v1883_v62  ;;  %v1884_v9 = vadd.f32 %v1755_v51, %v1486_v36  ;;  %v10094_v36 = vld [vmem:[#allocation31_spill] sm:$0xff]  ;;  %v2387_v21 = vmax.f32 %v2323_v15, 0.0  ;;  %v8119_v61 = vpop.f32.mrf.mxu0 }
 0x301   :  { %v8104_v27 = vpop.f32.mrf.mxu1  ;;  %v1054_v43 = vadd.f32 %v10095_v3, %v10094_v36  ;;  %v1490_v16 = vadd.f32 %v10097_v58, %v1050_v34  ;;  %v1060_v15 = vadd.f32 %v10100_v44, %v10099_v14  ;;  %v10103_v34 = vld [vmem:[#allocation115_spill] sm:$0xff]  ;;  %v10105_v36 = vld [vmem:[#allocation118_spill] sm:$0xff] }
 0x302   :  { %v2388_v0 = vmax.f32 %v2324_v54, 0.0  ;;  %v2325_v31 = vadd.f32 %v7980_v45, %v2249_v53  ;;  %v2250_v12 = vadd.f32 %v10093_v37, %v1884_v9  ;;  %v10098_v53 = vld [vmem:[#allocation30_spill] sm:$0xff]  ;;  %v10108_v58 = vld [vmem:[#allocation39_spill] sm:$0xff] }
 0x303   :  { %v1759_v19 = vpop.f32.mrf.mxu1  ;;  %v1492_v9 = vadd.f32 %v10098_v53, %v1054_v43  ;;  %v10106_v43 = vld [vmem:[#allocation29_spill] sm:$0xff]  ;;  %v10111_v14 = vld [vmem:[#allocation34_spill] sm:$0xff] }
 0x304   :  { %v8112_v42 = vpack.c.bf16 %v2388_v0, %v2386_v25  ;;  %v1886_v50 = vadd.f32 %v1759_v19, %v1488_v59  ;;  %v2389_v41 = vmax.f32 %v2325_v31, 0.0  ;;  %v2326_v60 = vadd.f32 %v7962_v49, %v2250_v12  ;;  %v10101_v25 = vld [vmem:[#allocation155_spill] sm:$0xff]  ;;  %v10102_v31 = vld [vmem:[#allocation33_spill] sm:$0xff]  ;;  %v8130_v12 = vpop.f32.mrf.mxu0 }
 0x305   :  { %v1761_v38 = vpop.f32.mrf.mxu1  ;;  %v1056_v37 = vadd.f32 %v10103_v34, %v10102_v31  ;;  %v1494_v44 = vadd.f32 %v10111_v14, %v1060_v15  ;;  %v10113_v31 = vld [vmem:[#allocation107_spill] sm:$0xff] }
 0x306   :  { %v2252_v29 = vadd.f32 %v10096_v46, %v1886_v50  ;;  %v8121_v51 = vpack.c.bf16 %v2389_v41, %v2387_v21  ;;  %v2390_v4 = vmax.f32 %v2326_v60, 0.0  ;;  %v10104_v50 = vld [vmem:[#allocation37_spill] sm:$0xff]  ;;  %v10107_v46 = vld [vmem:[#allocation112_spill] sm:$0xff]  ;;  %v10120_v15 = vld [vmem:[#allocation43_spill] sm:$0xff] }
 0x307   :  { %v1765_v62 = vpop.f32.mrf.mxu1  ;;  %v1062_v3 = vadd.f32 %v10105_v36, %v10104_v50  ;;  %v10109_v60 = vld [vmem:[#allocation120_spill] sm:$0xff]  ;;  %v10114_v50 = vld [vmem:[#allocation25_spill] sm:$0xff]  ;;  %v10121_v14 = vld [vmem:[#allocation123_spill] sm:$0xff] }
 0x308   :  { %v2328_v56 = vadd.f32 %v7962_v49, %v2252_v29  ;;  %v1888_v54 = vadd.f32 %v1765_v62, %v1490_v16  ;;  %v1052_v29 = vadd.f32 %v10107_v46, %v10106_v43  ;;  %v1064_v16 = vadd.f32 %v10109_v60, %v10108_v58  ;;  %v10117_v46 = vld [vmem:[#allocation41_spill] sm:$0xff] }
 0x309   :  { %v1767_v13 = vpop.f32.mrf.mxu1  ;;  %v10118_v58 = vld [vmem:[#allocation121_spill] sm:$0xff]  ;;  %v1070_v30 = vadd.f32 %v10121_v14, %v10120_v15  ;;  %v10129_v15 = vld [vmem:[#allocation24_spill] sm:$0xff] }
 0x30a   :  { %v2392_v59 = vmax.f32 %v2328_v56, 0.0  ;;  %v2254_v0 = vadd.f32 %v10101_v25, %v1888_v54  ;;  %v10110_v54 = vld [vmem:[#allocation161_spill] sm:$0xff]  ;;  %v1066_v60 = vadd.f32 %v10118_v58, %v10117_v46  ;;  %v10126_v58 = vld [vmem:[#allocation124_spill] sm:$0xff] }
 0x30b   :  { %v1769_v19 = vpop.f32.mrf.mxu1  ;;  %v10112_v25 = vld [vmem:[#allocation21_spill] sm:$0xff] }
 0x30c   :  { %v8134_v21 = vpack.c.bf16 %v2392_v59, %v2390_v4  ;;  %v1890_v41 = vadd.f32 %v1769_v19, %v1492_v9  ;;  %v2330_v56 = vadd.f32 %v7962_v49, %v2254_v0  ;;  %v1042_v34 = vadd.f32 %v10113_v31, %v10112_v25  ;;  %v10115_v4 = vld [vmem:[#allocation109_spill] sm:$0xff]  ;;  %v8147_v9 = vpop.f32.mrf.mxu0  ;;  %v10116_v19 = vld [vmem:[#allocation32_spill] sm:$0xff] }
 0x30d   :  { %v1771_v62 = vpop.f32.mrf.mxu1  ;;  %v1046_v59 = vadd.f32 %v10115_v4, %v10114_v50  ;;  %v1493_v36 = vadd.f32 %v10116_v19, %v1056_v37  ;;  %v10122_v25 = vld [vmem:[#allocation28_spill] sm:$0xff]  ;;  %v10123_v4 = vld [vmem:[#allocation38_spill] sm:$0xff]  ;;  %v10124_v19 = vld [vmem:[#allocation165_spill] sm:$0xff] }
 0x30e   :  { %v2256_v53 = vadd.f32 %v10110_v54, %v1890_v41  ;;  %v10119_v41 = vld [vmem:[#allocation36_spill] sm:$0xff]  ;;  %v1491_v31 = vadd.f32 %v10122_v25, %v1052_v29  ;;  %v1496_v18 = vadd.f32 %v10123_v4, %v1064_v16  ;;  %v2394_v20 = vmax.f32 %v2330_v56, 0.0  ;;  %v10125_v46 = vld [vmem:[#allocation45_spill] sm:$0xff] }
 0x30f   :  { %v1775_v43 = vpop.f32.mrf.mxu1  ;;  %v1495_v54 = vadd.f32 %v10119_v41, %v1062_v3  ;;  %v1891_v55 = vadd.f32 %v1771_v62, %v1493_v36  ;;  %v8163_v41 = vpop.f32.mrf.mxu0  ;;  %v1489_v14 = vadd.f32 %v10129_v15, %v1046_v59  ;;  %v10130_v36 = vld [vmem:[#allocation20_spill] sm:$0xff] }
 0x310   :  { %v2332_v0 = vadd.f32 %v7962_v49, %v2256_v53  ;;  %v1892_v11 = vadd.f32 %v1775_v43, %v1494_v44  ;;  %v1072_v53 = vadd.f32 %v10126_v58, %v10125_v46  ;;  %v10127_v44 = vld [vmem:[#allocation47_spill] sm:$0xff]  ;;  %v10128_v43 = vld [vmem:[#allocation126_spill] sm:$0xff]  ;;  %v1889_v29 = vadd.f32 %v1767_v13, %v1491_v31 }
 0x311   :  { %v1777_v50 = vpop.f32.mrf.mxu1  ;;  %v1074_v3 = vadd.f32 %v10128_v43, %v10127_v44  ;;  %v1487_v25 = vadd.f32 %v10130_v36, %v1042_v34  ;;  %v10133_v46 = vld [vmem:[#allocation167_spill] sm:$0xff]  ;;  %v10134_v13 = vld [vmem:[#allocation42_spill] sm:$0xff]  ;;  %v8175_v15 = vpop.f32.mrf.mxu0 }
 0x312   :  { %v2396_v37 = vmax.f32 %v2332_v0, 0.0  ;;  %v2258_v57 = vadd.f32 %v10124_v19, %v1892_v11  ;;  %v1893_v6 = vadd.f32 %v1777_v50, %v1495_v54  ;;  %v10131_v0 = vld [vmem:[#allocation40_spill] sm:$0xff]  ;;  %v1887_v54 = vadd.f32 %v1761_v38, %v1489_v14 }
 0x313   :  { %v1779_v62 = vpop.f32.mrf.mxu1  ;;  %v1497_v11 = vadd.f32 %v10131_v0, %v1066_v60  ;;  %v10132_v50 = vld [vmem:[#allocation164_spill] sm:$0xff]  ;;  %v1498_v31 = vadd.f32 %v10134_v13, %v1070_v30  ;;  %v10142_v13 = vld [vmem:[#allocation53_spill] sm:$0xff] }
 0x314   :  { %v8167_v16 = vpack.c.bf16 %v2396_v37, %v2394_v20  ;;  %v1894_v56 = vadd.f32 %v1779_v62, %v1496_v18  ;;  %v2257_v4 = vadd.f32 %v10132_v50, %v1891_v55  ;;  %v2334_v19 = vadd.f32 %v7962_v49, %v2258_v57  ;;  %v10135_v18 = vld [vmem:[#allocation158_spill] sm:$0xff]  ;;  %v10136_v38 = vld [vmem:[#allocation44_spill] sm:$0xff]  ;;  %v10138_v57 = vld [vmem:[#allocation51_spill] sm:$0xff] }
 0x315   :  { %v2259_v58 = vadd.f32 %v10133_v46, %v1893_v6  ;;  %v1781_v44 = vpop.f32.mrf.mxu1  ;;  %v1885_v20 = vadd.f32 %v8104_v27, %v1487_v25  ;;  %v2255_v34 = vadd.f32 %v10135_v18, %v1889_v29  ;;  %v1499_v37 = vadd.f32 %v10136_v38, %v1072_v53  ;;  %v10137_v55 = vld [vmem:[#allocation46_spill] sm:$0xff]  ;;  %v10139_v62 = vld [vmem:[#allocation129_spill] sm:$0xff]  ;;  %v10140_v30 = vld [vmem:[#allocation152_spill] sm:$0xff] }
 0x316   :  { %v2260_v43 = vadd.f32 %v7940_v8, %v1894_v56  ;;  %v1895_v59 = vadd.f32 %v1781_v44, %v1497_v11  ;;  %v1500_v14 = vadd.f32 %v10137_v55, %v1074_v3  ;;  %v1080_v6 = vadd.f32 %v10139_v62, %v10138_v57  ;;  %v8192_v44 = vpop.f32.mrf.mxu0 }
 0x317   :  { %v1785_v60 = vpop.f32.mrf.mxu1  ;;  %v2253_v0 = vadd.f32 %v10140_v30, %v1887_v54  ;;  %v2333_v11 = vadd.f32 %v7980_v45, %v2257_v4  ;;  %v2398_v27 = vmax.f32 %v2334_v19, 0.0  ;;  %v2335_v29 = vadd.f32 %v7980_v45, %v2259_v58  ;;  %v10143_v4 = vld [vmem:[#allocation130_spill] sm:$0xff]  ;;  %v10145_v58 = vld [vmem:[#allocation132_spill] sm:$0xff] }
 0x318   :  { %v2336_v36 = vadd.f32 %v7962_v49, %v2260_v43  ;;  %v2261_v8 = vadd.f32 %v7955_v2, %v1895_v59  ;;  %v1896_v56 = vadd.f32 %v1785_v60, %v1498_v31  ;;  %v10141_v43 = vld [vmem:[#allocation146_spill] sm:$0xff]  ;;  %v2331_v59 = vadd.f32 %v7980_v45, %v2255_v34  ;;  %v10144_v31 = vld [vmem:[#allocation55_spill] sm:$0xff] }
 0x319   :  { %v1787_v25 = vpop.f32.mrf.mxu1  ;;  %v2251_v2 = vadd.f32 %v10141_v43, %v1885_v20  ;;  %v1082_v19 = vadd.f32 %v10143_v4, %v10142_v13  ;;  %v1084_v18 = vadd.f32 %v10145_v58, %v10144_v31  ;;  %v2329_v55 = vadd.f32 %v7980_v45, %v2253_v0  ;;  %v10150_v13 = vld [vmem:[#allocation54_spill] sm:$0xff] }
 0x31a   :  { %v2400_v50 = vmax.f32 %v2336_v36, 0.0  ;;  %v2337_v53 = vadd.f32 %v7980_v45, %v2261_v8  ;;  %v2262_v3 = vadd.f32 %v7971_v63, %v1896_v56  ;;  %v8190_v46 = vadd.f32 %v1787_v25, %v1499_v37  ;;  %v10146_v36 = vld [vmem:[#allocation50_spill] sm:$0xff]  ;;  %v8206_v56 = vpop.f32.mrf.mxu0 }
 0x31b   :  { %v1789_v54 = vpop.f32.mrf.mxu1  ;;  %v2399_v63 = vmax.f32 %v2335_v29, 0.0  ;;  %v2397_v62 = vmax.f32 %v2333_v11, 0.0  ;;  %v1502_v8 = vadd.f32 %v10146_v36, %v1080_v6  ;;  %v2327_v30 = vadd.f32 %v7980_v45, %v2251_v2  ;;  %v10149_v11 = vld [vmem:[#allocation135_spill] sm:$0xff] }
 0x31c   :  { %v2448_v60 = vpack.c.bf16 %v2400_v50, %v2398_v27  ;;  %v1898_v38 = vadd.f32 %v1789_v54, %v1500_v14  ;;  %v2401_v57 = vmax.f32 %v2337_v53, 0.0  ;;  %v2338_v20 = vadd.f32 %v7962_v49, %v2262_v3  ;;  %v10147_v50 = vld [vmem:[#allocation52_spill] sm:$0xff]  ;;  %v10148_v53 = vld [vmem:[#allocation59_spill] sm:$0xff] }
 0x31d   :  { %v8201_v37 = vpop.f32.mrf.mxu1  ;;  %v2395_v25 = vmax.f32 %v2331_v59, 0.0  ;;  %v1503_v43 = vadd.f32 %v10147_v50, %v1082_v19  ;;  %v1090_v54 = vadd.f32 %v10149_v11, %v10148_v53  ;;  %v1504_v6 = vadd.f32 %v10150_v13, %v1084_v18  ;;  %v10151_v36 = vld [vmem:[#allocation63_spill] sm:$0xff]  ;;  %v10154_v50 = vld [vmem:[#allocation62_spill] sm:$0xff]  ;;  %v10156_v11 = vld [vmem:[#allocation141_spill] sm:$0xff] }
 0x31e   :  { %v2264_v34 = vadd.f32 %v7999_v24, %v1898_v38  ;;  %v2449_v14 = vpack.c.bf16 %v2401_v57, %v2399_v63  ;;  %v2393_v4 = vmax.f32 %v2329_v55, 0.0  ;;  %v2402_v31 = vmax.f32 %v2338_v20, 0.0  ;;  %v8217_v38 = vpop.f32.mrf.mxu0  ;;  %v10155_v53 = vld [vmem:[#allocation67_spill] sm:$0xff] }
 0x31f   :  { %v1795_v27 = vpop.f32.mrf.mxu1  ;;  %v2447_v24 = vpack.c.bf16 %v2397_v62, %v2395_v25  ;;  %v2391_v63 = vmax.f32 %v2327_v30, 0.0  ;;  %v10152_v62 = vld [vmem:[#allocation138_spill] sm:$0xff] }
 0x320   :  { %v2340_v0 = vadd.f32 %v7962_v49, %v2264_v34  ;;  %v1900_v29 = vadd.f32 %v1795_v27, %v1502_v8  ;;  %2571 = vmatprep.subr.bf16.mxu1 %v2449_v14  ;;  %v1094_v8 = vadd.f32 %v10152_v62, %v10151_v36  ;;  %v8229_v30 = vpop.f32.mrf.mxu0 }
 0x321   :  { %v1797_v3 = vpop.f32.mrf.mxu1  ;;  %2572 = vmatpush1.bf16.msra.mxu1 %v2448_v60  ;;  %v2445_v55 = vpack.c.bf16 %v2393_v4, %v2391_v63  ;;  %v10153_v60 = vld [vmem:[#allocation58_spill] sm:$0xff] }
 0x322   :  { %v2404_v58 = vmax.f32 %v2340_v0, 0.0  ;;  %v2266_v2 = vadd.f32 %v8027_v39, %v1900_v29  ;;  %v8215_v59 = vadd.f32 %v1797_v3, %v1503_v43  ;;  %2573 = vmatprep.subr.bf16.mxu1 %v2447_v24  ;;  %v1506_v25 = vadd.f32 %v10153_v60, %v1090_v54  ;;  %v8239_v54 = vpop.f32.mrf.mxu0  ;;  %v10161_v60 = vld [vmem:[#allocation75_spill] sm:$0xff] }
 0x323   :  { %v1799_v19 = vpop.f32.mrf.mxu1  ;;  %v1508_v43 = vadd.f32 %v10154_v50, %v1094_v8  ;;  %v1100_v3 = vadd.f32 %v10156_v11, %v10155_v53  ;;  %v6512_v53 = vld [vmem:[%s9858_s5 + $0x10c] ss:$8 sps:$4 sm:$0xff]  }
 0x324   :  { %v8219_v57 = vpack.c.bf16 %v2404_v58, %v2402_v31  ;;  %v1902_v34 = vadd.f32 %v1799_v19, %v1504_v6  ;;  %v2342_v20 = vadd.f32 %v7962_v49, %v2266_v2  ;;  %v10157_v31 = vld [vmem:[#allocation71_spill] sm:$0xff]  ;;  %v10158_v58 = vld [vmem:[#allocation144_spill] sm:$0xff]  ;;  %v8252_v36 = vpop.f32.mrf.mxu0 }
 0x325   :  { %v8223_v18 = vpop.f32.mrf.mxu1  ;;  %2574 = vmatpush1.bf16.msra.mxu1 %v8167_v16  ;;  %v1104_v2 = vadd.f32 %v10158_v58, %v10157_v31  ;;  %v6515_v58 = vld [vmem:[%s9858_s5 + $0xfc] ss:$8 sps:$4 sm:$0xff]  }
 0x326   :  { %v2268_v39 = vadd.f32 %v8055_v22, %v1902_v34  ;;  %2575 = vmatprep.subr.bf16.mxu1 %v2445_v55  ;;  %v2406_v24 = vmax.f32 %v2342_v20, 0.0  ;;  %v10160_v20 = vld [vmem:[#allocation70_spill] sm:$0xff]  ;;  %v8269_v50 = vpop.f32.mrf.mxu0 }
 0x327   :  { %v1805_v27 = vpop.f32.mrf.mxu1 }
 0x328   :  { %v2344_v14 = vadd.f32 %v7962_v49, %v2268_v39  ;;  %v1904_v0 = vadd.f32 %v1805_v27, %v1506_v25  ;;  %v1512_v39 = vadd.f32 %v10160_v20, %v1104_v2  ;;  %v8291_v2 = vpop.f32.mrf.mxu0 }
 0x329   :  { %v8232_v29 = vpop.f32.mrf.mxu1  ;;  %2576 = vmatpush1.bf16.msra.mxu1 %v8134_v21 }
 0x32a   :  { %v2408_v22 = vmax.f32 %v2344_v14, 0.0  ;;  %v2270_v16 = vadd.f32 %v8081_v52, %v1904_v0  ;;  %2577 = vmatprep.subr.bf16.mxu1 %v8121_v51  ;;  %v10159_v52 = vld [vmem:[#allocation66_spill] sm:$0xff] }
 0x32b   :  { %v1809_v13 = vpop.f32.mrf.mxu1  ;;  %v1510_v21 = vadd.f32 %v10159_v52, %v1100_v3 }
 0x32c   :  { %v8242_v6 = vpack.c.bf16 %v2408_v22, %v2406_v24  ;;  %v1906_v4 = vadd.f32 %v1809_v13, %v1508_v43  ;;  %v2346_v19 = vadd.f32 %v7962_v49, %v2270_v16  ;;  %v10164_v24 = vld [vmem:[#allocation150_spill] sm:$0xff]  ;;  %v6510_v16 = vld [vmem:[%s9858_s5 + $0x108] ss:$8 sps:$4 sm:$0xff]  }
 0x32d   :  { %v8246_v63 = vpop.f32.mrf.mxu1  ;;  %2578 = vmatpush1.bf16.msra.mxu1 %v8112_v42  ;;  %v10162_v42 = vld [vmem:[#allocation147_spill] sm:$0xff] }
 0x32e   :  { %v2272_v34 = vadd.f32 %v8110_v17, %v1906_v4  ;;  %2579 = vmatprep.subr.bf16.mxu1 %v8094_v35  ;;  %v6507_v17 = vld [vmem:[%s9858_s5 + $0x118] ss:$8 sps:$4 sm:$0xff]   ;;  %v1110_v25 = vadd.f32 %v10162_v42, %v10161_v60  ;;  %v2410_v27 = vmax.f32 %v2346_v19, 0.0  ;;  %v6509_v35 = vld [vmem:[%s9858_s5 + $0x11c] ss:$8 sps:$4 sm:$0xff]   ;;  %v2211_v42 = vpop.f32.mrf.mxu0 }
 0x32f   :  { %v1815_v51 = vpop.f32.mrf.mxu1  ;;  %2982 = vmatprep.subr.bf16.mxu0 %v6509_v35  ;;  %v10165_v4 = vld [vmem:[#allocation74_spill] sm:$0xff]  ;;  %v6518_v60 = vld [vmem:[%s9858_s5 + $0xec] ss:$8 sps:$4 sm:$0xff]  }
 0x330   :  { %v2348_v62 = vadd.f32 %v7962_v49, %v2272_v34  ;;  %v1908_v8 = vadd.f32 %v1815_v51, %v1510_v21  ;;  %2983 = vmatpush1.bf16.msra.mxu0 %v6507_v17  ;;  %v1514_v31 = vadd.f32 %v10165_v4, %v1110_v25  ;;  %v10170_v35 = vld [vmem:[#allocation156_spill] sm:$0xff] }
 0x331   :  { %v8256_v55 = vpop.f32.mrf.mxu1  ;;  %2580 = vmatpush1.bf16.msra.mxu1 %v8083_v40  ;;  %2984 = vmatprep.subr.bf16.mxu0 %v6512_v53 }
 0x332   :  { %v2412_v14 = vmax.f32 %v2348_v62, 0.0  ;;  %v2274_v0 = vadd.f32 %v8130_v12, %v1908_v8  ;;  %2581 = vmatprep.subr.bf16.mxu1 %v8071_v48  ;;  %v10163_v12 = vld [vmem:[#allocation79_spill] sm:$0xff]  ;;  %v10167_v62 = vld [vmem:[#allocation82_spill] sm:$0xff]  ;;  %v10168_v8 = vld [vmem:[#allocation153_spill] sm:$0xff] }
 0x333   :  { %v1819_v43 = vpop.f32.mrf.mxu1  ;;  %v1114_v40 = vadd.f32 %v10164_v24, %v10163_v12  ;;  %v1120_v20 = vadd.f32 %v10168_v8, %v10167_v62  ;;  %v6527_v24 = vld [vmem:[%s9858_s5 + $0xdc] ss:$8 sps:$4 sm:$0xff]  }
 0x334   :  { %v8275_v11 = vpack.c.bf16 %v2412_v14, %v2410_v27  ;;  %v1910_v3 = vadd.f32 %v1819_v43, %v1512_v39  ;;  %v2350_v48 = vadd.f32 %v7962_v49, %v2274_v0  ;;  %2985 = vmatpush1.bf16.msra.mxu0 %v6510_v16  ;;  %v10169_v0 = vld [vmem:[#allocation85_spill] sm:$0xff] }
 0x335   :  { %v8279_v22 = vpop.f32.mrf.mxu1  ;;  %2582 = vmatpush1.bf16.msra.mxu1 %v8059_v47  ;;  %v6513_v47 = vld [vmem:[%s9858_s5 + $0xf8] ss:$8 sps:$4 sm:$0xff]   ;;  %2986 = vmatprep.subr.bf16.mxu0 %v6515_v58  ;;  %v1124_v43 = vadd.f32 %v10170_v35, %v10169_v0 }
 0x336   :  { %v2276_v13 = vadd.f32 %v8163_v41, %v1910_v3  ;;  %2583 = vmatprep.subr.bf16.mxu1 %v8041_v28  ;;  %v10166_v41 = vld [vmem:[#allocation78_spill] sm:$0xff]  ;;  %v2414_v39 = vmax.f32 %v2350_v48, 0.0 }
 0x337   :  { %v1825_v19 = vpop.f32.mrf.mxu1  ;;  %v1516_v51 = vadd.f32 %v10166_v41, %v1114_v40  ;;  %v8325_v40 = vpop.f32.mrf.mxu0 }
 0x338   :  { %v2352_v34 = vadd.f32 %v7962_v49, %v2276_v13  ;;  %v1912_v52 = vadd.f32 %v1825_v19, %v1514_v31  ;;  %2987 = vmatpush1.bf16.msra.mxu0 %v6513_v47  ;;  %v10172_v31 = vld [vmem:[#allocation90_spill] sm:$0xff]  ;;  %v10174_v19 = vld [vmem:[#allocation159_spill] sm:$0xff] }
 0x339   :  { %v8295_v21 = vpop.f32.mrf.mxu1  ;;  %2584 = vmatpush1.bf16.msra.mxu1 %v8031_v33  ;;  %v6516_v33 = vld [vmem:[%s9858_s5 + $0xe8] ss:$8 sps:$4 sm:$0xff]   ;;  %2988 = vmatprep.subr.bf16.mxu0 %v6518_v60  ;;  %v1520_v58 = vadd.f32 %v10172_v31, %v1124_v43  ;;  %v6539_v47 = vld [vmem:[%s9858_s5 + $0xcc] ss:$8 sps:$4 sm:$0xff]   ;;  %v2215_v62 = vpop.f32.mrf.mxu0  ;;  %v10177_v43 = vld [vmem:[#allocation94_spill] sm:$0xff] }
 0x33a   :  { %v2416_v17 = vmax.f32 %v2352_v34, 0.0  ;;  %v2278_v28 = vadd.f32 %v8192_v44, %v1912_v52  ;;  %2585 = vmatprep.subr.bf16.mxu1 %v8013_v26  ;;  %v10171_v26 = vld [vmem:[#allocation84_spill] sm:$0xff]  ;;  %v10175_v60 = vld [vmem:[#allocation91_spill] sm:$0xff] }
 0x33b   :  { %v1829_v25 = vpop.f32.mrf.mxu1  ;;  %v1518_v12 = vadd.f32 %v10171_v26, %v1120_v20  ;;  %v6549_v26 = vld [vmem:[%s9858_s5 + $0xb8] ss:$8 sps:$4 sm:$0xff]  }
 0x33c   :  { %v8309_v27 = vpack.c.bf16 %v2416_v17, %v2414_v39  ;;  %v1914_v14 = vadd.f32 %v1829_v25, %v1516_v51  ;;  %v2354_v44 = vadd.f32 %v7962_v49, %v2278_v28  ;;  %2989 = vmatpush1.bf16.msra.mxu0 %v6516_v33  ;;  %v6537_v17 = vld [vmem:[%s9858_s5 + $0xc8] ss:$8 sps:$4 sm:$0xff]   ;;  %v10176_v25 = vld [vmem:[#allocation162_spill] sm:$0xff] }
 0x33d   :  { %v8313_v53 = vpop.f32.mrf.mxu1  ;;  %2586 = vmatpush1.bf16.msra.mxu1 %v8003_v7  ;;  %v6525_v7 = vld [vmem:[%s9858_s5 + $0xd8] ss:$8 sps:$4 sm:$0xff]   ;;  %2990 = vmatprep.subr.bf16.mxu0 %v6527_v24 }
 0x33e   :  { %v2280_v3 = vadd.f32 %v8217_v38, %v1914_v14  ;;  %v10173_v38 = vld [vmem:[#allocation88_spill] sm:$0xff]  ;;  %v2418_v52 = vmax.f32 %v2354_v44, 0.0  ;;  %v1134_v14 = vadd.f32 %v10176_v25, %v10175_v60  ;;  %v2217_v44 = vpop.f32.mrf.mxu0  ;;  %v10183_v60 = vld [vmem:[#allocation86_spill] sm:$0xff]  ;;  %v10184_v25 = vld [vmem:[#allocation157_spill] sm:$0xff] }
 0x33f   :  { %v1835_v16 = vpop.f32.mrf.mxu1  ;;  %v1130_v34 = vadd.f32 %v10174_v19, %v10173_v38  ;;  %v10180_v38 = vld [vmem:[#allocation97_spill] sm:$0xff] }
 0x340   :  { %v2356_v48 = vadd.f32 %v7962_v49, %v2280_v3  ;;  %v1916_v13 = vadd.f32 %v1835_v16, %v1518_v12  ;;  %2991 = vmatpush1.bf16.msra.mxu0 %v6525_v7  ;;  %v10178_v16 = vld [vmem:[#allocation92_spill] sm:$0xff]  ;;  %v1524_v19 = vadd.f32 %v10180_v38, %v1134_v14  ;;  %v10186_v14 = vld [vmem:[#allocation83_spill] sm:$0xff] }
 0x341   :  { %v8328_v4 = vpop.f32.mrf.mxu1  ;;  %v1522_v33 = vadd.f32 %v10177_v43, %v1130_v34  ;;  %2992 = vmatprep.subr.bf16.mxu0 %v6539_v47  ;;  %v2221_v34 = vpop.f32.mrf.mxu0 }
 0x342   :  { %v2420_v41 = vmax.f32 %v2356_v48, 0.0  ;;  %v2282_v51 = vadd.f32 %v8239_v54, %v1916_v13  ;;  %v6551_v54 = vld [vmem:[%s9858_s5 + $0xbc] ss:$8 sps:$4 sm:$0xff]   ;;  %v10179_v48 = vld [vmem:[#allocation163_spill] sm:$0xff] }
 0x343   :  { %v1839_v8 = vpop.f32.mrf.mxu1  ;;  %v1136_v13 = vadd.f32 %v10179_v48, %v10178_v16 }
 0x344   :  { %v8340_v20 = vpack.c.bf16 %v2420_v41, %v2418_v52  ;;  %v1918_v39 = vadd.f32 %v1839_v8, %v1520_v58  ;;  %v2358_v0 = vadd.f32 %v7962_v49, %v2282_v51  ;;  %2993 = vmatpush1.bf16.msra.mxu0 %v6537_v17  ;;  %v10181_v52 = vld [vmem:[#allocation89_spill] sm:$0xff]  ;;  %v10182_v41 = vld [vmem:[#allocation160_spill] sm:$0xff] }
 0x345   :  { %v1841_v28 = vpop.f32.mrf.mxu1  ;;  %2994 = vmatprep.subr.bf16.mxu0 %v6551_v54  ;;  %v1132_v51 = vadd.f32 %v10182_v41, %v10181_v52  ;;  %v10187_v54 = vld [vmem:[#allocation154_spill] sm:$0xff]  ;;  %v10190_v52 = vld [vmem:[#allocation151_spill] sm:$0xff] }
 0x346   :  { %v2284_v35 = vadd.f32 %v8269_v50, %v1918_v39  ;;  %v2422_v58 = vmax.f32 %v2358_v0, 0.0  ;;  %v10191_v41 = vld [vmem:[#allocation95_spill] sm:$0xff] }
 0x347   :  { %v1845_v3 = vpop.f32.mrf.mxu1 }
 0x348   :  { %v2360_v12 = vadd.f32 %v7962_v49, %v2284_v35  ;;  %v1920_v24 = vadd.f32 %v1845_v3, %v1522_v33  ;;  %v1126_v35 = vadd.f32 %v10184_v25, %v10183_v60  ;;  %2995 = vmatpush1.bf16.msra.mxu0 %v6549_v26  ;;  %v1122_v3 = vadd.f32 %v10187_v54, %v10186_v14  ;;  %v10194_v54 = vld [vmem:[#allocation77_spill] sm:$0xff] }
 0x349   :  { %v1847_v31 = vpop.f32.mrf.mxu1 }
 0x34a   :  { %v2424_v7 = vmax.f32 %v2360_v12, 0.0  ;;  %v2286_v50 = vadd.f32 %v2211_v42, %v1920_v24  ;;  %v10185_v42 = vld [vmem:[#allocation98_spill] sm:$0xff]  ;;  %v2223_v12 = vpop.f32.mrf.mxu0  ;;  %v10188_v24 = vld [vmem:[#allocation96_spill] sm:$0xff] }
 0x34b   :  { %v1849_v47 = vpop.f32.mrf.mxu1  ;;  %v1525_v33 = vadd.f32 %v10185_v42, %v1136_v13  ;;  %v1523_v16 = vadd.f32 %v10188_v24, %v1132_v51  ;;  %v10196_v24 = vld [vmem:[#allocation87_spill] sm:$0xff] }
 0x34c   :  { %v8362_v8 = vpack.c.bf16 %v2424_v7, %v2422_v58  ;;  %v1922_v39 = vadd.f32 %v1849_v47, %v1524_v19  ;;  %v2362_v17 = vadd.f32 %v7962_v49, %v2286_v50  ;;  %v10189_v19 = vld [vmem:[#allocation80_spill] sm:$0xff]  ;;  %v10192_v50 = vld [vmem:[#allocation166_spill] sm:$0xff]  ;;  %v10193_v47 = vld [vmem:[#allocation93_spill] sm:$0xff] }
 0x34d   :  { %v1851_v43 = vpop.f32.mrf.mxu1  ;;  %v1116_v26 = vadd.f32 %v10190_v52, %v10189_v19  ;;  %v1521_v13 = vadd.f32 %v10193_v47, %v1126_v35  ;;  %v10201_v47 = vld [vmem:[#allocation81_spill] sm:$0xff] }
 0x34e   :  { %v2288_v0 = vadd.f32 %v2215_v62, %v1922_v39  ;;  %v1923_v7 = vadd.f32 %v1851_v43, %v1525_v33  ;;  %v1146_v62 = vadd.f32 %v10192_v50, %v10191_v41  ;;  %v1921_v39 = vadd.f32 %v1847_v31, %v1523_v16  ;;  %v2225_v33 = vpop.f32.mrf.mxu0  ;;  %v10197_v16 = vld [vmem:[#allocation61_spill] sm:$0xff] }
 0x34f   :  { %v1855_v48 = vpop.f32.mrf.mxu1  ;;  %v2426_v25 = vmax.f32 %v2362_v17, 0.0  ;;  %v1919_v19 = vadd.f32 %v1841_v28, %v1521_v13 }
 0x350   :  { %v2364_v58 = vadd.f32 %v7962_v49, %v2288_v0  ;;  %v1924_v38 = vadd.f32 %v1855_v48, %v7931_v5  ;;  %v10195_v0 = vld [vmem:[#allocation148_spill] sm:$0xff]  ;;  %v1529_v5 = vadd.f32 %v7946_v10, %v1146_v62  ;;  %v1519_v48 = vadd.f32 %v10196_v24, %v1122_v3 }
 0x351   :  { %v1857_v60 = vpop.f32.mrf.mxu1  ;;  %v1112_v43 = vadd.f32 %v10195_v0, %v10194_v54  ;;  %v2289_v35 = vadd.f32 %v2217_v44, %v1923_v7  ;;  %v2287_v28 = vadd.f32 %v8325_v40, %v1921_v39  ;;  %v10203_v7 = vld [vmem:[#allocation142_spill] sm:$0xff]  ;;  %v2285_v0 = vadd.f32 %v8291_v2, %v1919_v19  ;;  %v10207_v24 = vld [vmem:[#allocation72_spill] sm:$0xff] }
 0x352   :  { %v2428_v42 = vmax.f32 %v2364_v58, 0.0  ;;  %v2290_v14 = vadd.f32 %v2221_v34, %v1924_v38  ;;  %v1925_v51 = vadd.f32 %v1857_v60, %v7938_v1  ;;  %v10198_v34 = vld [vmem:[#allocation136_spill] sm:$0xff]  ;;  %v10199_v1 = vld [vmem:[#allocation73_spill] sm:$0xff]  ;;  %v1517_v60 = vadd.f32 %v10201_v47, %v1116_v26 }
 0x353   :  { %v1859_v52 = vpop.f32.mrf.mxu1  ;;  %v1092_v58 = vadd.f32 %v10198_v34, %v10197_v16  ;;  %v10200_v38 = vld [vmem:[#allocation145_spill] sm:$0xff]  ;;  %v1917_v10 = vadd.f32 %v8328_v4, %v1519_v48  ;;  %v2365_v26 = vadd.f32 %v7980_v45, %v2289_v35  ;;  %v10208_v35 = vld [vmem:[#allocation68_spill] sm:$0xff]  ;;  %v2361_v34 = vadd.f32 %v7980_v45, %v2285_v0 }
 0x354   :  { %v8383_v41 = vpack.c.bf16 %v2428_v42, %v2426_v25  ;;  %v2291_v31 = vadd.f32 %v2223_v12, %v1925_v51  ;;  %v1926_v17 = vadd.f32 %v1859_v52, %v7944_v23  ;;  %v1106_v50 = vadd.f32 %v10200_v38, %v10199_v1  ;;  %v10202_v12 = vld [vmem:[#allocation69_spill] sm:$0xff]  ;;  %v2227_v25 = vpop.f32.mrf.mxu0  ;;  %v10204_v42 = vld [vmem:[#allocation76_spill] sm:$0xff] }
 0x355   :  { %v1861_v62 = vpop.f32.mrf.mxu1  ;;  %v2366_v3 = vadd.f32 %v7962_v49, %v2290_v14  ;;  %v1102_v23 = vadd.f32 %v10203_v7, %v10202_v12  ;;  %v1515_v51 = vadd.f32 %v10204_v42, %v1112_v43  ;;  %v1915_v54 = vadd.f32 %v8313_v53, %v1517_v60  ;;  %v10205_v14 = vld [vmem:[#allocation65_spill] sm:$0xff] }
 0x356   :  { %v2292_v13 = vadd.f32 %v2225_v33, %v1926_v17  ;;  %v1927_v44 = vadd.f32 %v1861_v62, %v1529_v5  ;;  %v2367_v4 = vadd.f32 %v7980_v45, %v2291_v31  ;;  %v10206_v33 = vld [vmem:[#allocation139_spill] sm:$0xff]  ;;  %v1513_v48 = vadd.f32 %v10207_v24, %v1106_v50  ;;  %v10209_v47 = vld [vmem:[#allocation57_spill] sm:$0xff] }
 0x357   :  { %v1096_v5 = vadd.f32 %v10206_v33, %v10205_v14  ;;  %v1913_v52 = vadd.f32 %v8295_v21, %v1515_v51  ;;  %v2283_v43 = vadd.f32 %v8252_v36, %v1917_v10  ;;  %v2363_v53 = vadd.f32 %v7980_v45, %v2287_v28  ;;  %v10210_v36 = vld [vmem:[#allocation133_spill] sm:$0xff]  ;;  %v10211_v10 = vld [vmem:[#allocation64_spill] sm:$0xff] }
 0x358   :  { %v2368_v40 = vadd.f32 %v7962_v49, %v2292_v13  ;;  %v2293_v39 = vadd.f32 %v2227_v25, %v1927_v44  ;;  %v2430_v17 = vmax.f32 %v2366_v3, 0.0  ;;  %v1511_v31 = vadd.f32 %v10208_v35, %v1102_v23  ;;  %v10218_v35 = vld [vmem:[#allocation5_spill] sm:$0xff] }
 0x359   :  { %v1911_v49 = vadd.f32 %v8279_v22, %v1513_v48  ;;  %v2281_v16 = vadd.f32 %v8229_v30, %v1915_v54  ;;  %v2431_v1 = vmax.f32 %v2367_v4, 0.0  ;;  %v2429_v21 = vmax.f32 %v2365_v26, 0.0  ;;  %v10212_v30 = vld [vmem:[#allocation60_spill] sm:$0xff]  ;;  %v10213_v54 = vld [vmem:[#allocation49_spill] sm:$0xff] }
 0x35a   :  { %v2432_v2 = vmax.f32 %v2368_v40, 0.0  ;;  %v2369_v19 = vadd.f32 %v7980_v45, %v2293_v39  ;;  %v1086_v60 = vadd.f32 %v10210_v36, %v10209_v47  ;;  %v1509_v62 = vadd.f32 %v10211_v10, %v1096_v5  ;;  %v10215_v26 = vld [vmem:[#allocation56_spill] sm:$0xff] }
 0x35b   :  { %v1909_v28 = vadd.f32 %v8256_v55, %v1511_v31  ;;  %v2279_v3 = vadd.f32 %v8206_v56, %v1913_v52  ;;  %v2359_v13 = vadd.f32 %v7980_v45, %v2283_v43  ;;  %v2427_v22 = vmax.f32 %v2363_v53, 0.0  ;;  %v10214_v56 = vld [vmem:[#allocation127_spill] sm:$0xff]  ;;  %v10216_v48 = vld [vmem:[#allocation48_spill] sm:$0xff] }
 0x35c   :  { %v2433_v38 = vmax.f32 %v2369_v19, 0.0  ;;  %v2464_v50 = vpack.c.bf16 %v2432_v2, %v2430_v17  ;;  %v1507_v12 = vadd.f32 %v10212_v30, %v1092_v58  ;;  %v1907_v7 = vadd.f32 %v8246_v63, %v1509_v62  ;;  %v10217_v17 = vld [vmem:[#allocation99_spill] sm:$0xff]  ;;  %v6528_v30 = vld [vmem:[%s9858_s5 + $0x50] ss:$8 sps:$4 sm:$0xff]  }
 0x35d   :  { %v2277_v23 = vadd.f32 %v8175_v15, %v1911_v49  ;;  %v2357_v25 = vadd.f32 %v7980_v45, %v2281_v16  ;;  %v2463_v51 = vpack.c.bf16 %v2429_v21, %v2427_v22  ;;  %v2425_v55 = vmax.f32 %v2361_v34, 0.0  ;;  %v10219_v49 = vld [vmem:[#allocation170_spill] sm:$0xff]  ;;  %v6491_v22 = vld [vmem:[%s9857_s4 + $0x10] ss:$8 sps:$4 sm:$0xff]  }
 0x35e   :  { %v2465_v44 = vpack.c.bf16 %v2433_v38, %v2431_v1  ;;  %v2566_v42 = vsel %vm699_vm1, %v2464_v50, 0  ;;  %v1076_v0 = vadd.f32 %v10214_v56, %v10213_v54  ;;  %v1505_v4 = vadd.f32 %v10215_v26, %v1086_v60  ;;  %v10220_v38 = vld [vmem:[#allocation169_spill] sm:$0xff]  ;;  %v6540_v54 = vld [vmem:[%s9858_s5 + $0x20] ss:$8 sps:$4 sm:$0xff]   ;;  %v6498_v26 = vld [vmem:[%s9857_s4 + $0x44] ss:$8 sps:$4 sm:$0xff]  }
 0x35f   :  { %v1905_v58 = vadd.f32 %v8232_v29, %v1507_v12  ;;  %v2275_v63 = vadd.f32 %v8147_v9, %v1909_v28  ;;  %v2355_v15 = vadd.f32 %v7980_v45, %v2279_v3  ;;  %v2423_v40 = vmax.f32 %v2359_v13, 0.0  ;;  %v6521_v3 = vld [vmem:[%s9858_s5 + $0x74] ss:$8 sps:$4 sm:$0xff]   ;;  %v6533_v12 = vld [vmem:[%s9858_s5 + $0x44] ss:$8 sps:$4 sm:$0xff]  }
 0x360   :  { %5891 = vmatprep.subr.msk.bf16.mxu1 %vm699_vm1, %v2465_v44  ;;  %v1903_v39 = vadd.f32 %v8223_v18, %v1505_v4  ;;  %v2273_v14 = vadd.f32 %v8119_v61, %v1907_v7  ;;  %v2353_v33 = vadd.f32 %v7980_v45, %v2277_v23  ;;  %v2421_v24 = vmax.f32 %v2357_v25, 0.0  ;;  %v6530_v13 = vld [vmem:[%s9858_s5 + $0x54] ss:$8 sps:$4 sm:$0xff]   ;;  %v6492_v44 = vld [vmem:[%s9857_s4 + $0x24] ss:$8 sps:$4 sm:$0xff]  }
 0x361   :  { %2588 = vmatpush2.bf16.msra.mxu1 %v2566_v42  ;;  %v2461_v5 = vpack.c.bf16 %v2425_v55, %v2423_v40  ;;  %v1501_v52 = vadd.f32 %v10216_v48, %v1076_v0  ;;  %v2271_v29 = vadd.f32 %v8092_v32, %v1905_v58  ;;  %v2351_v9 = vadd.f32 %v7980_v45, %v2275_v63  ;;  %v6531_v7 = vld [vmem:[%s9858_s5 + $0x40] ss:$8 sps:$4 sm:$0xff]   ;;  %v6536_v23 = vld [vmem:[%s9858_s5 + $0x34] ss:$8 sps:$4 sm:$0xff]   ;;  %v6542_v55 = vld [vmem:[%s9858_s5 + $0x24] ss:$8 sps:$4 sm:$0xff]  }
 0x362   :  { %2589 = vmatprep.subr.bf16.mxu1 %v2463_v51  ;;  %v2419_v43 = vmax.f32 %v2355_v15, 0.0  ;;  %v2269_v18 = vadd.f32 %v10217_v17, %v1903_v39  ;;  %v2349_v61 = vadd.f32 %v7980_v45, %v2273_v14  ;;  %v2417_v19 = vmax.f32 %v2353_v33, 0.0  ;;  %v6494_v25 = vld [vmem:[%s9857_s4 + $0x20] ss:$8 sps:$4 sm:$0xff]   ;;  %v6495_v42 = vld [vmem:[%s9857_s4 + $0x34] ss:$8 sps:$4 sm:$0xff]  }
 0x363   :  { %v1899_v53 = vadd.f32 %v8201_v37, %v1501_v52  ;;  %v2267_v31 = vadd.f32 %v10218_v35, %v8215_v59  ;;  %v2415_v32 = vmax.f32 %v2351_v9, 0.0  ;;  %v2263_v50 = vadd.f32 %v10220_v38, %v8190_v46  ;;  %v6534_v51 = vld [vmem:[%s9858_s5 + $0x30] ss:$8 sps:$4 sm:$0xff]   ;;  %v6545_v56 = vld [vmem:[%s9858_s5 + $0x14] ss:$8 sps:$4 sm:$0xff]   ;;  %v2708_v63 = vld [vmem:[%s9858_s5 + $0xa0] sm:$0xff] }
 0x364   :  { %v2459_v2 = vpack.c.bf16 %v2421_v24, %v2419_v43  ;;  %v2345_v34 = vadd.f32 %v7980_v45, %v2269_v18  ;;  %v2413_v1 = vmax.f32 %v2349_v61, 0.0  ;;  %v6497_v0 = vld [vmem:[%s9857_s4 + $0x30] ss:$8 sps:$4 sm:$0xff]   ;;  %v6548_v58 = vld [vmem:[%s9858_s5 + $0x4] ss:$8 sps:$4 sm:$0xff]   ;;  %v5971_v40 = vcombine.high %v2708_v63, %v2708_v63 }
 0x365   :  { %2590 = vmatpush2.bf16.msra.mxu1 %v8383_v41  ;;  %v2347_v41 = vadd.f32 %v7980_v45, %v2271_v29  ;;  %v2265_v16 = vadd.f32 %v10219_v49, %v1899_v53  ;;  %v2457_v37 = vpack.c.bf16 %v2417_v19, %v2415_v32  ;;  %v2339_v60 = vadd.f32 %v7980_v45, %v2263_v50  ;;  %v6543_v4 = vld [vmem:[%s9858_s5 + $0x10] ss:$8 sps:$4 sm:$0xff]   ;;  %v6546_v15 = vld [vmem:[%s9858_s5] ss:$8 sps:$4 sm:$0xff]   ;;  %v6501_v33 = vld [vmem:[%s9857_s4 + $0x54] ss:$8 sps:$4 sm:$0xff]  }
 0x366   :  { %2591 = vmatprep.subr.bf16.mxu1 %v2461_v5  ;;  %v2409_v36 = vmax.f32 %v2345_v34, 0.0  ;;  %v5970_v39 = vcombine.low %v2708_v63, %v2708_v63  ;;  %v6500_v14 = vld [vmem:[%s9857_s4 + $0x40] ss:$8 sps:$4 sm:$0xff]   ;;  %v6503_v24 = vld [vmem:[%s9857_s4 + $0x50] ss:$8 sps:$4 sm:$0xff]  }
 0x367   :  { %v2411_v21 = vmax.f32 %v2347_v41, 0.0  ;;  %v2341_v59 = vadd.f32 %v7980_v45, %v2265_v16  ;;  %v6504_v48 = vld [vmem:[%s9857_s4 + $0x64] ss:$8 sps:$4 sm:$0xff]   ;;  %v6506_v52 = vld [vmem:[%s9857_s4 + $0x60] ss:$8 sps:$4 sm:$0xff]  }
 0x368   :  { %v3205_v5 = vsel %vm2975_vm7, %v5970_v39, 0  ;;  %v6556_v29 = vld [vmem:[%s9858_s5 + $0x94] ss:$8 sps:$4 sm:$0xff]   ;;  %v6554_v9 = vld [vmem:[%s9858_s5 + $0x90] ss:$8 sps:$4 sm:$0xff]   ;;  %v5919_v61 = vld [vmem:[%s9858_s5 + $0x148] sm:$0xff] }
 0x369   :  { %2592 = vmatpush2.bf16.msra.mxu1 %v8362_v8  ;;  %v2343_v8 = vadd.f32 %v7980_v45, %v2267_v31  ;;  %v2455_v47 = vpack.c.bf16 %v2413_v1, %v2411_v21  ;;  %v2405_v28 = vmax.f32 %v2341_v59, 0.0  ;;  %v6486_v45 = vld [vmem:[%s9857_s4] ss:$8 sps:$4 sm:$0xff]   ;;  %v6559_v43 = vld [vmem:[%s9858_s5 + $0x84] ss:$8 sps:$4 sm:$0xff]   ;;  %v5940_v19 = vcombine.low %v5919_v61, %v5919_v61 }
 0x36a   :  { %2593 = vmatprep.subr.bf16.mxu1 %v2459_v2  ;;  %v6557_v53 = vld [vmem:[%s9858_s5 + $0x80] ss:$8 sps:$4 sm:$0xff]   ;;  %v6562_v17 = vld [vmem:[%s9858_s5 + $0xac] ss:$8 sps:$4 sm:$0xff]   ;;  %v5941_v2 = vcombine.high %v5919_v61, %v5919_v61  ;;  %v6567_v31 = vld [vmem:[%s9858_s5 + $0x13c] ss:$8 sps:$4 sm:$0xff]  }
 0x36b   :  { %v2407_v10 = vmax.f32 %v2343_v8, 0.0  ;;  %v6560_v18 = vld [vmem:[%s9858_s5 + $0xa8] ss:$8 sps:$4 sm:$0xff]   ;;  %2996 = vmatprep.subr.bf16.mxu0 %v6562_v17  ;;  %v2977_v35 = vsel %vm2975_vm7, %v5940_v19, 0  ;;  %v6565_v41 = vld [vmem:[%s9858_s5 + $0x138] ss:$8 sps:$4 sm:$0xff]  }
 0x36c   :  { %2997 = vmatpush1.bf16.msra.mxu0 %v6560_v18  ;;  %v6568_v32 = vld [vmem:[%s9858_s5 + $0x128] ss:$8 sps:$4 sm:$0xff]   ;;  %v6570_v49 = vld [vmem:[%s9858_s5 + $0x12c] ss:$8 sps:$4 sm:$0xff]   ;;  %v6594_v17 = vld [vmem:[%s9858_s5 + $0x21c] ss:$8 sps:$4 sm:$0xff]  }
 0x36d   :  { %2594 = vmatpush2.bf16.msra.mxu1 %v8340_v20  ;;  %v2453_v62 = vpack.c.bf16 %v2409_v36, %v2407_v10  ;;  %v2403_v20 = vmax.f32 %v2339_v60, 0.0  ;;  %5942 = vmatprep.subr.msk.bf16.mxu0 %vm2975_vm7, %v5941_v2  ;;  %v6573_v16 = vld [vmem:[%s9858_s5 + $0x26c] ss:$8 sps:$4 sm:$0xff]   ;;  %v6571_v21 = vld [vmem:[%s9858_s5 + $0x268] ss:$8 sps:$4 sm:$0xff]  }
 0x36e   :  { %2595 = vmatprep.subr.bf16.mxu1 %v2457_v37  ;;  %v6585_v34 = vld [vmem:[%s9858_s5 + $0x1c4] ss:$8 sps:$4 sm:$0xff]   ;;  %v6583_v63 = vld [vmem:[%s9858_s5 + $0x1c0] ss:$8 sps:$4 sm:$0xff]  }
 0x36f   :  { %v2451_v46 = vpack.c.bf16 %v2405_v28, %v2403_v20  ;;  %v6576_v36 = vld [vmem:[%s9858_s5 + $0x25c] ss:$8 sps:$4 sm:$0xff]  }
 0x370   :  { %3009 = vmatpush2.bf16.msra.mxu0 %v2977_v35  ;;  %v6597_v2 = vld [vmem:[%s9858_s5 + $0x1a4] ss:$8 sps:$4 sm:$0xff]  }
 0x371   :  { %2596 = vmatpush2.bf16.msra.mxu1 %v8309_v27  ;;  %v6519_v27 = vld [vmem:[%s9858_s5 + $0x70] ss:$8 sps:$4 sm:$0xff]   ;;  %3010 = vmatprep.subr.bf16.mxu0 %v6567_v31 }
 0x372   :  { %2597 = vmatprep.subr.bf16.mxu1 %v2455_v47 }
 0x374   :  { %3011 = vmatpush2.bf16.msra.mxu0 %v6565_v41 }
 0x375   :  { %2598 = vmatpush2.bf16.msra.mxu1 %v8275_v11  ;;  %v6489_v11 = vld [vmem:[%s9857_s4 + $0x14] ss:$8 sps:$4 sm:$0xff]   ;;  %3012 = vmatprep.subr.bf16.mxu0 %v6570_v49 }
 0x376   :  { %2599 = vmatprep.subr.bf16.mxu1 %v2453_v62  ;;  %v6574_v62 = vld [vmem:[%s9858_s5 + $0x258] ss:$8 sps:$4 sm:$0xff]  }
 0x378   :  { %3013 = vmatpush2.bf16.msra.mxu0 %v6568_v32 }
 0x379   :  { %2600 = vmatpush2.bf16.msra.mxu1 %v8242_v6  ;;  %v6524_v6 = vld [vmem:[%s9858_s5 + $0x64] ss:$8 sps:$4 sm:$0xff]   ;;  %3514 = vmatprep.subr.bf16.mxu0 %v6585_v34  ;;  %v6592_v34 = vld [vmem:[%s9858_s5 + $0x218] ss:$8 sps:$4 sm:$0xff]  }
 0x37a   :  { %2601 = vmatprep.subr.bf16.mxu1 %v2451_v46  ;;  %v6579_v46 = vld [vmem:[%s9858_s5 + $0x24c] ss:$8 sps:$4 sm:$0xff]  }
 0x37d   :  { %2602 = vmatpush2.bf16.msra.mxu1 %v8219_v57  ;;  %v6522_v57 = vld [vmem:[%s9858_s5 + $0x60] ss:$8 sps:$4 sm:$0xff]  }
 0x37e   :  { %3210 = vmatprep.subr.bf16.mxu1 %v6521_v3 }
 0x380   :  { %2604 = vmatmul.mubr.bf16.vlgmr.msra.gmra.mxu1 %v6486_v45 }
 0x381   :  { %5893 = vmatprep.mubr.msk.bf16.mxu1 %vm2543_vm6, %v6489_v11  ;;  %3211 = vmatpush1.bf16.msra.mxu1 %v6519_v27 }
 0x382   :  { %3212 = vmatprep.subr.bf16.mxu1 %v6524_v6 }
 0x385   :  { %3213 = vmatpush1.bf16.msra.mxu1 %v6522_v57  ;;  %v6577_v57 = vld [vmem:[%s9858_s5 + $0x248] ss:$8 sps:$4 sm:$0xff]  }
 0x386   :  { %3214 = vmatprep.subr.bf16.mxu1 %v6530_v13 }
 0x388   :  { %2614 = vmatmul.mubr.bf16.gmra.mxu1 %v6491_v22 }
 0x389   :  { %5894 = vmatprep.mubr.msk.bf16.mxu1 %vm2543_vm6, %v6492_v44  ;;  %3215 = vmatpush1.bf16.msra.mxu1 %v6528_v30  ;;  %v6582_v44 = vld [vmem:[%s9858_s5 + $0x23c] ss:$8 sps:$4 sm:$0xff]  }
 0x38a   :  { %3216 = vmatprep.subr.bf16.mxu1 %v6533_v12 }
 0x38d   :  { %3217 = vmatpush1.bf16.msra.mxu1 %v6531_v7 }
 0x38e   :  { %3218 = vmatprep.subr.bf16.mxu1 %v6536_v23 }
 0x390   :  { %2624 = vmatmul.mubr.bf16.gmra.mxu1 %v6494_v25 }
 0x391   :  { %5895 = vmatprep.mubr.msk.bf16.mxu1 %vm2543_vm6, %v6495_v42  ;;  %3219 = vmatpush1.bf16.msra.mxu1 %v6534_v51 }
 0x392   :  { %3220 = vmatprep.subr.bf16.mxu1 %v6542_v55 }
 0x395   :  { %3221 = vmatpush1.bf16.msra.mxu1 %v6540_v54 }
 0x396   :  { %3222 = vmatprep.subr.bf16.mxu1 %v6545_v56 }
 0x398   :  { %2634 = vmatmul.mubr.bf16.gmra.mxu1 %v6497_v0  ;;  %v6580_v0 = vld [vmem:[%s9858_s5 + $0x238] ss:$8 sps:$4 sm:$0xff]  }
 0x399   :  { %5896 = vmatprep.mubr.msk.bf16.mxu1 %vm2543_vm6, %v6498_v26  ;;  %3223 = vmatpush1.bf16.msra.mxu1 %v6543_v4 }
 0x39a   :  { %3224 = vmatprep.subr.bf16.mxu1 %v6548_v58 }
 0x39d   :  { %3225 = vmatpush1.bf16.msra.mxu1 %v6546_v15  ;;  %v6588_v15 = vld [vmem:[%s9858_s5 + $0x22c] ss:$8 sps:$4 sm:$0xff]  }
 0x39e   :  { %5972 = vmatprep.subr.msk.bf16.mxu1 %vm2975_vm7, %v5971_v40 }
 0x3a0   :  { %2644 = vmatmul.mubr.bf16.gmra.mxu1 %v6500_v14 }
 0x3a1   :  { %5897 = vmatprep.mubr.msk.bf16.mxu1 %vm2543_vm6, %v6501_v33  ;;  %3237 = vmatpush2.bf16.msra.mxu1 %v3205_v5  ;;  %v6591_v33 = vld [vmem:[%s9858_s5 + $0x1b4] ss:$8 sps:$4 sm:$0xff]  }
 0x3a2   :  { %3238 = vmatprep.subr.bf16.mxu1 %v6556_v29 }
 0x3a5   :  { %3239 = vmatpush2.bf16.msra.mxu1 %v6554_v9  ;;  %v6586_v9 = vld [vmem:[%s9858_s5 + $0x228] ss:$8 sps:$4 sm:$0xff]  }
 0x3a6   :  { %3240 = vmatprep.subr.bf16.mxu1 %v6559_v43 }
 0x3a8   :  { %2654 = vmatmul.mubr.bf16.gmra.mxu1 %v6503_v24 }
 0x3a9   :  { %5898 = vmatprep.mubr.msk.bf16.mxu1 %vm2543_vm6, %v6504_v48  ;;  %3241 = vmatpush2.bf16.msra.mxu1 %v6557_v53  ;;  %v6589_v53 = vld [vmem:[%s9858_s5 + $0x1b0] ss:$8 sps:$4 sm:$0xff]  }
 0x3aa   :  { %3860 = vmatprep.subr.bf16.mxu1 %v6573_v16 }
 0x3b0   :  { %2664 = vmatmul.mubr.bf16.gmra.mxu1 %v6506_v52 }
 0x440   :  { %v2605_v37 = vpop.f32.mrf.mxu1 }
 0x442   :  { %v2607_v1 = vpop.f32.mrf.mxu1 }
 0x444   :  { %v2609_v38 = vpop.f32.mrf.mxu1 }
 0x445   :  { %v8601_v59 = vpack.c.bf16 %v2609_v38, %v2605_v37  ;;  %v6595_v38 = vld [vmem:[%s9858_s5 + $0x1a0] ss:$8 sps:$4 sm:$0xff]  }
 0x446   :  { %v2611_v50 = vpop.f32.mrf.mxu1 }
 0x447   :  { %v8596_v8 = vpack.c.bf16 %v2611_v50, %v2607_v1  ;;  %v2734_v28 = vshll.u32 %v8601_v59, 16  ;;  %v2732_v23 = vshrl.u32 %v8601_v59, 16  ;;  %v4013_v26 = vrot.slane %v8601_v59, 2  ;;  %v6600_v50 = vld [vmem:[%s9858_s5 + $0x20c] ss:$8 sps:$4 sm:$0xff]  }
 0x448   :  { %v2615_v47 = vpop.f32.mrf.mxu1 }
 0x449   :  { %5973 = vmatprep.mubr.msk.bf16.mxu1 %vm2953_vm8, %v8596_v8  ;;  %v2746_v10 = vshll.u32 %v8596_v8, 16  ;;  %v2736_v22 = vrot.slane %v2734_v28, 1  ;;  %v2744_v30 = vshrl.u32 %v8596_v8, 16  ;;  %v4016_v51 = vrot.slane %v8596_v8, 2 }
 0x44a   :  { %v2617_v60 = vpop.f32.mrf.mxu1  ;;  %3243 = vmatmul.mubr.bf16.vlgmr.msra.gmra.mxu1 %v8601_v59 }
 0x44b   :  { %3861 = vmatpush1.bf16.msra.mxu1 %v6571_v21  ;;  %v2748_v6 = vrot.slane %v2746_v10, 1  ;;  %v2737_v58 = vor.u32 %v2736_v22, %v2732_v23  ;;  %v6601_v22 = vld [vmem:[%s9858_s5 + $0x190] ss:$8 sps:$4 sm:$0xff]  }
 0x44c   :  { %v2619_v20 = vpop.f32.mrf.mxu1  ;;  %3862 = vmatprep.subr.bf16.mxu1 %v6576_v36 }
 0x44d   :  { %v8617_v3 = vpack.c.bf16 %v2619_v20, %v2615_v47  ;;  %v2749_v54 = vor.u32 %v2748_v6, %v2744_v30 }
 0x44e   :  { %v2621_v45 = vpop.f32.mrf.mxu1 }
 0x44f   :  { %v2739_v11 = vshll.u32 %v8617_v3, 16  ;;  %v8620_v27 = vpack.c.bf16 %v2621_v45, %v2617_v60  ;;  %3863 = vmatpush1.bf16.msra.mxu1 %v6574_v62  ;;  %v4014_v7 = vrot.slane %v8617_v3, 2  ;;  %v2755_v31 = vshrl.u32 %v8617_v3, 16  ;;  %v6603_v60 = vld [vmem:[%s9858_s5 + $0x194] ss:$8 sps:$4 sm:$0xff]  }
 0x450   :  { %v2625_v13 = vpop.f32.mrf.mxu1  ;;  %3864 = vmatprep.subr.bf16.mxu1 %v6579_v46 }
 0x451   :  { %5974 = vmatprep.mubr.msk.bf16.mxu1 %vm2953_vm8, %v8620_v27  ;;  %v2751_v12 = vshll.u32 %v8620_v27, 16  ;;  %v2741_v42 = vrot.slane %v2739_v11, 1  ;;  %v4017_v55 = vrot.slane %v8620_v27, 2  ;;  %v8669_v5 = vsel %vm699_vm1, %v4013_v26, %v4014_v7 }
 0x452   :  { %v2627_v25 = vpop.f32.mrf.mxu1  ;;  %3253 = vmatmul.mubr.bf16.gmra.mxu1 %v8617_v3  ;;  %v2763_v18 = vshrl.u32 %v8620_v27, 16 }
 0x453   :  { %v2753_v56 = vrot.slane %v2751_v12, 1  ;;  %3865 = vmatpush1.bf16.msra.mxu1 %v6577_v57  ;;  %v8660_v40 = vsel %vm699_vm1, %v4016_v51, %v4017_v55  ;;  %v2742_v48 = vsel %vm504_vm4, %v2737_v58, %v2741_v42  ;;  %v2757_v1 = vor.u32 %v2755_v31, %v2741_v42  ;;  %v6598_v57 = vld [vmem:[%s9858_s5 + $0x208] ss:$8 sps:$4 sm:$0xff]   ;;  %v6609_v51 = vld [vmem:[%s9858_s5 + $0x184] ss:$8 sps:$4 sm:$0xff]  }
 0x454   :  { %v2629_v4 = vpop.f32.mrf.mxu1  ;;  %3866 = vmatprep.subr.bf16.mxu1 %v6582_v44  ;;  %v6606_v44 = vld [vmem:[%s9858_s5 + $0x1fc] ss:$8 sps:$4 sm:$0xff]  }
 0x455   :  { %v8662_v39 = vpack.c.bf16 %v2629_v4, %v2625_v13  ;;  %v2754_v14 = vsel %vm504_vm4, %v2749_v54, %v2753_v56  ;;  %v2765_v49 = vor.u32 %v2763_v18, %v2753_v56 }
 0x456   :  { %v2631_v24 = vpop.f32.mrf.mxu1  ;;  %5943 = vmatprep.mubr.msk.bf16.mxu0 %vm2953_vm8, %v2754_v14 }
 0x457   :  { %v8673_v52 = vpack.c.bf16 %v2631_v24, %v2627_v25  ;;  %3015 = vmatmul.mubr.bf16.vlgmr.msra.gmra.mxu0 %v2742_v48  ;;  %v2759_v29 = vshll.u32 %v8662_v39, 16  ;;  %3867 = vmatpush1.bf16.msra.mxu1 %v6580_v0  ;;  %v4019_v19 = vrot.slane %v8662_v39, 2  ;;  %v2771_v56 = vshrl.u32 %v8662_v39, 16  ;;  %v6607_v24 = vld [vmem:[%s9858_s5 + $0x180] ss:$8 sps:$4 sm:$0xff]  }
 0x458   :  { %v2635_v43 = vpop.f32.mrf.mxu1  ;;  %3515 = vmatpush1.bf16.msra.mxu0 %v6583_v63  ;;  %3868 = vmatprep.subr.bf16.mxu1 %v6588_v15  ;;  %v6604_v63 = vld [vmem:[%s9858_s5 + $0x1f8] ss:$8 sps:$4 sm:$0xff]  }
 0x459   :  { %5975 = vmatprep.mubr.msk.bf16.mxu1 %vm2953_vm8, %v8673_v52  ;;  %v2767_v61 = vshll.u32 %v8673_v52, 16  ;;  %3516 = vmatprep.subr.bf16.mxu0 %v6591_v33  ;;  %v2761_v41 = vrot.slane %v2759_v29, 1  ;;  %v4021_v32 = vrot.slane %v8673_v52, 2  ;;  %v8725_v62 = vsel %vm699_vm1, %v4014_v7, %v4019_v19  ;;  %v6051_v7 = vld [vmem:[%s9858_s5 + $0x298] sm:$0xff] }
 0x45a   :  { %v2637_v35 = vpop.f32.mrf.mxu1  ;;  %3263 = vmatmul.mubr.bf16.gmra.mxu1 %v8662_v39  ;;  %v2779_v25 = vshrl.u32 %v8673_v52, 16  ;;  %v6073_v15 = vcombine.high %v6051_v7, %v6051_v7  ;;  %v6072_v48 = vcombine.low %v6051_v7, %v6051_v7 }
 0x45b   :  { %v2769_v16 = vrot.slane %v2767_v61, 1  ;;  %3869 = vmatpush1.bf16.msra.mxu1 %v6586_v9  ;;  %v8714_v21 = vsel %vm699_vm1, %v4017_v55, %v4021_v32  ;;  %v2762_v46 = vsel %vm504_vm4, %v2757_v1, %v2761_v41  ;;  %v2773_v33 = vor.u32 %v2771_v56, %v2761_v41 }
 0x45c   :  { %v2639_v37 = vpop.f32.mrf.mxu1  ;;  %3517 = vmatpush1.bf16.msra.mxu0 %v6589_v53  ;;  %3870 = vmatprep.subr.bf16.mxu1 %v6594_v17  ;;  %v6613_v17 = vld [vmem:[%s9858_s5 + $0x174] ss:$8 sps:$4 sm:$0xff]  }
 0x45d   :  { %v8716_v47 = vpack.c.bf16 %v2639_v37, %v2635_v43  ;;  %v2770_v36 = vsel %vm504_vm4, %v2765_v49, %v2769_v16  ;;  %3518 = vmatprep.subr.bf16.mxu0 %v6597_v2  ;;  %v2781_v4 = vor.u32 %v2779_v25, %v2769_v16  ;;  %v6617_v37 = vld [vmem:[%s9858_s5 + $0x28c] ss:$8 sps:$4 sm:$0xff]  }
 0x45e   :  { %v2641_v20 = vpop.f32.mrf.mxu1  ;;  %5944 = vmatprep.mubr.msk.bf16.mxu0 %vm2953_vm8, %v2770_v36 }
 0x45f   :  { %v8729_v45 = vpack.c.bf16 %v2641_v20, %v2637_v35  ;;  %3025 = vmatmul.mubr.bf16.gmra.mxu0 %v2762_v46  ;;  %v2775_v6 = vshll.u32 %v8716_v47, 16  ;;  %3871 = vmatpush1.bf16.msra.mxu1 %v6592_v34  ;;  %v4023_v55 = vrot.slane %v8716_v47, 2  ;;  %v3855_v34 = vsel %vm2975_vm7, %v6072_v48, 0 }
 0x460   :  { %v2645_v13 = vpop.f32.mrf.mxu1  ;;  %3519 = vmatpush1.bf16.msra.mxu0 %v6595_v38  ;;  %3872 = vmatprep.subr.bf16.mxu1 %v6600_v50  ;;  %v6620_v50 = vld [vmem:[%s9858_s5 + $0x164] ss:$8 sps:$4 sm:$0xff]   ;;  %v2787_v20 = vshrl.u32 %v8716_v47, 16 }
 0x461   :  { %5976 = vmatprep.mubr.msk.bf16.mxu1 %vm2953_vm8, %v8729_v45  ;;  %v2783_v42 = vshll.u32 %v8729_v45, 16  ;;  %3520 = vmatprep.subr.bf16.mxu0 %v6603_v60  ;;  %v2777_v0 = vrot.slane %v2775_v6, 1  ;;  %v4025_v26 = vrot.slane %v8729_v45, 2  ;;  %v8783_v2 = vsel %vm699_vm1, %v4019_v19, %v4023_v55  ;;  %v6611_v19 = vld [vmem:[%s9858_s5 + $0x170] ss:$8 sps:$4 sm:$0xff]  }
 0x462   :  { %v2647_v54 = vpop.f32.mrf.mxu1  ;;  %3273 = vmatmul.mubr.bf16.gmra.mxu1 %v8716_v47  ;;  %v2795_v1 = vshrl.u32 %v8729_v45, 16 }
 0x463   :  { %v2785_v58 = vrot.slane %v2783_v42, 1  ;;  %3873 = vmatpush1.bf16.msra.mxu1 %v6598_v57  ;;  %v8770_v9 = vsel %vm699_vm1, %v4021_v32, %v4025_v26  ;;  %v2778_v41 = vsel %vm504_vm4, %v2773_v33, %v2777_v0 }
 0x464   :  { %v2649_v14 = vpop.f32.mrf.mxu1  ;;  %3521 = vmatpush1.bf16.msra.mxu0 %v6601_v22  ;;  %3874 = vmatprep.subr.bf16.mxu1 %v6606_v44  ;;  %v6615_v44 = vld [vmem:[%s9858_s5 + $0x288] ss:$8 sps:$4 sm:$0xff]  }
 0x465   :  { %v8772_v43 = vpack.c.bf16 %v2649_v14, %v2645_v13  ;;  %v2786_v53 = vsel %vm504_vm4, %v2781_v4, %v2785_v58  ;;  %3522 = vmatprep.subr.bf16.mxu0 %v6609_v51  ;;  %v2797_v13 = vor.u32 %v2795_v1, %v2785_v58  ;;  %v2789_v51 = vor.u32 %v2787_v20, %v2777_v0  ;;  %v6623_v4 = vld [vmem:[%s9858_s5 + $0x27c] ss:$8 sps:$4 sm:$0xff]   ;;  %v6000_v14 = vld [vmem:[%s9858_s5 + $0x1f0] sm:$0xff] }
 0x466   :  { %v2651_v35 = vpop.f32.mrf.mxu1  ;;  %5945 = vmatprep.mubr.msk.bf16.mxu0 %vm2953_vm8, %v2786_v53  ;;  %v6626_v0 = vld [vmem:[%s9858_s5 + $0x154] ss:$8 sps:$4 sm:$0xff]  }
 0x467   :  { %v8787_v32 = vpack.c.bf16 %v2651_v35, %v2647_v54  ;;  %3035 = vmatmul.mubr.bf16.gmra.mxu0 %v2778_v41  ;;  %v2791_v49 = vshll.u32 %v8772_v43, 16  ;;  %3875 = vmatpush1.bf16.msra.mxu1 %v6604_v63  ;;  %v4027_v36 = vrot.slane %v8772_v43, 2  ;;  %v6618_v54 = vld [vmem:[%s9858_s5 + $0x160] ss:$8 sps:$4 sm:$0xff]   ;;  %v3678_v41 = vrot.slane %v2751_v12, 2 }
 0x468   :  { %v2655_v16 = vpop.f32.mrf.mxu1  ;;  %3523 = vmatpush1.bf16.msra.mxu0 %v6607_v24  ;;  %6074 = vmatprep.subr.msk.bf16.mxu1 %vm2975_vm7, %v6073_v15 }
 0x469   :  { %5977 = vmatprep.mubr.msk.bf16.mxu1 %vm2953_vm8, %v8787_v32  ;;  %v2799_v38 = vshll.u32 %v8787_v32, 16  ;;  %3524 = vmatprep.subr.bf16.mxu0 %v6613_v17  ;;  %v2793_v46 = vrot.slane %v2791_v49, 1  ;;  %v4029_v57 = vrot.slane %v8787_v32, 2  ;;  %v6621_v17 = vld [vmem:[%s9858_s5 + $0x278] ss:$8 sps:$4 sm:$0xff]  }
 0x46a   :  { %v2657_v60 = vpop.f32.mrf.mxu1  ;;  %3283 = vmatmul.mubr.bf16.gmra.mxu1 %v8772_v43 }
 0x46b   :  { %v2801_v22 = vrot.slane %v2799_v38, 1  ;;  %3887 = vmatpush2.bf16.msra.mxu1 %v3855_v34  ;;  %v8827_v58 = vsel %vm699_vm1, %v4025_v26, %v4029_v57  ;;  %v8843_v26 = vsel %vm699_vm1, %v4023_v55, %v4027_v36  ;;  %v2794_v24 = vsel %vm504_vm4, %v2789_v51, %v2793_v46 }
 0x46c   :  { %v2659_v7 = vpop.f32.mrf.mxu1  ;;  %3525 = vmatpush1.bf16.msra.mxu0 %v6611_v19  ;;  %3888 = vmatprep.subr.bf16.mxu1 %v6617_v37  ;;  %v3677_v55 = vrot.slane %v2763_v18, 1  ;;  %v6022_v19 = vcombine.high %v6000_v14, %v6000_v14  ;;  %v6021_v34 = vcombine.low %v6000_v14, %v6000_v14  ;;  %v2811_v37 = vshrl.u32 %v8787_v32, 16 }
 0x46d   :  { %v8829_v63 = vpack.c.bf16 %v2659_v7, %v2655_v16  ;;  %v2802_v15 = vsel %vm504_vm4, %v2797_v13, %v2801_v22  ;;  %3526 = vmatprep.subr.bf16.mxu0 %v6620_v50  ;;  %v6624_v16 = vld [vmem:[%s9858_s5 + $0x150] ss:$8 sps:$4 sm:$0xff]   ;;  %v3674_v18 = vrot.slane %v2744_v30, 1  ;;  %v2803_v13 = vshrl.u32 %v8772_v43, 16 }
 0x46e   :  { %v2661_v33 = vpop.f32.mrf.mxu1  ;;  %5946 = vmatprep.mubr.msk.bf16.mxu0 %vm2953_vm8, %v2802_v15  ;;  %v3675_v7 = vrot.slane %v2746_v10, 2 }
 0x46f   :  { %v8847_v48 = vpack.c.bf16 %v2661_v33, %v2657_v60  ;;  %3045 = vmatmul.mubr.bf16.gmra.mxu0 %v2794_v24  ;;  %v2807_v53 = vshll.u32 %v8829_v63, 16  ;;  %3889 = vmatpush2.bf16.msra.mxu1 %v6615_v44  ;;  %v4031_v12 = vrot.slane %v8829_v63, 2  ;;  %v2805_v15 = vor.u32 %v2803_v13, %v2793_v46  ;;  %v6631_v24 = vld [vmem:[%s9858_s5 + $0x1e4] ss:$8 sps:$4 sm:$0xff]  }
 0x470   :  { %v2665_v35 = vpop.f32.mrf.mxu1  ;;  %3527 = vmatpush1.bf16.msra.mxu0 %v6618_v54  ;;  %3890 = vmatprep.subr.bf16.mxu1 %v6623_v4  ;;  %v2813_v54 = vor.u32 %v2811_v37, %v2801_v22  ;;  %v3509_v22 = vsel %vm2975_vm7, %v6021_v34, 0  ;;  %v3671_v34 = vrot.slane %v2739_v11, 2  ;;  %v6634_v11 = vld [vmem:[%s9858_s5 + $0x1d4] ss:$8 sps:$4 sm:$0xff]  }
 0x471   :  { %5978 = vmatprep.mubr.msk.bf16.mxu1 %vm2953_vm8, %v8847_v48  ;;  %v2815_v50 = vshll.u32 %v8847_v48, 16  ;;  %3528 = vmatprep.subr.bf16.mxu0 %v6626_v0  ;;  %v2809_v44 = vrot.slane %v2807_v53, 1  ;;  %v4033_v51 = vrot.slane %v8847_v48, 2  ;;  %v3679_v0 = vor.u32 %v3678_v41, %v3677_v55 }
 0x472   :  { %v2667_v60 = vpop.f32.mrf.mxu1  ;;  %3293 = vmatmul.mubr.bf16.gmra.mxu1 %v8829_v63  ;;  %v8894_v46 = vsel %vm699_vm1, %v4027_v36, %v4031_v12  ;;  %v3667_v36 = vrot.slane %v2732_v23, 1 }
 0x473   :  { %v2817_v30 = vrot.slane %v2815_v50, 1  ;;  %3891 = vmatpush2.bf16.msra.mxu1 %v6621_v17  ;;  %v8881_v14 = vsel %vm699_vm1, %v4029_v57, %v4033_v51  ;;  %v2810_v57 = vsel %vm504_vm4, %v2805_v15, %v2809_v44  ;;  %v3686_v15 = vrot.slane %v2767_v61, 2  ;;  %v6632_v61 = vld [vmem:[%s9858_s5 + $0x1d0] ss:$8 sps:$4 sm:$0xff]  }
 0x474   :  { %v2669_v4 = vpop.f32.mrf.mxu1  ;;  %3529 = vmatpush1.bf16.msra.mxu0 %v6624_v16  ;;  %v3670_v16 = vrot.slane %v2755_v31, 1 }
 0x475   :  { %v8883_v33 = vpack.c.bf16 %v2669_v4, %v2665_v35  ;;  %v2818_v10 = vsel %vm504_vm4, %v2813_v54, %v2817_v30  ;;  %6023 = vmatprep.subr.msk.bf16.mxu0 %vm2975_vm7, %v6022_v19  ;;  %v3676_v35 = vor.u32 %v3675_v7, %v3674_v18  ;;  %v6629_v18 = vld [vmem:[%s9858_s5 + $0x1e0] ss:$8 sps:$4 sm:$0xff]   ;;  %v3685_v7 = vrot.slane %v2779_v25, 1 }
 0x476   :  { %v2671_v17 = vpop.f32.mrf.mxu1  ;;  %5947 = vmatprep.mubr.msk.bf16.mxu0 %vm2953_vm8, %v2818_v10  ;;  %v2819_v54 = vshrl.u32 %v8829_v63, 16 }
 0x477   :  { %v8898_v55 = vpack.c.bf16 %v2671_v17, %v2667_v60  ;;  %3055 = vmatmul.mubr.bf16.gmra.mxu0 %v2810_v57  ;;  %v9877_v41 = vshll.u32 %v8883_v33, 16  ;;  %v3680_v19 = vsel %vm1535_vm5, %v3676_v35, %v3679_v0  ;;  %v2827_v60 = vshrl.u32 %v8847_v48, 16 }
 0x478   :  { %3541 = vmatpush2.bf16.msra.mxu0 %v3509_v22  ;;  %v4035_v23 = vrot.slane %v8883_v33, 2  ;;  %v3668_v17 = vrot.slane %v2734_v28, 2  ;;  %v2821_v57 = vor.u32 %v2819_v54, %v2809_v44  ;;  %v6637_v28 = vld [vmem:[%s9858_s5 + $0x314] ss:$8 sps:$4 sm:$0xff]  }
 0x479   :  { %5979 = vmatprep.mubr.msk.bf16.mxu1 %vm2953_vm8, %v8898_v55  ;;  %v2831_v31 = vshll.u32 %v8898_v55, 16  ;;  %3542 = vmatprep.subr.bf16.mxu0 %v6631_v24  ;;  %v2825_v4 = vrot.slane %v9877_v41, 1  ;;  %v4037_v10 = vrot.slane %v8898_v55, 2  ;;  %v2829_v25 = vor.u32 %v2827_v60, %v2817_v30 }
 0x47a   :  { %3303 = vmatmul.mubr.bf16.gmra.mxu1 %v8883_v33  ;;  %v2838_v24 = vshrl.u32 %v8898_v55, 16  ;;  %v3672_v41 = vor.u32 %v3671_v34, %v3670_v16  ;;  %v8955_v44 = vsel %vm699_vm1, %v4031_v12, %v4035_v23  ;;  %v3681_v34 = vrot.slane %v2771_v56, 1 }
 0x47b   :  { %6075 = vmatprep.mubr.msk.bf16.mxu1 %vm2953_vm8, %v3680_v19  ;;  %v2833_v22 = vrot.slane %v2831_v31, 1  ;;  %v8944_v30 = vsel %vm699_vm1, %v4033_v51, %v4037_v10  ;;  %v2826_v51 = vsel %vm504_vm4, %v2821_v57, %v2825_v4 }
 0x47c   :  { %3543 = vmatpush2.bf16.msra.mxu0 %v6629_v18  ;;  %v3687_v18 = vor.u32 %v3686_v15, %v3685_v7  ;;  %v3693_v7 = vrot.slane %v2795_v1, 1  ;;  %v2835_v15 = vshrl.u32 %v8883_v33, 16  ;;  %v3689_v1 = vrot.slane %v2787_v20, 1 }
 0x47d   :  { %v2834_v35 = vsel %vm504_vm4, %v2829_v25, %v2833_v22  ;;  %v2840_v19 = vor.u32 %v2838_v24, %v2833_v22  ;;  %3544 = vmatprep.subr.bf16.mxu0 %v6634_v11  ;;  %v3669_v25 = vor.u32 %v3668_v17, %v3667_v36  ;;  %v3682_v11 = vrot.slane %v2759_v29, 2 }
 0x47e   :  { %5948 = vmatprep.mubr.msk.bf16.mxu0 %vm2953_vm8, %v2834_v35  ;;  %v3688_v12 = vsel %vm1535_vm5, %v3679_v0, %v3687_v18  ;;  %v3694_v36 = vrot.slane %v2783_v42, 2  ;;  %v3353_v22 = vrot.slane %v8620_v27, 1  ;;  %v2837_v56 = vor.u32 %v2835_v15, %v2825_v4 }
 0x47f   :  { %3065 = vmatmul.mubr.bf16.gmra.mxu0 %v2826_v51  ;;  %v3673_v16 = vsel %vm1535_vm5, %v3669_v25, %v3672_v41  ;;  %v3352_v29 = vrot.slane %v8596_v8, 1  ;;  %v3683_v17 = vor.u32 %v3682_v11, %v3681_v34  ;;  %v3690_v27 = vrot.slane %v2775_v6, 2  ;;  %v6635_v6 = vld [vmem:[%s9858_s5 + $0x310] ss:$8 sps:$4 sm:$0xff]   ;;  %v6643_v25 = vld [vmem:[%s9858_s5 + $0x2f4] ss:$8 sps:$4 sm:$0xff]  }
 0x480   :  { %5949 = vmatprep.mubr.msk.bf16.mxu0 %vm2953_vm8, %v2840_v19  ;;  %3545 = vmatpush2.bf16.msra.mxu0 %v6632_v61  ;;  %v3695_v57 = vor.u32 %v3694_v36, %v3693_v7  ;;  %v3350_v8 = vrot.slane %v8617_v3, 1  ;;  %v3701_v61 = vrot.slane %v2811_v37, 1  ;;  %v3702_v35 = vrot.slane %v2799_v38, 2  ;;  %v6640_v3 = vld [vmem:[%s9858_s5 + $0x304] ss:$8 sps:$4 sm:$0xff]  }
 0x481   :  { %4178 = vmatprep.subr.bf16.mxu0 %v6637_v28  ;;  %v3354_v0 = vsel %vm1169_vm3, %v3352_v29, %v3353_v22  ;;  %v3684_v42 = vsel %vm1535_vm5, %v3672_v41, %v3683_v17  ;;  %v3357_v41 = vrot.slane %v8673_v52, 1  ;;  %v3349_v20 = vrot.slane %v8601_v59, 1  ;;  %v6638_v59 = vld [vmem:[%s9858_s5 + $0x300] ss:$8 sps:$4 sm:$0xff]  }
 0x482   :  { %3893 = vmatmul.mubr.bf16.vlgmr.msra.gmra.mxu1 %v3673_v16  ;;  %v3696_v4 = vsel %vm1535_vm5, %v3687_v18, %v3695_v57  ;;  %v3691_v19 = vor.u32 %v3690_v27, %v3689_v1  ;;  %v3703_v28 = vor.u32 %v3702_v35, %v3701_v61  ;;  %v3697_v51 = vrot.slane %v2803_v13, 1  ;;  %v6641_v13 = vld [vmem:[%s9858_s5 + $0x2f0] ss:$8 sps:$4 sm:$0xff]  }
 0x483   :  { %6076 = vmatprep.mubr.msk.bf16.mxu1 %vm2953_vm8, %v3688_v12  ;;  %v3351_v37 = vsel %vm1169_vm3, %v3349_v20, %v3350_v8  ;;  %v3358_v38 = vsel %vm1169_vm3, %v3353_v22, %v3357_v41  ;;  %v3698_v18 = vrot.slane %v2791_v49, 2  ;;  %v3355_v34 = vrot.slane %v8662_v39, 1  ;;  %v6646_v39 = vld [vmem:[%s9858_s5 + $0x2e4] ss:$8 sps:$4 sm:$0xff]   ;;  %v6655_v20 = vld [vmem:[%s9858_s5 + $0x2b4] ss:$8 sps:$4 sm:$0xff]  }
 0x484   :  { %v3692_v52 = vsel %vm1535_vm5, %v3683_v17, %v3691_v19  ;;  %v3704_v16 = vsel %vm1535_vm5, %v3695_v57, %v3703_v28  ;;  %v3709_v11 = vrot.slane %v2827_v60, 1  ;;  %v3710_v12 = vrot.slane %v2815_v50, 2  ;;  %v6649_v17 = vld [vmem:[%s9858_s5 + $0x2d4] ss:$8 sps:$4 sm:$0xff]  }
 0x485   :  { %v3361_v49 = vrot.slane %v8729_v45, 1  ;;  %v3699_v7 = vor.u32 %v3698_v18, %v3697_v51  ;;  %v3356_v60 = vsel %vm1169_vm3, %v3350_v8, %v3355_v34  ;;  %v6644_v45 = vld [vmem:[%s9858_s5 + $0x2e0] ss:$8 sps:$4 sm:$0xff]   ;;  %v3706_v29 = vrot.slane %v2807_v53, 2 }
 0x486   :  { %v3711_v36 = vor.u32 %v3710_v12, %v3709_v11  ;;  %v3718_v1 = vrot.slane %v2831_v31, 2  ;;  %v3365_v53 = vrot.slane %v8787_v32, 1  ;;  %v6650_v32 = vld [vmem:[%s9858_s5 + $0x2c0] ss:$8 sps:$4 sm:$0xff]   ;;  %v3713_v61 = vrot.slane %v2835_v15, 1 }
 0x487   :  { %3075 = vmatmul.mubr.bf16.gmra.mxu0 %v2837_v56  ;;  %v3362_v50 = vsel %vm1169_vm3, %v3357_v41, %v3361_v49  ;;  %v3700_v22 = vsel %vm1535_vm5, %v3691_v19, %v3699_v7  ;;  %v3705_v56 = vrot.slane %v2819_v54, 1  ;;  %v6647_v54 = vld [vmem:[%s9858_s5 + $0x2d0] ss:$8 sps:$4 sm:$0xff]   ;;  %v10221_v35 = vshll.u32 %v8883_v33, 16  ;;  %v6663_v11 = vld [vmem:[%s9858_s5 + $0x334] ss:$8 sps:$4 sm:$0xff]  }
 0x488   :  { %6024 = vmatprep.mubr.msk.bf16.mxu0 %vm2953_vm8, %v3354_v0  ;;  %v3712_v57 = vsel %vm1535_vm5, %v3703_v28, %v3711_v36  ;;  %v3359_v0 = vrot.slane %v8716_v47, 1  ;;  %v6652_v47 = vld [vmem:[%s9858_s5 + $0x2c4] ss:$8 sps:$4 sm:$0xff]   ;;  %v3366_v31 = vsel %vm1169_vm3, %v3361_v49, %v3365_v53  ;;  %v3363_v19 = vrot.slane %v8772_v43, 1  ;;  %v6653_v15 = vld [vmem:[%s9858_s5 + $0x2b0] ss:$8 sps:$4 sm:$0xff]  }
 0x489   :  { %v3707_v27 = vor.u32 %v3706_v29, %v3705_v56  ;;  %v3714_v41 = vrot.slane %v10221_v35, 2  ;;  %v6658_v28 = vld [vmem:[%s9858_s5 + $0x2a4] ss:$8 sps:$4 sm:$0xff]  }
 0x48a   :  { %3903 = vmatmul.mubr.bf16.gmra.mxu1 %v3684_v42  ;;  %v3717_v42 = vrot.slane %v2838_v24, 1  ;;  %v3360_v24 = vsel %vm1169_vm3, %v3355_v34, %v3359_v0  ;;  %v6102_v43 = vld [vmem:[%s9858_s5 + $0x340] sm:$0xff] }
 0x48b   :  { %6077 = vmatprep.mubr.msk.bf16.mxu1 %vm2953_vm8, %v3696_v4  ;;  %v3708_v8 = vsel %vm1535_vm5, %v3699_v7, %v3707_v27  ;;  %v6124_v51 = vcombine.high %v6102_v43, %v6102_v43  ;;  %v6123_v18 = vcombine.low %v6102_v43, %v6102_v43  ;;  %v3371_v7 = vrot.slane %v8883_v33, 1 }
 0x48c   :  { %v3719_v4 = vor.u32 %v3718_v1, %v3717_v42 }
 0x48d   :  { %v4173_v34 = vsel %vm2975_vm7, %v6123_v18, 0 }
 0x48f   :  { %3547 = vmatmul.mubr.bf16.vlgmr.msra.gmra.mxu0 %v3351_v37  ;;  %v3715_v37 = vor.u32 %v3714_v41, %v3713_v61 }
 0x490   :  { %6025 = vmatprep.mubr.msk.bf16.mxu0 %vm2953_vm8, %v3358_v38  ;;  %4179 = vmatpush1.bf16.msra.mxu0 %v6635_v6  ;;  %v3720_v6 = vsel %vm1535_vm5, %v3711_v36, %v3719_v4  ;;  %v3364_v38 = vsel %vm1169_vm3, %v3359_v0, %v3363_v19 }
 0x491   :  { %4180 = vmatprep.subr.bf16.mxu0 %v6640_v3  ;;  %v3369_v3 = vrot.slane %v8847_v48, 1 }
 0x492   :  { %3913 = vmatmul.mubr.bf16.gmra.mxu1 %v3692_v52  ;;  %v3716_v52 = vsel %vm1535_vm5, %v3707_v27, %v3715_v37 }
 0x493   :  { %6078 = vmatprep.mubr.msk.bf16.mxu1 %vm2953_vm8, %v3704_v16  ;;  %v3370_v48 = vsel %vm1169_vm3, %v3365_v53, %v3369_v3  ;;  %v3373_v16 = vrot.slane %v8898_v55, 1 }
 0x494   :  { %4181 = vmatpush1.bf16.msra.mxu0 %v6638_v59  ;;  %v6656_v59 = vld [vmem:[%s9858_s5 + $0x2a0] ss:$8 sps:$4 sm:$0xff]  }
 0x495   :  { %4182 = vmatprep.subr.bf16.mxu0 %v6643_v25  ;;  %v3367_v25 = vrot.slane %v8829_v63, 1  ;;  %v3374_v49 = vsel %vm1169_vm3, %v3369_v3, %v3373_v16  ;;  %v6661_v63 = vld [vmem:[%s9858_s5 + $0x330] ss:$8 sps:$4 sm:$0xff]  }
 0x497   :  { %3557 = vmatmul.mubr.bf16.gmra.mxu0 %v3356_v60  ;;  %v3368_v12 = vsel %vm1169_vm3, %v3363_v19, %v3367_v25  ;;  %v6664_v60 = vld [vmem:[%s9858_s5 + $0x320] ss:$8 sps:$4 sm:$0xff]   ;;  %v3372_v36 = vsel %vm1169_vm3, %v3367_v25, %v3371_v7 }
 0x498   :  { %6026 = vmatprep.mubr.msk.bf16.mxu0 %vm2953_vm8, %v3362_v50  ;;  %4183 = vmatpush1.bf16.msra.mxu0 %v6641_v13  ;;  %v6666_v13 = vld [vmem:[%s9858_s5 + $0x324] ss:$8 sps:$4 sm:$0xff]  }
 0x499   :  { %4184 = vmatprep.subr.bf16.mxu0 %v6646_v39  ;;  %v10222_v39 = vmov 0  }
 0x49a   :  { %3923 = vmatmul.mubr.bf16.gmra.mxu1 %v3700_v22 }
 0x49b   :  { %6079 = vmatprep.mubr.msk.bf16.mxu1 %vm2953_vm8, %v3712_v57 }
 0x49c   :  { %4185 = vmatpush1.bf16.msra.mxu0 %v6644_v45 }
 0x49d   :  { %4186 = vmatprep.subr.bf16.mxu0 %v6649_v17 }
 0x49f   :  { %3567 = vmatmul.mubr.bf16.gmra.mxu0 %v3360_v24 }
 0x4a0   :  { %6027 = vmatprep.mubr.msk.bf16.mxu0 %vm2953_vm8, %v3366_v31  ;;  %4187 = vmatpush1.bf16.msra.mxu0 %v6647_v54 }
 0x4a1   :  { %4188 = vmatprep.subr.bf16.mxu0 %v6652_v47 }
 0x4a2   :  { %3933 = vmatmul.mubr.bf16.gmra.mxu1 %v3708_v8 }
 0x4a3   :  { %6080 = vmatprep.mubr.msk.bf16.mxu1 %vm2953_vm8, %v3720_v6 }
 0x4a4   :  { %4189 = vmatpush1.bf16.msra.mxu0 %v6650_v32 }
 0x4a5   :  { %4190 = vmatprep.subr.bf16.mxu0 %v6655_v20 }
 0x4a7   :  { %3577 = vmatmul.mubr.bf16.gmra.mxu0 %v3364_v38 }
 0x4a8   :  { %6028 = vmatprep.mubr.msk.bf16.mxu0 %vm2953_vm8, %v3370_v48  ;;  %4191 = vmatpush1.bf16.msra.mxu0 %v6653_v15 }
 0x4a9   :  { %4192 = vmatprep.subr.bf16.mxu0 %v6658_v28 }
 0x4aa   :  { %3943 = vmatmul.mubr.bf16.gmra.mxu1 %v3716_v52 }
 0x4ab   :  { %6081 = vmatprep.mubr.msk.bf16.mxu1 %vm2953_vm8, %v3719_v4 }
 0x4ac   :  { %4193 = vmatpush1.bf16.msra.mxu0 %v6656_v59 }
 0x4ad   :  { %6125 = vmatprep.subr.msk.bf16.mxu0 %vm2975_vm7, %v6124_v51 }
 0x4af   :  { %3587 = vmatmul.mubr.bf16.gmra.mxu0 %v3368_v12 }
 0x4b0   :  { %6029 = vmatprep.mubr.msk.bf16.mxu0 %vm2953_vm8, %v3374_v49  ;;  %4205 = vmatpush2.bf16.msra.mxu0 %v4173_v34 }
 0x4b1   :  { %4206 = vmatprep.subr.bf16.mxu0 %v6663_v11 }
 0x4b2   :  { %3953 = vmatmul.mubr.bf16.gmra.mxu1 %v3715_v37 }
 0x4b3   :  { %4457 = vmatprep.mubr.bf16.mxu1 %v10222_v39 }
 0x4b4   :  { %4207 = vmatpush2.bf16.msra.mxu0 %v6661_v63 }
 0x4b5   :  { %4208 = vmatprep.subr.bf16.mxu0 %v6666_v13 }
 0x4b7   :  { %3597 = vmatmul.mubr.bf16.gmra.mxu0 %v3372_v36 }
 0x4b8   :  { %6030 = vmatprep.mubr.msk.bf16.mxu0 %vm2953_vm8, %v3373_v16  ;;  %4209 = vmatpush2.bf16.msra.mxu0 %v6664_v60 }
 0x4b9   :  { %4774 = vmatprep.subr.bf16.mxu0 %v10222_v39 }
 0x4bf   :  { %3607 = vmatmul.mubr.bf16.gmra.mxu0 %v3371_v7 }
 0x4c0   :  { %6126 = vmatprep.mubr.msk.bf16.mxu0 %vm2953_vm8, %v8660_v40 }
 0x4c7   :  { %4211 = vmatmul.mubr.bf16.vlgmr.msra.gmra.mxu0 %v8669_v5 }
 0x4c8   :  { %6127 = vmatprep.mubr.msk.bf16.mxu0 %vm2953_vm8, %v8714_v21 }
 0x4cf   :  { %4221 = vmatmul.mubr.bf16.gmra.mxu0 %v8725_v62 }
 0x4d0   :  { %6128 = vmatprep.mubr.msk.bf16.mxu0 %vm2953_vm8, %v8770_v9 }
 0x4d7   :  { %4231 = vmatmul.mubr.bf16.gmra.mxu0 %v8783_v2 }
 0x4d8   :  { %6129 = vmatprep.mubr.msk.bf16.mxu0 %vm2953_vm8, %v8827_v58 }
 0x4df   :  { %4241 = vmatmul.mubr.bf16.gmra.mxu0 %v8843_v26 }
 0x4e0   :  { %6130 = vmatprep.mubr.msk.bf16.mxu0 %vm2953_vm8, %v8881_v14 }
 0x4e7   :  { %4251 = vmatmul.mubr.bf16.gmra.mxu0 %v8894_v46 }
 0x4e8   :  { %6131 = vmatprep.mubr.msk.bf16.mxu0 %vm2953_vm8, %v8944_v30 }
 0x4ef   :  { %4261 = vmatmul.mubr.bf16.gmra.mxu0 %v8955_v44 }
 0x4f0   :  { %6132 = vmatprep.mubr.msk.bf16.mxu0 %vm2953_vm8, %v4037_v10 }
 0x4f7   :  { %4271 = vmatmul.mubr.bf16.gmra.mxu0 %v4035_v23 }
 0x50a   :  { %v3244_v40 = vpop.f32.mrf.mxu1 }
 0x50c   :  { %v3246_v5 = vpop.f32.mrf.mxu1 }
 0x50e   :  { %v3248_v21 = vpop.f32.mrf.mxu1 }
 0x510   :  { %v9136_v62 = vpop.f32.mrf.mxu1 }
 0x512   :  { %v3254_v9 = vpop.f32.mrf.mxu1 }
 0x514   :  { %v3256_v2 = vpop.f32.mrf.mxu1 }
 0x516   :  { %v3258_v58 = vpop.f32.mrf.mxu1 }
 0x517   :  { %v3016_v26 = vpop.f32.mrf.mxu0 }
 0x518   :  { %v9138_v14 = vadd.f32 %v3244_v40, %v3016_v26  ;;  %v9140_v46 = vpop.f32.mrf.mxu1 }
 0x519   :  { %v3018_v30 = vpop.f32.mrf.mxu0 }
 0x51a   :  { %v9142_v55 = vadd.f32 %v3246_v5, %v3018_v30  ;;  %v3264_v10 = vpop.f32.mrf.mxu1 }
 0x51b   :  { %v3020_v44 = vpop.f32.mrf.mxu0 }
 0x51c   :  { %v9144_v33 = vadd.f32 %v3248_v21, %v3020_v44  ;;  %v3266_v23 = vpop.f32.mrf.mxu1 }
 0x51d   :  { %v9146_v50 = vpop.f32.mrf.mxu0 }
 0x51e   :  { %v3268_v45 = vpop.f32.mrf.mxu1 }
 0x51f   :  { %v3026_v22 = vpop.f32.mrf.mxu0 }
 0x520   :  { %v9148_v56 = vadd.f32 %v3254_v9, %v3026_v22  ;;  %v9150_v29 = vpop.f32.mrf.mxu1 }
 0x521   :  { %v3028_v17 = vpop.f32.mrf.mxu0 }
 0x522   :  { %v9152_v57 = vadd.f32 %v3256_v2, %v3028_v17  ;;  %v3274_v0 = vpop.f32.mrf.mxu1 }
 0x523   :  { %v3030_v42 = vpop.f32.mrf.mxu0 }
 0x524   :  { %v9154_v1 = vadd.f32 %v3258_v58, %v3030_v42  ;;  %v3276_v53 = vpop.f32.mrf.mxu1 }
 0x525   :  { %v9156_v54 = vpop.f32.mrf.mxu0 }
 0x526   :  { %v3278_v27 = vpop.f32.mrf.mxu1 }
 0x527   :  { %v3036_v47 = vpop.f32.mrf.mxu0 }
 0x528   :  { %v9158_v24 = vadd.f32 %v3264_v10, %v3036_v47  ;;  %v9160_v4 = vpop.f32.mrf.mxu1 }
 0x529   :  { %v3038_v31 = vpop.f32.mrf.mxu0 }
 0x52a   :  { %v9162_v32 = vadd.f32 %v3266_v23, %v3038_v31  ;;  %v3284_v8 = vpop.f32.mrf.mxu1 }
 0x52b   :  { %v3040_v61 = vpop.f32.mrf.mxu0 }
 0x52c   :  { %v9164_v35 = vadd.f32 %v3268_v45, %v3040_v61  ;;  %v3286_v41 = vpop.f32.mrf.mxu1 }
 0x52d   :  { %v9166_v20 = vpop.f32.mrf.mxu0 }
 0x52e   :  { %v3288_v6 = vpop.f32.mrf.mxu1 }
 0x52f   :  { %v3046_v19 = vpop.f32.mrf.mxu0 }
 0x530   :  { %v9168_v3 = vadd.f32 %v3274_v0, %v3046_v19  ;;  %v9170_v15 = vpop.f32.mrf.mxu1 }
 0x531   :  { %v3048_v37 = vpop.f32.mrf.mxu0 }
 0x532   :  { %v9172_v28 = vadd.f32 %v3276_v53, %v3048_v37  ;;  %v3294_v38 = vpop.f32.mrf.mxu1 }
 0x533   :  { %v3050_v43 = vpop.f32.mrf.mxu0 }
 0x534   :  { %v9174_v48 = vadd.f32 %v3278_v27, %v3050_v43  ;;  %v3296_v59 = vpop.f32.mrf.mxu1 }
 0x535   :  { %v9176_v52 = vpop.f32.mrf.mxu0 }
 0x536   :  { %v3298_v51 = vpop.f32.mrf.mxu1 }
 0x537   :  { %v3056_v18 = vpop.f32.mrf.mxu0 }
 0x538   :  { %v9178_v25 = vadd.f32 %v3284_v8, %v3056_v18  ;;  %v9180_v16 = vpop.f32.mrf.mxu1  ;;  %v3251_v8 = vadd.f32 %v9136_v62, %v9146_v50  ;;  %v3261_v50 = vadd.f32 %v9140_v46, %v9156_v54  ;;  %v3271_v46 = vadd.f32 %v9150_v29, %v9166_v20 }
 0x539   :  { %v3058_v34 = vpop.f32.mrf.mxu0  ;;  %v3281_v29 = vadd.f32 %v9160_v4, %v9176_v52  ;;  %v6670_v4 = vld [vmem:[%s9860_s8 + $0x38] sm:$0xff]  }
 0x53a   :  { %v9182_v11 = vadd.f32 %v3286_v41, %v3058_v34  ;;  %v9184_v12 = vpop.f32.mrf.mxu1  ;;  %4775 = vmatpush1.bf16.msra.mxu0 %v6670_v4  ;;  %v10226_v4 = vld [vmem:[#allocation168_spill] sm:$0xff] }
 0x53b   :  { %v3060_v49 = vpop.f32.mrf.mxu0  ;;  %4776 = vmatprep.subr.bf16.mxu0 %v10222_v39 }
 0x53c   :  { %v9186_v63 = vadd.f32 %v3288_v6, %v3060_v49  ;;  %v9188_v13 = vpop.f32.mrf.mxu1 }
 0x53d   :  { %v9190_v7 = vpop.f32.mrf.mxu0 }
 0x53e   :  { %v9194_v40 = vpop.f32.mrf.mxu1 }
 0x53f   :  { %v3066_v60 = vpop.f32.mrf.mxu0 }
 0x540   :  { %v9192_v36 = vadd.f32 %v3294_v38, %v3066_v60  ;;  %v9200_v58 = vpop.f32.mrf.mxu1 }
 0x541   :  { %v3068_v5 = vpop.f32.mrf.mxu0  ;;  %10223 = vst [vmem:[#allocation7_spill] sm:$0xff] %v9200_v58 }
 0x542   :  { %v9196_v21 = vadd.f32 %v3296_v59, %v3068_v5  ;;  %v3894_v10 = vpop.f32.mrf.mxu1 }
 0x543   :  { %v3070_v9 = vpop.f32.mrf.mxu0 }
 0x544   :  { %v9198_v2 = vadd.f32 %v3298_v51, %v3070_v9  ;;  %v3896_v45 = vpop.f32.mrf.mxu1 }
 0x545   :  { %v9202_v26 = vpop.f32.mrf.mxu0 }
 0x546   :  { %v3898_v42 = vpop.f32.mrf.mxu1 }
 0x547   :  { %v9204_v30 = vpop.f32.mrf.mxu0 }
 0x548   :  { %v3900_v6 = vpop.f32.mrf.mxu1 }
 0x549   :  { %v9206_v44 = vpop.f32.mrf.mxu0 }
 0x54b   :  { %v9208_v23 = vpop.f32.mrf.mxu0 }
 0x54d   :  { %v9210_v22 = vpop.f32.mrf.mxu0 }
 0x54f   :  { %v3548_v17 = vpop.f32.mrf.mxu0 }
 0x550   :  { %v3617_v0 = vadd.f32 %v3548_v17, %v9138_v14 }
 0x551   :  { %v3550_v53 = vpop.f32.mrf.mxu0 }
 0x552   :  { %v3618_v27 = vadd.f32 %v3550_v53, %v9142_v55  ;;  %v9214_v47 = vadd.f32 %v3894_v10, %v3617_v0  ;;  %v3904_v55 = vpop.f32.mrf.mxu1 }
 0x553   :  { %v3552_v31 = vpop.f32.mrf.mxu0 }
 0x554   :  { %v3619_v61 = vadd.f32 %v3552_v31, %v9144_v33  ;;  %v9219_v41 = vadd.f32 %v3896_v45, %v3618_v27  ;;  %v9244_v10 = vpop.f32.mrf.mxu1 }
 0x555   :  { %v3554_v19 = vpop.f32.mrf.mxu0 }
 0x556   :  { %v3620_v37 = vadd.f32 %v3554_v19, %v3251_v8  ;;  %v9221_v38 = vadd.f32 %v3898_v42, %v3619_v61  ;;  %v9253_v0 = vpop.f32.mrf.mxu1 }
 0x557   :  { %v3558_v14 = vpop.f32.mrf.mxu0 }
 0x558   :  { %v3621_v43 = vadd.f32 %v3558_v14, %v9148_v56  ;;  %v9224_v59 = vadd.f32 %v3900_v6, %v3620_v37  ;;  %v9261_v27 = vpop.f32.mrf.mxu1 }
 0x559   :  { %v3560_v51 = vpop.f32.mrf.mxu0 }
 0x55a   :  { %v9227_v18 = vadd.f32 %v3560_v51, %v9152_v57  ;;  %v9229_v62 = vadd.f32 %v3904_v55, %v3621_v43  ;;  %v9270_v61 = vpop.f32.mrf.mxu1 }
 0x55b   :  { %v3562_v33 = vpop.f32.mrf.mxu0 }
 0x55c   :  { %v9234_v34 = vadd.f32 %v3562_v33, %v9154_v1  ;;  %v9278_v37 = vpop.f32.mrf.mxu1 }
 0x55d   :  { %v3564_v49 = vpop.f32.mrf.mxu0 }
 0x55e   :  { %v9236_v60 = vadd.f32 %v3564_v49, %v3261_v50  ;;  %v9294_v55 = vpop.f32.mrf.mxu1 }
 0x55f   :  { %v3568_v56 = vpop.f32.mrf.mxu0 }
 0x560   :  { %v9239_v5 = vadd.f32 %v3568_v56, %v9158_v24  ;;  %v9306_v50 = vpop.f32.mrf.mxu1 }
 0x561   :  { %v3570_v9 = vpop.f32.mrf.mxu0 }
 0x562   :  { %v9242_v57 = vadd.f32 %v3570_v9, %v9162_v32 }
 0x563   :  { %v3572_v45 = vpop.f32.mrf.mxu0 }
 0x564   :  { %v9249_v1 = vadd.f32 %v3572_v45, %v9164_v35  ;;  %v9317_v45 = vpop.f32.mrf.mxu1 }
 0x565   :  { %v3574_v54 = vpop.f32.mrf.mxu0 }
 0x566   :  { %v9251_v17 = vadd.f32 %v3574_v54, %v3271_v46  ;;  %v6675_v46 = vld [vmem:[%s9860_s8 + $0x18] sm:$0xff]  }
 0x567   :  { %v3578_v24 = vpop.f32.mrf.mxu0 }
 0x568   :  { %v9256_v42 = vadd.f32 %v3578_v24, %v9168_v3 }
 0x569   :  { %v3580_v32 = vpop.f32.mrf.mxu0 }
 0x56a   :  { %v9259_v53 = vadd.f32 %v3580_v32, %v9172_v28  ;;  %v4309_v32 = vld [vmem:[%s9861_s6] sm:$0x3] }
 0x56b   :  { %v3582_v31 = vpop.f32.mrf.mxu0 }
 0x56c   :  { %v9266_v35 = vadd.f32 %v3582_v31, %v9174_v48  ;;  %v3291_v48 = vadd.f32 %v9170_v15, %v9190_v7  ;;  %v6677_v31 = vld [vmem:[%s9860_s8 + $0x10] sm:$0xff]  }
 0x56d   :  { %v3584_v20 = vpop.f32.mrf.mxu0 }
 0x56e   :  { %v9268_v8 = vadd.f32 %v3584_v20, %v3281_v29 }
 0x56f   :  { %v3588_v3 = vpop.f32.mrf.mxu0 }
 0x570   :  { %v9273_v6 = vadd.f32 %v3588_v3, %v9178_v25  ;;  %v6671_v25 = vld [vmem:[%s9860_s8 + $0x30] sm:$0xff]  }
 0x571   :  { %v3590_v28 = vpop.f32.mrf.mxu0  ;;  %4777 = vmatpush1.bf16.msra.mxu0 %v6671_v25 }
 0x572   :  { %v9276_v19 = vadd.f32 %v3590_v28, %v9182_v11  ;;  %4778 = vmatprep.subr.bf16.mxu0 %v10222_v39  ;;  %v6679_v28 = vld [vmem:[%s9860_s8 + $0x8] sm:$0xff]  }
 0x573   :  { %v3592_v14 = vpop.f32.mrf.mxu0 }
 0x574   :  { %v9286_v52 = vadd.f32 %v3592_v14, %v9186_v63  ;;  %v6672_v63 = vld [vmem:[%s9860_s8 + $0x28] sm:$0xff]  }
 0x575   :  { %v3594_v43 = vpop.f32.mrf.mxu0  ;;  %4779 = vmatpush1.bf16.msra.mxu0 %v6672_v63 }
 0x576   :  { %v9291_v11 = vadd.f32 %v3594_v43, %v3291_v48  ;;  %4780 = vmatprep.subr.bf16.mxu0 %v10222_v39  ;;  %v10227_v48 = vsub.s32 0, %v10226_v4 }
 0x577   :  { %v3598_v51 = vpop.f32.mrf.mxu0 }
 0x578   :  { %v9297_v33 = vadd.f32 %v3598_v51, %v9192_v36  ;;  %v6673_v36 = vld [vmem:[%s9860_s8 + $0x20] sm:$0xff]   ;;  %v9348_v43 = vrot.slane %v4309_v32, %v10227_v48 }
 0x579   :  { %v3600_v15 = vpop.f32.mrf.mxu0  ;;  %4781 = vmatpush1.bf16.msra.mxu0 %v6673_v36 }
 0x57a   :  { %v9303_v7 = vadd.f32 %v3600_v15, %v9196_v21  ;;  %4782 = vmatprep.subr.bf16.mxu0 %v10222_v39  ;;  %v10228_v15 = vsub.s32 1, %v10226_v4 }
 0x57b   :  { %v3602_v49 = vpop.f32.mrf.mxu0 }
 0x57c   :  { %v9309_v56 = vadd.f32 %v3602_v49, %v9198_v2  ;;  %v9327_v2 = vpop.f32.mrf.mxu1  ;;  %v9353_v63 = vrot.slane %v4309_v32, %v10228_v15 }
 0x57d   :  { %v9311_v9 = vpop.f32.mrf.mxu0  ;;  %4783 = vmatpush1.bf16.msra.mxu0 %v6675_v46 }
 0x57e   :  { %4784 = vmatprep.subr.bf16.mxu0 %v10222_v39  ;;  %v9340_v20 = vpop.f32.mrf.mxu1 }
 0x57f   :  { %v9319_v21 = vpop.f32.mrf.mxu0 }
 0x580   :  { %v9356_v49 = vpop.f32.mrf.mxu1 }
 0x581   :  { %v9324_v54 = vpop.f32.mrf.mxu0  ;;  %4785 = vmatpush1.bf16.msra.mxu0 %v6677_v31 }
 0x582   :  { %4786 = vmatprep.subr.bf16.mxu0 %v10222_v39  ;;  %v9367_v48 = vpop.f32.mrf.mxu1 }
 0x583   :  { %v9329_v24 = vpop.f32.mrf.mxu0 }
 0x584   :  { %10224 = vst [vmem:[#allocation100_spill] sm:$0xff] %v9329_v24  ;;  %v3936_v58 = vpop.f32.mrf.mxu1 }
 0x585   :  { %v9337_v29 = vpop.f32.mrf.mxu0  ;;  %4787 = vmatpush1.bf16.msra.mxu0 %v6679_v28 }
 0x586   :  { %10225 = vst [vmem:[#allocation2_spill] sm:$0xff] %v9337_v29  ;;  %4788 = vmatprep.subr.bf16.mxu0 %v10222_v39 }
 0x587   :  { %v4212_v3 = vpop.f32.mrf.mxu0 }
 0x588   :  { %v4281_v14 = vadd.f32 %v4212_v3, %v9214_v47  ;;  %v6681_v3 = vld [vmem:[%s9860_s8] sm:$0xff]  }
 0x589   :  { %v4214_v25 = vpop.f32.mrf.mxu0  ;;  %4789 = vmatpush1.bf16.msra.mxu0 %v6681_v3 }
 0x58a   :  { %v4282_v51 = vadd.f32 %v4214_v25, %v9219_v41  ;;  %v4321_v46 = vadd.f32 %v9348_v43, %v4281_v14  ;;  %4802 = vmatprep.subr.bf16.mxu0 %v10222_v39 }
 0x58b   :  { %v4216_v36 = vpop.f32.mrf.mxu0 }
 0x58c   :  { %v4283_v47 = vadd.f32 %v4216_v36, %v9221_v38  ;;  %v4322_v41 = vadd.f32 %v9353_v63, %v4282_v51  ;;  %v3968_v38 = vadd.f32 %v9244_v10, %v9227_v18  ;;  %v4349_v14 = vmax.f32 %v4321_v46, 0.0 }
 0x58d   :  { %v4218_v31 = vpop.f32.mrf.mxu0  ;;  %v3969_v51 = vadd.f32 %v9253_v0, %v9234_v34 }
 0x58e   :  { %v4323_v32 = vadd.f32 %v9348_v43, %v4283_v47  ;;  %v4284_v4 = vadd.f32 %v4218_v31, %v9224_v59  ;;  %v4350_v59 = vmax.f32 %v4322_v41, 0.0  ;;  %v3938_v41 = vpop.f32.mrf.mxu1 }
 0x58f   :  { %v4222_v25 = vpop.f32.mrf.mxu0 }
 0x590   :  { %v4351_v15 = vmax.f32 %v4323_v32, 0.0  ;;  %v4324_v36 = vadd.f32 %v9353_v63, %v4284_v4  ;;  %v4285_v28 = vadd.f32 %v4222_v25, %v9229_v62  ;;  %v3970_v62 = vadd.f32 %v9261_v27, %v9236_v60 }
 0x591   :  { %v4224_v29 = vpop.f32.mrf.mxu0 }
 0x592   :  { %v9375_v47 = vpack.c.bf16 %v4351_v15, %v4349_v14  ;;  %v4352_v31 = vmax.f32 %v4324_v36, 0.0  ;;  %v4286_v24 = vadd.f32 %v4224_v29, %v3968_v38  ;;  %v4325_v10 = vadd.f32 %v9348_v43, %v4285_v28 }
 0x593   :  { %v4226_v18 = vpop.f32.mrf.mxu0  ;;  %v3971_v29 = vadd.f32 %v9270_v61, %v9239_v5  ;;  %v3972_v38 = vadd.f32 %v9278_v37, %v9242_v57  ;;  %v3940_v5 = vpop.f32.mrf.mxu1  ;;  %v3974_v57 = vadd.f32 %v9306_v50, %v9251_v17 }
 0x594   :  { %v4287_v46 = vadd.f32 %v4226_v18, %v3969_v51  ;;  %v9381_v32 = vpack.c.bf16 %v4352_v31, %v4350_v59  ;;  %v4326_v34 = vadd.f32 %v9353_v63, %v4286_v24  ;;  %v4353_v14 = vmax.f32 %v4325_v10, 0.0 }
 0x595   :  { %v4228_v4 = vpop.f32.mrf.mxu0  ;;  %v3973_v24 = vadd.f32 %v9294_v55, %v9249_v1 }
 0x596   :  { %v4327_v0 = vadd.f32 %v9348_v43, %v4287_v46  ;;  %v4288_v3 = vadd.f32 %v4228_v4, %v3970_v62  ;;  %v4354_v28 = vmax.f32 %v4326_v34, 0.0  ;;  %v3975_v4 = vadd.f32 %v9317_v45, %v9256_v42  ;;  %v3944_v34 = vpop.f32.mrf.mxu1 }
 0x597   :  { %v4232_v25 = vpop.f32.mrf.mxu0 }
 0x598   :  { %v4355_v15 = vmax.f32 %v4327_v0, 0.0  ;;  %v4328_v60 = vadd.f32 %v9353_v63, %v4288_v3  ;;  %v4289_v27 = vadd.f32 %v4232_v25, %v3971_v29  ;;  %v3976_v3 = vadd.f32 %v9327_v2, %v9259_v53  ;;  %v3946_v42 = vpop.f32.mrf.mxu1 }
 0x599   :  { %v4234_v36 = vpop.f32.mrf.mxu0  ;;  %v3978_v53 = vadd.f32 %v9356_v49, %v9268_v8 }
 0x59a   :  { %v9392_v51 = vpack.c.bf16 %v4355_v15, %v4353_v14  ;;  %v4356_v59 = vmax.f32 %v4328_v60, 0.0  ;;  %v4290_v31 = vadd.f32 %v4234_v36, %v3972_v38  ;;  %v4329_v18 = vadd.f32 %v9348_v43, %v4289_v27 }
 0x59b   :  { %v4236_v61 = vpop.f32.mrf.mxu0  ;;  %v3977_v14 = vadd.f32 %v9340_v20, %v9266_v35 }
 0x59c   :  { %v4291_v46 = vadd.f32 %v4236_v61, %v3973_v24  ;;  %v9397_v37 = vpack.c.bf16 %v4356_v59, %v4354_v28  ;;  %v4330_v62 = vadd.f32 %v9353_v63, %v4290_v31  ;;  %v4357_v29 = vmax.f32 %v4329_v18, 0.0  ;;  %v3948_v18 = vpop.f32.mrf.mxu1 }
 0x59d   :  { %v4238_v10 = vpop.f32.mrf.mxu0  ;;  %v3979_v61 = vadd.f32 %v9367_v48, %v9273_v6 }
 0x59e   :  { %v4331_v1 = vadd.f32 %v9348_v43, %v4291_v46  ;;  %v4292_v55 = vadd.f32 %v4238_v10, %v3974_v57  ;;  %v4358_v15 = vmax.f32 %v4330_v62, 0.0  ;;  %v3980_v57 = vadd.f32 %v3936_v58, %v9276_v19 }
 0x59f   :  { %v4242_v0 = vpop.f32.mrf.mxu0  ;;  %v3982_v58 = vadd.f32 %v3940_v5, %v9291_v11  ;;  %v3984_v5 = vadd.f32 %v3946_v42, %v9303_v7  ;;  %v3309_v7 = vadd.f32 %v9194_v40, %v9208_v23 }
 0x5a0   :  { %v4359_v25 = vmax.f32 %v4331_v1, 0.0  ;;  %v4332_v17 = vadd.f32 %v9353_v63, %v4292_v55  ;;  %v4293_v50 = vadd.f32 %v4242_v0, %v3975_v4  ;;  %v3981_v55 = vadd.f32 %v3938_v41, %v9286_v52 }
 0x5a1   :  { %v4244_v38 = vpop.f32.mrf.mxu0 }
 0x5a2   :  { %v9408_v60 = vpack.c.bf16 %v4359_v25, %v4357_v29  ;;  %v4360_v27 = vmax.f32 %v4332_v17, 0.0  ;;  %v4294_v36 = vadd.f32 %v4244_v38, %v3976_v3  ;;  %v4333_v24 = vadd.f32 %v9348_v43, %v4293_v50  ;;  %v3950_v25 = vpop.f32.mrf.mxu1 }
 0x5a3   :  { %v4246_v45 = vpop.f32.mrf.mxu0  ;;  %v3301_v50 = vadd.f32 %v9180_v16, %v9202_v26 }
 0x5a4   :  { %v4295_v28 = vadd.f32 %v4246_v45, %v3977_v14  ;;  %v9413_v2 = vpack.c.bf16 %v4360_v27, %v4358_v15  ;;  %v4334_v31 = vadd.f32 %v9353_v63, %v4294_v36  ;;  %v4361_v10 = vmax.f32 %v4333_v24, 0.0  ;;  %v3954_v36 = vpop.f32.mrf.mxu1 }
 0x5a5   :  { %v4248_v59 = vpop.f32.mrf.mxu0  ;;  %v3983_v15 = vadd.f32 %v3944_v34, %v9297_v33  ;;  %v3305_v27 = vadd.f32 %v9184_v12, %v9204_v30  ;;  %v3640_v45 = vadd.f32 %v9311_v9, %v3301_v50  ;;  %v3985_v34 = vadd.f32 %v3948_v18, %v9309_v56  ;;  %v10230_v56 = vld [vmem:[#allocation100_spill] sm:$0xff] }
 0x5a6   :  { %v4335_v35 = vadd.f32 %v9348_v43, %v4295_v28  ;;  %v4296_v20 = vadd.f32 %v4248_v59, %v3978_v53  ;;  %v4362_v4 = vmax.f32 %v4334_v31, 0.0  ;;  %v3307_v53 = vadd.f32 %v9188_v13, %v9206_v44  ;;  %v3956_v42 = vpop.f32.mrf.mxu1 }
 0x5a7   :  { %v4252_v46 = vpop.f32.mrf.mxu0  ;;  %v3641_v59 = vadd.f32 %v9319_v21, %v3305_v27  ;;  %v3986_v13 = vadd.f32 %v3950_v25, %v3640_v45  ;;  %v10229_v21 = vld [vmem:[#allocation7_spill] sm:$0xff]  ;;  %v3643_v18 = vadd.f32 %v10230_v56, %v3309_v7  ;;  %v6690_v7 = vld [vmem:[%s9860_s8 + $0x98] sm:$0xff]  }
 0x5a8   :  { %v4363_v62 = vmax.f32 %v4335_v35, 0.0  ;;  %v4336_v1 = vadd.f32 %v9353_v63, %v4296_v20  ;;  %v4297_v8 = vadd.f32 %v4252_v46, %v3979_v61  ;;  %v3642_v35 = vadd.f32 %v9324_v54, %v3307_v53  ;;  %v10231_v54 = vld [vmem:[#allocation2_spill] sm:$0xff] }
 0x5a9   :  { %v4254_v49 = vpop.f32.mrf.mxu0  ;;  %v3987_v23 = vadd.f32 %v3954_v36, %v3641_v59 }
 0x5aa   :  { %v9422_v0 = vpack.c.bf16 %v4363_v62, %v4361_v10  ;;  %v4364_v3 = vmax.f32 %v4336_v1, 0.0  ;;  %v4298_v29 = vadd.f32 %v4254_v49, %v3980_v57  ;;  %v4337_v6 = vadd.f32 %v9348_v43, %v4297_v8  ;;  %v3958_v8 = vpop.f32.mrf.mxu1 }
 0x5ab   :  { %v4256_v17 = vpop.f32.mrf.mxu0  ;;  %v3311_v57 = vadd.f32 %v10229_v21, %v9210_v22 }
 0x5ac   :  { %v4299_v48 = vadd.f32 %v4256_v17, %v3981_v55  ;;  %v9426_v19 = vpack.c.bf16 %v4364_v3, %v4362_v4  ;;  %v4338_v52 = vadd.f32 %v9353_v63, %v4298_v29  ;;  %v4365_v24 = vmax.f32 %v4337_v6, 0.0 }
 0x5ad   :  { %v4258_v38 = vpop.f32.mrf.mxu0  ;;  %v3644_v49 = vadd.f32 %v10231_v54, %v3311_v57  ;;  %v3988_v4 = vadd.f32 %v3956_v42, %v3642_v35  ;;  %v3989_v6 = vadd.f32 %v3958_v8, %v3643_v18  ;;  %v6692_v42 = vld [vmem:[%s9860_s8 + $0x90] sm:$0xff]   ;;  %v6689_v18 = vld [vmem:[%s9860_s8 + $0x120] sm:$0xff]  }
 0x5ae   :  { %v4339_v41 = vadd.f32 %v9348_v43, %v4299_v48  ;;  %v4300_v14 = vadd.f32 %v4258_v38, %v3982_v58  ;;  %v4366_v12 = vmax.f32 %v4338_v52, 0.0  ;;  %v3960_v52 = vpop.f32.mrf.mxu1 }
 0x5af   :  { %v4262_v11 = vpop.f32.mrf.mxu0  ;;  %v3990_v27 = vadd.f32 %v3960_v52, %v3644_v49  ;;  %v6691_v49 = vld [vmem:[%s9860_s8 + $0x118] sm:$0xff]  }
 0x5b0   :  { %v4367_v28 = vmax.f32 %v4339_v41, 0.0  ;;  %v4340_v16 = vadd.f32 %v9353_v63, %v4300_v14  ;;  %v4301_v26 = vadd.f32 %v4262_v11, %v3983_v15 }
 0x5b1   :  { %v4264_v33 = vpop.f32.mrf.mxu0 }
 0x5b2   :  { %v4385_v30 = vpack.c.bf16 %v4367_v28, %v4365_v24  ;;  %v4368_v31 = vmax.f32 %v4340_v16, 0.0  ;;  %v4302_v9 = vadd.f32 %v4264_v33, %v3984_v5  ;;  %v4341_v61 = vadd.f32 %v9348_v43, %v4301_v26 }
 0x5b3   :  { %v4266_v20 = vpop.f32.mrf.mxu0 }
 0x5b4   :  { %v4303_v46 = vadd.f32 %v4266_v20, %v3985_v34  ;;  %v4386_v44 = vpack.c.bf16 %v4368_v31, %v4366_v12  ;;  %v4342_v62 = vadd.f32 %v9353_v63, %v4302_v9  ;;  %v4369_v3 = vmax.f32 %v4341_v61, 0.0  ;;  %v6686_v31 = vld [vmem:[%s9860_s8 + $0x58] sm:$0xff]   ;;  %v6688_v9 = vld [vmem:[%s9860_s8 + $0x50] sm:$0xff]  }
 0x5b5   :  { %v4268_v10 = vpop.f32.mrf.mxu0 }
 0x5b6   :  { %v4343_v1 = vadd.f32 %v9348_v43, %v4303_v46  ;;  %v4304_v40 = vadd.f32 %v4268_v10, %v3986_v13  ;;  %v4370_v48 = vmax.f32 %v4342_v62, 0.0 }
 0x5b7   :  { %v4272_v55 = vpop.f32.mrf.mxu0 }
 0x5b8   :  { %v4371_v29 = vmax.f32 %v4343_v1, 0.0  ;;  %v4344_v25 = vadd.f32 %v9353_v63, %v4304_v40  ;;  %v4305_v17 = vadd.f32 %v4272_v55, %v3987_v23 }
 0x5b9   :  { %v4274_v22 = vpop.f32.mrf.mxu0 }
 0x5ba   :  { %v4387_v58 = vpack.c.bf16 %v4371_v29, %v4369_v3  ;;  %v4372_v50 = vmax.f32 %v4344_v25, 0.0  ;;  %v4306_v38 = vadd.f32 %v4274_v22, %v3988_v4  ;;  %v4345_v14 = vadd.f32 %v9348_v43, %v4305_v17 }
 0x5bb   :  { %v4276_v41 = vpop.f32.mrf.mxu0 }
 0x5bc   :  { %v4307_v15 = vadd.f32 %v4276_v41, %v3989_v6  ;;  %v4388_v36 = vpack.c.bf16 %v4372_v50, %v4370_v48  ;;  %v4346_v11 = vadd.f32 %v9353_v63, %v4306_v38  ;;  %v4373_v28 = vmax.f32 %v4345_v14, 0.0  ;;  %v6693_v41 = vld [vmem:[%s9860_s8 + $0x110] sm:$0xff]  }
 0x5bd   :  { %v4278_v45 = vpop.f32.mrf.mxu0 }
 0x5be   :  { %v4347_v5 = vadd.f32 %v9348_v43, %v4307_v15  ;;  %v4308_v24 = vadd.f32 %v4278_v45, %v3990_v27  ;;  %v4374_v53 = vmax.f32 %v4346_v11, 0.0  ;;  %v6667_v43 = vld [vmem:[%s9859_s7] sm:$0xff]   ;;  %v6694_v27 = vld [vmem:[%s9860_s8 + $0xd8] sm:$0xff]  }
 0x5c0   :  { %v4375_v16 = vmax.f32 %v4347_v5, 0.0  ;;  %v4348_v26 = vadd.f32 %v9353_v63, %v4308_v24  ;;  %v6674_v63 = vld [vmem:[%s9860_s8 + $0x88] sm:$0xff]  }
 0x5c2   :  { %v4389_v59 = vpack.c.bf16 %v4375_v16, %v4373_v28  ;;  %v4376_v33 = vmax.f32 %v4348_v26, 0.0 }
 0x5c4   :  { %v4390_v34 = vpack.c.bf16 %v4376_v33, %v4374_v53  ;;  %v4420_v12 = vsel %vm699_vm1, %v4389_v59, 0  ;;  %v6695_v33 = vld [vmem:[%s9860_s8 + $0x108] sm:$0xff]  }
 0x5c6   :  { %6136 = vmatprep.subr.msk.bf16.mxu1 %vm699_vm1, %v4390_v34 }
 0x5c7   :  { %4428 = vmatpush1.bf16.msra.mxu1 %v4420_v12 }
 0x5c8   :  { %4429 = vmatprep.subr.bf16.mxu1 %v4388_v36 }
 0x5cb   :  { %4430 = vmatpush1.bf16.msra.mxu1 %v4387_v58 }
 0x5cc   :  { %4431 = vmatprep.subr.bf16.mxu1 %v4386_v44  ;;  %v6687_v44 = vld [vmem:[%s9860_s8 + $0x128] sm:$0xff]  }
 0x5cf   :  { %4432 = vmatpush1.bf16.msra.mxu1 %v4385_v30  ;;  %v6685_v30 = vld [vmem:[%s9860_s8 + $0x40] sm:$0xff]  }
 0x5d0   :  { %4433 = vmatprep.subr.bf16.mxu1 %v9426_v19  ;;  %v6684_v19 = vld [vmem:[%s9860_s8 + $0x60] sm:$0xff]  }
 0x5d3   :  { %4434 = vmatpush1.bf16.msra.mxu1 %v9422_v0  ;;  %v6683_v0 = vld [vmem:[%s9860_s8 + $0x48] sm:$0xff]  }
 0x5d4   :  { %4435 = vmatprep.subr.bf16.mxu1 %v9413_v2  ;;  %v6682_v2 = vld [vmem:[%s9860_s8 + $0x68] sm:$0xff]   ;;  %4803 = vmatpush2.bf16.msra.mxu0 %v6683_v0  ;;  %v6697_v0 = vld [vmem:[%s9860_s8 + $0x100] sm:$0xff]  }
 0x5d5   :  { %4804 = vmatprep.subr.bf16.mxu0 %v10222_v39 }
 0x5d7   :  { %4436 = vmatpush1.bf16.msra.mxu1 %v9408_v60  ;;  %v6669_v60 = vld [vmem:[%s9859_s7 + $0x10] ss:$0 sps:$4 sm:$0xff]  }
 0x5d8   :  { %4437 = vmatprep.subr.bf16.mxu1 %v9397_v37  ;;  %v6680_v37 = vld [vmem:[%s9860_s8 + $0x70] sm:$0xff]   ;;  %4805 = vmatpush2.bf16.msra.mxu0 %v6685_v30 }
 0x5d9   :  { %5115 = vmatprep.subr.bf16.mxu0 %v10222_v39 }
 0x5db   :  { %4438 = vmatpush1.bf16.msra.mxu1 %v9392_v51  ;;  %v6678_v51 = vld [vmem:[%s9860_s8 + $0x78] sm:$0xff]  }
 0x5dc   :  { %4439 = vmatprep.subr.bf16.mxu1 %v9381_v32  ;;  %v6676_v32 = vld [vmem:[%s9860_s8 + $0x80] sm:$0xff]  }
 0x5df   :  { %4440 = vmatpush1.bf16.msra.mxu1 %v9375_v47  ;;  %v6668_v47 = vld [vmem:[%s9859_s7 + $0x8] sm:$0xff]  }
 0x5e0   :  { %4652 = vmatprep.subr.bf16.mxu1 %v10222_v39 }
 0x5e2   :  { %6137 = vmatmul.mubr.msk.bf16.vlgmr.msra.gmra.mxu1 %vm4409_vm9, %v6667_v43 }
 0x5e3   :  { %4467 = vmatprep.mubr.bf16.mxu1 %v10222_v39  ;;  %4653 = vmatpush1.bf16.msra.mxu1 %v6674_v63  ;;  %v6696_v63 = vld [vmem:[%s9860_s8 + $0xd0] sm:$0xff]  }
 0x5e4   :  { %4654 = vmatprep.subr.bf16.mxu1 %v10222_v39 }
 0x5e7   :  { %4655 = vmatpush1.bf16.msra.mxu1 %v6676_v32 }
 0x5e8   :  { %4656 = vmatprep.subr.bf16.mxu1 %v10222_v39 }
 0x5ea   :  { %6138 = vmatmul.mubr.msk.bf16.gmra.mxu1 %vm4409_vm9, %v6668_v47 }
 0x5eb   :  { %4477 = vmatprep.mubr.bf16.mxu1 %v10222_v39  ;;  %4657 = vmatpush1.bf16.msra.mxu1 %v6678_v51 }
 0x5ec   :  { %4658 = vmatprep.subr.bf16.mxu1 %v10222_v39 }
 0x5ef   :  { %4659 = vmatpush1.bf16.msra.mxu1 %v6680_v37 }
 0x5f0   :  { %4660 = vmatprep.subr.bf16.mxu1 %v10222_v39 }
 0x5f2   :  { %6139 = vmatmul.mubr.msk.bf16.gmra.mxu1 %vm4409_vm9, %v6669_v60 }
 0x5f3   :  { %4661 = vmatpush1.bf16.msra.mxu1 %v6682_v2 }
 0x5f4   :  { %4662 = vmatprep.subr.bf16.mxu1 %v10222_v39 }
 0x5f7   :  { %4663 = vmatpush1.bf16.msra.mxu1 %v6684_v19 }
 0x5f8   :  { %4664 = vmatprep.subr.bf16.mxu1 %v10222_v39 }
 0x5fb   :  { %4665 = vmatpush1.bf16.msra.mxu1 %v6686_v31 }
 0x5fc   :  { %4666 = vmatprep.subr.bf16.mxu1 %v10222_v39 }
 0x5ff   :  { %4667 = vmatpush1.bf16.msra.mxu1 %v6688_v9 }
 0x600   :  { %4680 = vmatprep.subr.bf16.mxu1 %v10222_v39 }
 0x603   :  { %4681 = vmatpush2.bf16.msra.mxu1 %v6690_v7  ;;  %v6698_v7 = vld [vmem:[%s9860_s8 + $0xc8] sm:$0xff]  }
 0x604   :  { %4682 = vmatprep.subr.bf16.mxu1 %v10222_v39 }
 0x607   :  { %4683 = vmatpush2.bf16.msra.mxu1 %v6692_v42 }
 0x608   :  { %4939 = vmatprep.subr.bf16.mxu1 %v10222_v39 }
 0x6a2   :  { %v4459_v35 = vpop.f32.mrf.mxu1 }
 0x6a4   :  { %v4461_v20 = vpop.f32.mrf.mxu1 }
 0x6a6   :  { %v4463_v61 = vpop.f32.mrf.mxu1 }
 0x6a7   :  { %v9535_v21 = vpack.c.bf16 %v4463_v61, %v4459_v35  ;;  %v6699_v61 = vld [vmem:[%s9860_s8 + $0xf8] sm:$0xff]  }
 0x6a8   :  { %v4465_v46 = vpop.f32.mrf.mxu1 }
 0x6a9   :  { %v9530_v13 = vpack.c.bf16 %v4465_v46, %v4461_v20  ;;  %v4536_v62 = vshll.u32 %v9535_v21, 16  ;;  %v4534_v22 = vshrl.u32 %v9535_v21, 16  ;;  %v5197_v51 = vrot.slane %v9535_v21, 2  ;;  %v6700_v46 = vld [vmem:[%s9860_s8 + $0xc0] sm:$0xff]  }
 0x6aa   :  { %v4469_v57 = vpop.f32.mrf.mxu1 }
 0x6ab   :  { %6183 = vmatprep.mubr.msk.bf16.mxu0 %vm4642_vm10, %v9530_v13  ;;  %v4548_v10 = vshll.u32 %v9530_v13, 16  ;;  %v4546_v3 = vshrl.u32 %v9530_v13, 16  ;;  %v4538_v29 = vrot.slane %v4536_v62, 1 }
 0x6ac   :  { %v4471_v56 = vpop.f32.mrf.mxu1  ;;  %4807 = vmatmul.mubr.bf16.vlgmr.msra.gmra.mxu0 %v9535_v21 }
 0x6ad   :  { %5116 = vmatpush1.bf16.msra.mxu0 %v6687_v44  ;;  %v4550_v55 = vrot.slane %v4548_v10, 1  ;;  %v4539_v15 = vor.u32 %v4538_v29, %v4534_v22  ;;  %v5028_v36 = vrot.slane %v4546_v3, 1  ;;  %v5029_v45 = vrot.slane %v4548_v10, 2  ;;  %v6702_v10 = vld [vmem:[%s9860_s8 + $0xb8] sm:$0xff]  }
 0x6ae   :  { %v4473_v1 = vpop.f32.mrf.mxu1  ;;  %5117 = vmatprep.subr.bf16.mxu0 %v10222_v39 }
 0x6af   :  { %v9546_v40 = vpack.c.bf16 %v4473_v1, %v4469_v57  ;;  %v4551_v38 = vor.u32 %v4550_v55, %v4546_v3  ;;  %v5030_v32 = vor.u32 %v5029_v45, %v5028_v36  ;;  %v6701_v57 = vld [vmem:[%s9860_s8 + $0xf0] sm:$0xff]   ;;  %v4860_v1 = vrot.slane %v9530_v13, 1  ;;  %v6708_v36 = vld [vmem:[%s9860_s8 + $0xe8] sm:$0xff]  }
 0x6b0   :  { %v4475_v23 = vpop.f32.mrf.mxu1  ;;  %v6704_v55 = vld [vmem:[%s9860_s8 + $0xb0] sm:$0xff]  }
 0x6b1   :  { %v4541_v8 = vshll.u32 %v9546_v40, 16  ;;  %v9549_v54 = vpack.c.bf16 %v4475_v23, %v4471_v56  ;;  %5118 = vmatpush1.bf16.msra.mxu0 %v6689_v18  ;;  %v5198_v43 = vrot.slane %v9546_v40, 2  ;;  %v4557_v60 = vshrl.u32 %v9546_v40, 16 }
 0x6b2   :  { %5119 = vmatprep.subr.bf16.mxu0 %v10222_v39  ;;  %v4479_v4 = vpop.f32.mrf.mxu1 }
 0x6b3   :  { %6184 = vmatprep.mubr.msk.bf16.mxu0 %vm4642_vm10, %v9549_v54  ;;  %v4553_v25 = vshll.u32 %v9549_v54, 16  ;;  %v4565_v17 = vshrl.u32 %v9549_v54, 16  ;;  %v9564_v6 = vpack.c.bf16 %v4479_v4, %v4479_v4  ;;  %v4543_v58 = vrot.slane %v4541_v8, 1 }
 0x6b4   :  { %4815 = vmatmul.mubr.bf16.gmra.mxu0 %v9546_v40  ;;  %v4481_v48 = vpop.f32.mrf.mxu1  ;;  %v9614_v30 = vsel %vm699_vm1, %v5197_v51, %v5198_v43  ;;  %v4861_v18 = vrot.slane %v9549_v54, 1  ;;  %v5024_v4 = vrot.slane %v4557_v60, 1  ;;  %v5025_v3 = vrot.slane %v4541_v8, 2  ;;  %v6706_v8 = vld [vmem:[%s9860_s8 + $0xa8] sm:$0xff]   ;;  %v6715_v51 = vld [vmem:[%s9860_s8 + $0x150] sm:$0xff]  }
 0x6b5   :  { %5120 = vmatpush1.bf16.msra.mxu0 %v6691_v49  ;;  %v9568_v50 = vpack.c.bf16 %v4481_v48, %v4481_v48  ;;  %v4555_v52 = vrot.slane %v4553_v25, 1  ;;  %v5031_v14 = vrot.slane %v4565_v17, 1  ;;  %v5032_v11 = vrot.slane %v4553_v25, 2  ;;  %v6703_v49 = vld [vmem:[%s9860_s8 + $0x138] sm:$0xff]  }
 0x6b6   :  { %5121 = vmatprep.subr.bf16.mxu0 %v10222_v39  ;;  %v4483_v5 = vpop.f32.mrf.mxu1  ;;  %v4544_v16 = vsel %vm504_vm4, %v4539_v15, %v4543_v58  ;;  %v4561_v53 = vshll.u32 %v9564_v6, 16  ;;  %v5203_v31 = vrot.slane %v9564_v6, 2  ;;  %v4559_v9 = vor.u32 %v4557_v60, %v4543_v58  ;;  %v6719_v60 = vld [vmem:[%s9860_s8 + $0x180] sm:$0xff]  }
 0x6b7   :  { %v4556_v24 = vsel %vm504_vm4, %v4551_v38, %v4555_v52  ;;  %6185 = vmatprep.mubr.msk.bf16.mxu0 %vm4642_vm10, %v9568_v50  ;;  %v4569_v28 = vshll.u32 %v9568_v50, 16  ;;  %v9585_v26 = vor.u32 %v5032_v11, %v5031_v14  ;;  %v4567_v34 = vor.u32 %v4565_v17, %v4555_v52  ;;  %v6705_v17 = vld [vmem:[%s9860_s8 + $0x130] sm:$0xff]   ;;  %v6709_v11 = vld [vmem:[%s9860_s8 + $0xe0] sm:$0xff]  }
 0x6b8   :  { %6170 = vmatprep.mubr.msk.bf16.mxu1 %vm4642_vm10, %v4556_v24  ;;  %v4484_v59 = vpop.f32.mrf.mxu1  ;;  %v4563_v2 = vrot.slane %v4561_v53, 1  ;;  %v4576_v19 = vshrl.u32 %v9568_v50, 16  ;;  %v9625_v35 = vsel %vm699_vm1, %v5198_v43, %v5203_v31  ;;  %v4573_v44 = vshrl.u32 %v9564_v6, 16 }
 0x6b9   :  { %5122 = vmatpush1.bf16.msra.mxu0 %v6693_v41  ;;  %4685 = vmatmul.mubr.bf16.vlgmr.msra.gmra.mxu1 %v4544_v16  ;;  %v4571_v12 = vrot.slane %v4569_v28, 1  ;;  %v5034_v37 = vsel %vm1535_vm5, %v5030_v32, %v9585_v26  ;;  %v4862_v23 = vsel %vm1169_vm3, %v4860_v1, %v4861_v18  ;;  %v5040_v25 = vrot.slane %v4569_v28, 2 }
 0x6ba   :  { %4940 = vmatpush1.bf16.msra.mxu1 %v6694_v27  ;;  %5123 = vmatprep.subr.bf16.mxu0 %v10222_v39  ;;  %v4564_v20 = vsel %vm504_vm4, %v4559_v9, %v4563_v2  ;;  %v4575_v56 = vor.u32 %v4573_v44, %v4563_v2  ;;  %v5039_v29 = vrot.slane %v4576_v19, 1  ;;  %v5021_v48 = vrot.slane %v4534_v22, 1  ;;  %v6707_v22 = vld [vmem:[%s9860_s8 + $0xa0] sm:$0xff]   ;;  %v6724_v9 = vld [vmem:[%s9862_s10 + $0x18] sm:$0xff]  }
 0x6bb   :  { %4941 = vmatprep.subr.bf16.mxu1 %v10222_v39  ;;  %v4572_v47 = vsel %vm504_vm4, %v4567_v34, %v4571_v12  ;;  %v4578_v42 = vor.u32 %v4576_v19, %v4571_v12  ;;  %v5022_v58 = vrot.slane %v4536_v62, 2  ;;  %v5026_v38 = vor.u32 %v5025_v3, %v5024_v4  ;;  %v6713_v12 = vld [vmem:[%s9860_s8 + $0x160] sm:$0xff]  }
 0x6bc   :  { %4823 = vmatmul.mubr.bf16.gmra.mxu0 %v9564_v6  ;;  %6171 = vmatprep.mubr.msk.bf16.mxu1 %vm4642_vm10, %v4572_v47  ;;  %v5041_v52 = vor.u32 %v5040_v25, %v5039_v29  ;;  %v5035_v14 = vrot.slane %v4573_v44, 1  ;;  %v5036_v15 = vrot.slane %v4561_v53, 2  ;;  %v4858_v24 = vrot.slane %v9546_v40, 1  ;;  %v6711_v40 = vld [vmem:[%s9860_s8 + $0x170] sm:$0xff]  }
 0x6bd   :  { %5124 = vmatpush1.bf16.msra.mxu0 %v6695_v33  ;;  %6249 = vmatprep.mubr.msk.bf16.mxu0 %vm4642_vm10, %v5034_v37  ;;  %v5023_v41 = vor.u32 %v5022_v58, %v5021_v48  ;;  %v4865_v28 = vrot.slane %v9568_v50, 1  ;;  %v4857_v16 = vrot.slane %v9535_v21, 1  ;;  %v4863_v21 = vrot.slane %v9564_v6, 1  ;;  %v6712_v33 = vld [vmem:[%s9860_s8 + $0x168] sm:$0xff]  }
 0x6be   :  { %4942 = vmatpush1.bf16.msra.mxu1 %v6696_v63  ;;  %5125 = vmatprep.subr.bf16.mxu0 %v10222_v39  ;;  %v5042_v27 = vsel %vm1535_vm5, %v9585_v26, %v5041_v52  ;;  %v5037_v45 = vor.u32 %v5036_v15, %v5035_v14  ;;  %v6710_v26 = vld [vmem:[%s9860_s8 + $0x178] sm:$0xff]   ;;  %v5201_v43 = vrot.slane %v9549_v54, 2  ;;  %v5200_v32 = vrot.slane %v9530_v13, 2  ;;  %v6716_v54 = vld [vmem:[%s9860_s8 + $0x148] sm:$0xff]   ;;  %v6717_v13 = vld [vmem:[%s9860_s8 + $0x140] sm:$0xff]  }
 0x6bf   :  { %4943 = vmatprep.subr.bf16.mxu1 %v10222_v39  ;;  %v5027_v62 = vsel %vm1535_vm5, %v5023_v41, %v5026_v38  ;;  %v4859_v53 = vsel %vm1169_vm3, %v4857_v16, %v4858_v24  ;;  %v4866_v59 = vsel %vm1169_vm3, %v4861_v18, %v4865_v28  ;;  %v4864_v34 = vsel %vm1169_vm3, %v4858_v24, %v4863_v21  ;;  %v6714_v63 = vld [vmem:[%s9860_s8 + $0x158] sm:$0xff]   ;;  %v6718_v37 = vld [vmem:[%s9860_s8 + $0x188] sm:$0xff]  }
 0x6c0   :  { %v5038_v5 = vsel %vm1535_vm5, %v5026_v38, %v5037_v45  ;;  %v5202_v47 = vsel %vm699_vm1, %v5200_v32, %v5201_v43  ;;  %v5205_v2 = vrot.slane %v9568_v50, 2  ;;  %v6735_v19 = vmov 0.0   ;;  %v6722_v6 = vld [vmem:[%s9862_s10 + $0x28] sm:$0xff]  }
 0x6c1   :  { %5126 = vmatpush1.bf16.msra.mxu0 %v6697_v0  ;;  %4693 = vmatmul.mubr.bf16.gmra.mxu1 %v4564_v20 }
 0x6c2   :  { %4944 = vmatpush1.bf16.msra.mxu1 %v6698_v7  ;;  %5127 = vmatprep.subr.bf16.mxu0 %v10222_v39  ;;  %v5206_v0 = vsel %vm699_vm1, %v5201_v43, %v5205_v2  ;;  %v6725_v7 = vld [vmem:[%s9862_s10 + $0x10] sm:$0xff]  }
 0x6c3   :  { %4945 = vmatprep.subr.bf16.mxu1 %v10222_v39  ;;  %6172 = vmatprep.mubr.msk.bf16.mxu1 %vm4642_vm10, %v4578_v42  ;;  %v6726_v42 = vld [vmem:[%s9862_s10 + $0x8] sm:$0xff]  }
 0x6c5   :  { %5128 = vmatpush1.bf16.msra.mxu0 %v6699_v61 }
 0x6c6   :  { %4946 = vmatpush1.bf16.msra.mxu1 %v6700_v46  ;;  %5129 = vmatprep.subr.bf16.mxu0 %v10222_v39 }
 0x6c7   :  { %4947 = vmatprep.subr.bf16.mxu1 %v10222_v39 }
 0x6c9   :  { %5130 = vmatpush1.bf16.msra.mxu0 %v6701_v57  ;;  %4701 = vmatmul.mubr.bf16.gmra.mxu1 %v4575_v56 }
 0x6ca   :  { %4948 = vmatpush1.bf16.msra.mxu1 %v6702_v10  ;;  %6216 = vmatprep.mubr.msk.bf16.mxu1 %vm4642_vm10, %v4862_v23 }
 0x6cb   :  { %5143 = vmatprep.subr.bf16.mxu0 %v10222_v39  ;;  %4949 = vmatprep.subr.bf16.mxu1 %v10222_v39 }
 0x6cd   :  { %5144 = vmatpush2.bf16.msra.mxu0 %v6703_v49 }
 0x6ce   :  { %4950 = vmatpush1.bf16.msra.mxu1 %v6704_v55  ;;  %5145 = vmatprep.subr.bf16.mxu0 %v10222_v39 }
 0x6cf   :  { %4951 = vmatprep.subr.bf16.mxu1 %v10222_v39 }
 0x6d1   :  { %5146 = vmatpush2.bf16.msra.mxu0 %v6705_v17 }
 0x6d2   :  { %4952 = vmatpush1.bf16.msra.mxu1 %v6706_v8  ;;  %6336 = vmatprep.subr.bf16.mxu0 %v6735_v19 }
 0x6d3   :  { %4953 = vmatprep.subr.bf16.mxu1 %v10222_v39 }
 0x6d4   :  { %5148 = vmatmul.mubr.bf16.vlgmr.msra.gmra.mxu0 %v5027_v62 }
 0x6d5   :  { %6250 = vmatprep.mubr.msk.bf16.mxu0 %vm4642_vm10, %v5042_v27 }
 0x6d6   :  { %4954 = vmatpush1.bf16.msra.mxu1 %v6707_v22 }
 0x6d7   :  { %4967 = vmatprep.subr.bf16.mxu1 %v10222_v39 }
 0x6da   :  { %4968 = vmatpush2.bf16.msra.mxu1 %v6708_v36 }
 0x6db   :  { %4969 = vmatprep.subr.bf16.mxu1 %v10222_v39 }
 0x6dc   :  { %5156 = vmatmul.mubr.bf16.gmra.mxu0 %v5038_v5 }
 0x6dd   :  { %6251 = vmatprep.mubr.msk.bf16.mxu0 %vm4642_vm10, %v5041_v52 }
 0x6de   :  { %4970 = vmatpush2.bf16.msra.mxu1 %v6709_v11 }
 0x6df   :  { %5279 = vmatprep.subr.bf16.mxu1 %v10222_v39 }
 0x6e1   :  { %4972 = vmatmul.mubr.bf16.vlgmr.msra.gmra.mxu1 %v4859_v53 }
 0x6e2   :  { %6217 = vmatprep.mubr.msk.bf16.mxu1 %vm4642_vm10, %v4866_v59  ;;  %5280 = vmatpush1.bf16.msra.mxu1 %v6710_v26 }
 0x6e3   :  { %5281 = vmatprep.subr.bf16.mxu1 %v10222_v39 }
 0x6e4   :  { %5164 = vmatmul.mubr.bf16.gmra.mxu0 %v5037_v45 }
 0x6e5   :  { %6352 = vmatprep.mubr.msk.bf16.mxu0 %vm6736_vm11, %v6735_v19 }
 0x6e6   :  { %5282 = vmatpush1.bf16.msra.mxu1 %v6711_v40 }
 0x6e7   :  { %5283 = vmatprep.subr.bf16.mxu1 %v10222_v39 }
 0x6e9   :  { %4980 = vmatmul.mubr.bf16.gmra.mxu1 %v4864_v34 }
 0x6ea   :  { %6218 = vmatprep.mubr.msk.bf16.mxu1 %vm4642_vm10, %v4865_v28  ;;  %5284 = vmatpush1.bf16.msra.mxu1 %v6712_v33 }
 0x6eb   :  { %5285 = vmatprep.subr.bf16.mxu1 %v10222_v39 }
 0x6ee   :  { %5286 = vmatpush1.bf16.msra.mxu1 %v6713_v12 }
 0x6ef   :  { %5287 = vmatprep.subr.bf16.mxu1 %v10222_v39 }
 0x6f1   :  { %4988 = vmatmul.mubr.bf16.gmra.mxu1 %v4863_v21 }
 0x6f2   :  { %5288 = vmatpush1.bf16.msra.mxu1 %v6714_v63  ;;  %6282 = vmatprep.mubr.msk.bf16.mxu1 %vm4642_vm10, %v5202_v47 }
 0x6f3   :  { %5289 = vmatprep.subr.bf16.mxu1 %v10222_v39 }
 0x6f6   :  { %5290 = vmatpush1.bf16.msra.mxu1 %v6715_v51 }
 0x6f7   :  { %5291 = vmatprep.subr.bf16.mxu1 %v10222_v39 }
 0x6fa   :  { %5292 = vmatpush1.bf16.msra.mxu1 %v6716_v54 }
 0x6fb   :  { %5293 = vmatprep.subr.bf16.mxu1 %v10222_v39 }
 0x6fe   :  { %5294 = vmatpush1.bf16.msra.mxu1 %v6717_v13 }
 0x6ff   :  { %5307 = vmatprep.subr.bf16.mxu1 %v10222_v39 }
 0x702   :  { %5308 = vmatpush2.bf16.msra.mxu1 %v6718_v37 }
 0x703   :  { %5309 = vmatprep.subr.bf16.mxu1 %v10222_v39  ;;  %v6720_v39 = vld [vmem:[%s9862_s10 + $0x38] ss:$0 sps:$4 sm:$0xff]  }
 0x704   :  { %v5438_v50 = vsel %vm2975_vm7, %v6720_v39, 0 }
 0x705   :  { %6337 = vmatpush3.bf16.msra.mxu0 %v5438_v50 }
 0x706   :  { %5310 = vmatpush2.bf16.msra.mxu1 %v6719_v60  ;;  %6338 = vmatprep.subr.bf16.mxu0 %v6735_v19 }
 0x707   :  { %6388 = vmatprep.subr.mxu1 %v6735_v19 }
 0x709   :  { %5312 = vmatmul.mubr.bf16.vlgmr.msra.gmra.mxu1 %v9614_v30  ;;  %v6721_v30 = vld [vmem:[%s9862_s10 + $0x30] sm:$0xff]  }
 0x70a   :  { %6283 = vmatprep.mubr.msk.bf16.mxu1 %vm4642_vm10, %v5206_v0  ;;  %6339 = vmatpush3.bf16.msra.mxu0 %v6721_v30 }
 0x70b   :  { %6340 = vmatprep.subr.bf16.mxu0 %v6735_v19 }
 0x70e   :  { %6341 = vmatpush3.bf16.msra.mxu0 %v6722_v6 }
 0x70f   :  { %6342 = vmatprep.subr.bf16.mxu0 %v6735_v19 }
 0x711   :  { %5320 = vmatmul.mubr.bf16.gmra.mxu1 %v9625_v35  ;;  %v6727_v35 = vld [vmem:[%s9862_s10] sm:$0xff]  }
 0x712   :  { %6284 = vmatprep.mubr.msk.bf16.mxu1 %vm4642_vm10, %v5205_v2 }
 0x719   :  { %5328 = vmatmul.mubr.bf16.gmra.mxu1 %v5203_v31  ;;  %v6723_v31 = vld [vmem:[%s9862_s10 + $0x20] sm:$0xff]  }
 0x71a   :  { %6343 = vmatpush3.bf16.msra.mxu0 %v6723_v31  ;;  %6398 = vmatprep.mubr.msk.f32.mxu1 %vm6736_vm11, %v6735_v19  ;;  %v6285_v31 = vld [vmem:[%s9864_s9] ss:$0 sm:$0xff] }
 0x71b   :  { %6344 = vmatprep.subr.bf16.mxu0 %v6735_v19 }
 0x71e   :  { %6345 = vmatpush3.bf16.msra.mxu0 %v6724_v9 }
 0x71f   :  { %6346 = vmatprep.subr.bf16.mxu0 %v6735_v19 }
 0x722   :  { %6347 = vmatpush3.bf16.msra.mxu0 %v6725_v7 }
 0x723   :  { %6348 = vmatprep.subr.bf16.mxu0 %v6735_v19 }
 0x726   :  { %6349 = vmatpush3.bf16.msra.mxu0 %v6726_v42 }
 0x727   :  { %6350 = vmatprep.subr.bf16.mxu0 %v6735_v19 }
 0x72a   :  { %6351 = vmatpush3.bf16.msra.mxu0 %v6727_v35 }
 0x72b   :  { %6364 = vmatprep.subr.bf16.mxu0 %v6735_v19 }
 0x76c   :  { %v4808_v20 = vpop.f32.mrf.mxu0 }
 0x76e   :  { %v4810_v61 = vpop.f32.mrf.mxu0 }
 0x770   :  { %v4811_v46 = vpop.f32.mrf.mxu0 }
 0x772   :  { %v4813_v44 = vpop.f32.mrf.mxu0 }
 0x774   :  { %v4816_v57 = vpop.f32.mrf.mxu0 }
 0x776   :  { %v4818_v56 = vpop.f32.mrf.mxu0 }
 0x778   :  { %v4819_v18 = vpop.f32.mrf.mxu0 }
 0x779   :  { %v4686_v10 = vpop.f32.mrf.mxu1 }
 0x77a   :  { %v4809_v1 = vadd.f32 %v4808_v20, %v4686_v10  ;;  %v4821_v23 = vpop.f32.mrf.mxu0 }
 0x77b   :  { %v4688_v49 = vpop.f32.mrf.mxu1 }
 0x77c   :  { %v4824_v55 = vpop.f32.mrf.mxu0 }
 0x77d   :  { %v4689_v4 = vpop.f32.mrf.mxu1 }
 0x77e   :  { %v4812_v3 = vadd.f32 %v4811_v46, %v4689_v4  ;;  %v4826_v29 = vpop.f32.mrf.mxu0 }
 0x77f   :  { %v4691_v25 = vpop.f32.mrf.mxu1 }
 0x780   :  { %v4827_v17 = vpop.f32.mrf.mxu0 }
 0x781   :  { %v4694_v48 = vpop.f32.mrf.mxu1 }
 0x782   :  { %v4817_v58 = vadd.f32 %v4816_v57, %v4694_v48  ;;  %v4828_v8 = vpop.f32.mrf.mxu0 }
 0x783   :  { %v4696_v38 = vpop.f32.mrf.mxu1 }
 0x784   :  { %v6729_v38 = vld [vmem:[%s9863_s12 + $0x20] sm:$0xff]  }
 0x785   :  { %v4697_v52 = vpop.f32.mrf.mxu1 }
 0x786   :  { %v4820_v41 = vadd.f32 %v4819_v18, %v4697_v52  ;;  %v6728_v18 = vld [vmem:[%s9863_s12 + $0x28] ss:$0 sps:$4 sm:$0x33]  }
 0x787   :  { %v4699_v22 = vpop.f32.mrf.mxu1  ;;  %v5567_v25 = vsel %vm5565_vm12, %v6728_v18, 0 }
 0x789   :  { %v4702_v62 = vpop.f32.mrf.mxu1 }
 0x78a   :  { %v4825_v14 = vadd.f32 %v4824_v55, %v4702_v62 }
 0x78b   :  { %v4704_v15 = vpop.f32.mrf.mxu1 }
 0x78d   :  { %v4705_v27 = vpop.f32.mrf.mxu1 }
 0x78f   :  { %v4706_v36 = vpop.f32.mrf.mxu1 }
 0x790   :  { %v6730_v36 = vld [vmem:[%s9863_s12 + $0x18] sm:$0xff]  }
 0x794   :  { %v5149_v45 = vpop.f32.mrf.mxu0 }
 0x796   :  { %v5151_v11 = vpop.f32.mrf.mxu0 }
 0x798   :  { %v5152_v5 = vpop.f32.mrf.mxu0 }
 0x79a   :  { %v5154_v24 = vpop.f32.mrf.mxu0 }
 0x79c   :  { %v5157_v28 = vpop.f32.mrf.mxu0 }
 0x79e   :  { %v5159_v16 = vpop.f32.mrf.mxu0 }
 0x7a0   :  { %v5160_v26 = vpop.f32.mrf.mxu0 }
 0x7a1   :  { %v4973_v53 = vpop.f32.mrf.mxu1 }
 0x7a2   :  { %v5162_v59 = vpop.f32.mrf.mxu0  ;;  %v4995_v0 = vadd.f32 %v4973_v53, %v4809_v1  ;;  %v6732_v53 = vld [vmem:[%s9863_s12 + $0x8] sm:$0xff]  }
 0x7a3   :  { %v4975_v40 = vpop.f32.mrf.mxu1  ;;  %v6733_v59 = vld [vmem:[%s9863_s12] sm:$0xff]  }
 0x7a4   :  { %v5165_v21 = vpop.f32.mrf.mxu0  ;;  %v5171_v50 = vadd.f32 %v5149_v45, %v4995_v0  ;;  %v6286_v40 = vld [vmem:[%s9865_s11] ss:$0 sm:$0xff] }
 0x7a5   :  { %v4976_v33 = vpop.f32.mrf.mxu1 }
 0x7a6   :  { %v5167_v34 = vpop.f32.mrf.mxu0  ;;  %v4996_v39 = vadd.f32 %v4976_v33, %v4812_v3 }
 0x7a7   :  { %v4978_v12 = vpop.f32.mrf.mxu1 }
 0x7a8   :  { %v5168_v43 = vpop.f32.mrf.mxu0  ;;  %v5172_v42 = vadd.f32 %v5152_v5, %v4996_v39 }
 0x7a9   :  { %v4981_v63 = vpop.f32.mrf.mxu1 }
 0x7aa   :  { %v5169_v32 = vpop.f32.mrf.mxu0  ;;  %v4997_v7 = vadd.f32 %v4981_v63, %v4817_v58 }
 0x7ab   :  { %v4983_v47 = vpop.f32.mrf.mxu1 }
 0x7ac   :  { %v5173_v56 = vadd.f32 %v5157_v28, %v4997_v7 }
 0x7ad   :  { %v4984_v51 = vpop.f32.mrf.mxu1 }
 0x7ae   :  { %v4998_v44 = vadd.f32 %v4984_v51, %v4820_v41 }
 0x7af   :  { %v4986_v54 = vpop.f32.mrf.mxu1 }
 0x7b0   :  { %v5174_v29 = vadd.f32 %v5160_v26, %v4998_v44  ;;  %v6731_v26 = vld [vmem:[%s9863_s12 + $0x10] sm:$0xff]  }
 0x7b1   :  { %v4989_v13 = vpop.f32.mrf.mxu1 }
 0x7b2   :  { %v4999_v4 = vadd.f32 %v4989_v13, %v4825_v14 }
 0x7b3   :  { %v4991_v37 = vpop.f32.mrf.mxu1 }
 0x7b4   :  { %v5175_v41 = vadd.f32 %v5165_v21, %v4999_v4 }
 0x7b5   :  { %v4992_v60 = vpop.f32.mrf.mxu1 }
 0x7b7   :  { %v4993_v2 = vpop.f32.mrf.mxu1 }
 0x7c9   :  { %v5313_v30 = vpop.f32.mrf.mxu1 }
 0x7ca   :  { %v5335_v6 = vadd.f32 %v5313_v30, %v5171_v50 }
 0x7cb   :  { %v5315_v9 = vpop.f32.mrf.mxu1 }
 0x7cc   :  { %v5347_v20 = vadd.f32 %v6285_v31, %v5335_v6 }
 0x7cd   :  { %v5316_v35 = vpop.f32.mrf.mxu1 }
 0x7ce   :  { %v5336_v61 = vadd.f32 %v5316_v35, %v5172_v42  ;;  %v5352_v1 = vmax.f32 %v5347_v20, 0.0 }
 0x7cf   :  { %v5318_v46 = vpop.f32.mrf.mxu1 }
 0x7d0   :  { %v5348_v57 = vadd.f32 %v6285_v31, %v5336_v61 }
 0x7d1   :  { %v5321_v10 = vpop.f32.mrf.mxu1 }
 0x7d2   :  { %v5353_v23 = vmax.f32 %v5348_v57, 0.0  ;;  %v5337_v49 = vadd.f32 %v5321_v10, %v5173_v56 }
 0x7d3   :  { %v5323_v55 = vpop.f32.mrf.mxu1 }
 0x7d4   :  { %v5357_v3 = vpack.c.bf16 %v5353_v23, %v5352_v1  ;;  %v5349_v48 = vadd.f32 %v6285_v31, %v5337_v49  ;;  %v6298_v23 = vld [vmem:[%s9866_s13] ss:$0 sm:$0xff] }
 0x7d5   :  { %v5324_v17 = vpop.f32.mrf.mxu1 }
 0x7d6   :  { %v5338_v58 = vadd.f32 %v5324_v17, %v5174_v29  ;;  %6353 = vmatmul.mubr.msk.bf16.vlgmr.msra.gmra.mxu0 %vm5427_vm13, %v5357_v3  ;;  %v5354_v62 = vmax.f32 %v5349_v48, 0.0 }
 0x7d7   :  { %v5326_v8 = vpop.f32.mrf.mxu1  ;;  %6356 = vmatprep.mubr.msk.bf16.mxu0 %vm6736_vm11, %v6735_v19  ;;  %6365 = vmatpush3.bf16.msra.mxu0 %v5567_v25 }
 0x7d8   :  { %v5350_v52 = vadd.f32 %v6285_v31, %v5338_v58  ;;  %6366 = vmatprep.subr.bf16.mxu0 %v6735_v19  ;;  %v5625_v8 = vld [vmem:[%s9867_s14] sm:$0xff] }
 0x7d9   :  { %v5329_v22 = vpop.f32.mrf.mxu1 }
 0x7da   :  { %v5355_v14 = vmax.f32 %v5350_v52, 0.0  ;;  %v5339_v15 = vadd.f32 %v5329_v22, %v5175_v41 }
 0x7db   :  { %v5331_v27 = vpop.f32.mrf.mxu1  ;;  %6367 = vmatpush3.bf16.msra.mxu0 %v6729_v38 }
 0x7dc   :  { %v5358_v45 = vpack.c.bf16 %v5355_v14, %v5354_v62  ;;  %v5351_v11 = vadd.f32 %v6285_v31, %v5339_v15  ;;  %6368 = vmatprep.subr.bf16.mxu0 %v6735_v19 }
 0x7dd   :  { %v5332_v5 = vpop.f32.mrf.mxu1 }
 0x7de   :  { %6357 = vmatmul.mubr.msk.bf16.gmra.mxu0 %vm5427_vm13, %v5358_v45  ;;  %v5356_v28 = vmax.f32 %v5351_v11, 0.0 }
 0x7df   :  { %v5333_v24 = vpop.f32.mrf.mxu1  ;;  %6360 = vmatprep.mubr.msk.bf16.mxu0 %vm6736_vm11, %v6735_v19  ;;  %6369 = vmatpush3.bf16.msra.mxu0 %v6730_v36 }
 0x7e0   :  { %6370 = vmatprep.subr.bf16.mxu0 %v6735_v19  ;;  %v5359_v16 = vpack.c.bf16 %v5356_v28, %v5356_v28 }
 0x7e3   :  { %6371 = vmatpush3.bf16.msra.mxu0 %v6731_v26 }
 0x7e4   :  { %6372 = vmatprep.subr.bf16.mxu0 %v6735_v19 }
 0x7e6   :  { %6361 = vmatmul.mubr.msk.bf16.gmra.mxu0 %vm5427_vm13, %v5359_v16 }
 0x7e7   :  { %6376 = vmatprep.mubr.msk.bf16.mxu0 %vm6736_vm11, %v6735_v19  ;;  %6373 = vmatpush3.bf16.msra.mxu0 %v6732_v53 }
 0x7e8   :  { %6374 = vmatprep.subr.bf16.mxu0 %v6735_v19 }
 0x7eb   :  { %6375 = vmatpush3.bf16.msra.mxu0 %v6733_v59 }
 0x896   :  { %v5474_v21 = vpop.f32.mrf.mxu0 }
 0x897   :  { %v5475_v34 = vadd.f32 %v6286_v40, %v5474_v21 }
 0x898   :  { %v6354_v33 = vpop.f32.mrf.mxu0 }
 0x899   :  { %v5496_v32 = vmax.f32 %v5475_v34, 0.0 }
 0x89a   :  { %v5477_v12 = vpop.f32.mrf.mxu0 }
 0x89b   :  { %v5478_v43 = vadd.f32 %v6286_v40, %v5477_v12 }
 0x89c   :  { %v6355_v63 = vpop.f32.mrf.mxu0 }
 0x89d   :  { %v5497_v47 = vmax.f32 %v5478_v43, 0.0 }
 0x89e   :  { %v5482_v51 = vpop.f32.mrf.mxu0 }
 0x89f   :  { %v5501_v54 = vpack.c.bf16 %v5497_v47, %v5496_v32  ;;  %v5483_v37 = vadd.f32 %v6286_v40, %v5482_v51 }
 0x8a0   :  { %v6358_v13 = vpop.f32.mrf.mxu0 }
 0x8a1   :  { %6377 = vmatmul.mubr.msk.bf16.vlgmr.msra.gmra.mxu0 %vm5555_vm14, %v5501_v54  ;;  %v5498_v39 = vmax.f32 %v5483_v37, 0.0 }
 0x8a2   :  { %v5485_v60 = vpop.f32.mrf.mxu0  ;;  %6380 = vmatprep.mubr.msk.bf16.mxu0 %vm6736_vm11, %v6735_v19 }
 0x8a3   :  { %v5486_v2 = vadd.f32 %v6286_v40, %v5485_v60 }
 0x8a4   :  { %v6359_v0 = vpop.f32.mrf.mxu0 }
 0x8a5   :  { %v5499_v50 = vmax.f32 %v5486_v2, 0.0 }
 0x8a6   :  { %v5490_v30 = vpop.f32.mrf.mxu0 }
 0x8a7   :  { %v5502_v6 = vpack.c.bf16 %v5499_v50, %v5498_v39  ;;  %v5491_v31 = vadd.f32 %v6286_v40, %v5490_v30 }
 0x8a8   :  { %v6362_v9 = vpop.f32.mrf.mxu0 }
 0x8a9   :  { %6381 = vmatmul.mubr.msk.bf16.gmra.mxu0 %vm5555_vm14, %v5502_v6  ;;  %v5500_v42 = vmax.f32 %v5491_v31, 0.0 }
 0x8aa   :  { %v5493_v7 = vpop.f32.mrf.mxu0  ;;  %6384 = vmatprep.mubr.msk.bf16.mxu0 %vm6736_vm11, %v6735_v19 }
 0x8ab   :  { %v5503_v20 = vpack.c.bf16 %v5500_v42, %v5500_v42 }
 0x8ac   :  { %v6363_v35 = vpop.f32.mrf.mxu0 }
 0x8b1   :  { %6385 = vmatmul.mubr.msk.bf16.gmra.mxu0 %vm5555_vm14, %v5503_v20 }
 0x961   :  { %v5603_v61 = vpop.f32.mrf.mxu0 }
 0x962   :  { %v5604_v58 = vadd.f32 %v6298_v23, %v5603_v61 }
 0x963   :  { %v6378_v46 = vpop.f32.mrf.mxu0 }
 0x965   :  { %v5606_v44 = vpop.f32.mrf.mxu0 }
 0x966   :  { %v5607_v48 = vadd.f32 %v6298_v23, %v5606_v44 }
 0x967   :  { %v6379_v57 = vpop.f32.mrf.mxu0 }
 0x969   :  { %v5611_v56 = vpop.f32.mrf.mxu0 }
 0x96a   :  { %v5612_v25 = vadd.f32 %v6298_v23, %v5611_v56 }
 0x96b   :  { %v6382_v18 = vpop.f32.mrf.mxu0 }
 0x96d   :  { %v5614_v10 = vpop.f32.mrf.mxu0 }
 0x96e   :  { %v5615_v3 = vadd.f32 %v6298_v23, %v5614_v10 }
 0x96f   :  { %v6383_v1 = vpop.f32.mrf.mxu0 }
 0x971   :  { %v5619_v49 = vpop.f32.mrf.mxu0 }
 0x972   :  { %v5620_v55 = vadd.f32 %v6298_v23, %v5619_v49 }
 0x973   :  { %v6386_v4 = vpop.f32.mrf.mxu0 }
 0x974   :  { %6389 = vmatpush3.msk.msra.mxu1 %vm2975_vm7, %v5620_v55 }
 0x975   :  { %v5622_v29 = vpop.f32.mrf.mxu0  ;;  %6390 = vmatprep.subr.mxu1 %v6735_v19 }
 0x976   :  { %6391 = vmatpush3.msra.mxu1 %v5615_v3 }
 0x977   :  { %v6387_v17 = vpop.f32.mrf.mxu0  ;;  %6392 = vmatprep.subr.mxu1 %v6735_v19 }
 0x978   :  { %6393 = vmatpush3.msra.mxu1 %v5612_v25 }
 0x979   :  { %6394 = vmatprep.subr.mxu1 %v6735_v19 }
 0x97a   :  { %6395 = vmatpush3.msra.mxu1 %v5607_v48 }
 0x97b   :  { %6396 = vmatprep.subr.mxu1 %v6735_v19 }
 0x97c   :  { %6397 = vmatpush3.msra.mxu1 %v5604_v58 }
 0x97d   :  { %6399 = vmatmul.mubr.msk.f32.vlgmr.msra.gmra.mxu1 %vm5626_vm15, %v5625_v8 }
 0xa3d   :  { %v5699_v38 = vpop.f32.mrf.mxu1 }
 0xa3e   :  { %5703 = vst [vmem:[%s9868_s15] sm:$0xff] %v5699_v38 }
 0xa3f   :  { %v6400_v52 = vpop.f32.mrf.mxu1 }

</bundles_post_ra>
